<compile_context>
chip_gen: v5e
topology: v5e:2x2
jax: 0.10.0
libtpu: 0.0.40
codegen_flags: <defaults>
</compile_context>

<pallas_src>
import functools

import jax
import jax.numpy as jnp
import numpy as np
from jax.experimental import pallas as pl
from jax.experimental.pallas import tpu as pltpu


def _ceil_div(a: int, b: int) -> int:
    return -(-a // b)


def _poly_kernel(x_ref, o_ref, *, degree: int, chunk_cols: int):
    """x_ref: (TM, D) VMEM tile.  o_ref: (TM, D + D^2 + ... + D^degree) tile."""
    x_in = x_ref[...]
    tm, d = x_in.shape
    out_dtype = o_ref.dtype

    if degree == 1:
        o_ref[...] = x_in
        return

    narrow_float = (jnp.issubdtype(x_in.dtype, jnp.floating)
                    and jnp.dtype(x_in.dtype).itemsize < 4)
    # Chain powers in f32 for bf16/f16 inputs; final-degree bulk in out dtype.
    compute_dtype = jnp.float32 if narrow_float else x_in.dtype
    final_dtype = out_dtype if narrow_float else compute_dtype
    x = x_in.astype(compute_dtype)

    # ---- static column layout of one output row --------------------------
    prefix = sum(d ** k for k in range(1, degree))       # degrees 1..degree-1
    final_w = d ** degree                                 # final degree width
    out_dim = prefix + final_w
    # Peel leading final-degree columns into the prefix slab so the slab ends
    # on a 128-lane boundary; all following chunk stores start lane-aligned.
    aligned_prefix = min(prefix + ((-prefix) % 128), out_dim)
    peel = aligned_prefix - prefix
    chunk_w = max(128, (chunk_cols // 128) * 128)         # 128-lane chunks
    chunk_starts = list(range(peel, final_w, chunk_w))    # cols in final power

    # ---- hoisted lane-tiled copies of x: tiled[:, i*d + j] == x[:, j] -----
    def make_tiled(width, dtype):
        k = width // d
        xv = x.astype(dtype)
        return jnp.broadcast_to(xv[:, None, :], (tm, k, d)).reshape(tm, width)

    inter_widths = [d ** deg for deg in range(2, degree)]
    if peel > 0:
        inter_widths.append(_ceil_div(peel, d) * d)
    chunk_tile_widths = []
    for c0 in chunk_starts:
        w = min(chunk_w, final_w - c0)
        a0, a1 = c0 // d, _ceil_div(c0 + w, d)
        chunk_tile_widths.append((a1 - a0) * d)

    xt_c = make_tiled(max(inter_widths), compute_dtype) if inter_widths else None
    xt_f = None
    if chunk_tile_widths:
        w_f = max(chunk_tile_widths)
        if final_dtype == compute_dtype and xt_c is not None and xt_c.shape[1] >= w_f:
            xt_f = xt_c
        else:
            xt_f = make_tiled(w_f, final_dtype)

    # ---- power chain: degrees 2 .. degree-1 (kept whole; also output segs)
    segs = [x]
    cur = x
    for deg in range(2, degree):
        k = cur.shape[1]
        rep = jnp.broadcast_to(cur[:, :, None], (tm, k, d)).reshape(tm, k * d)
        cur = rep * xt_c[:, :k * d]
        segs.append(cur)

    def final_cols(c0, w, xt, dtype):
        """Columns [c0, c0 + w) of the final-degree power, shape (TM, w)."""
        a0, a1 = c0 // d, _ceil_div(c0 + w, d)
        kk = a1 - a0
        cs = cur[:, a0:a1].astype(dtype)
        rep = jnp.broadcast_to(cs[:, :, None], (tm, kk, d)).reshape(tm, kk * d)
        strip = rep * xt[:, :kk * d]
        off = c0 - a0 * d
        if off == 0 and w == kk * d:
            return strip
        return strip[:, off:off + w]

    if peel > 0:
        segs.append(final_cols(0, peel, xt_c, compute_dtype))

    # One lane-dense store for everything up to the 128-aligned boundary.
    slab = segs[0] if len(segs) == 1 else jnp.concatenate(segs, axis=1)
    o_ref[:, 0:aligned_prefix] = slab.astype(out_dtype)

    # Final-degree bulk: 128-lane-aligned chunk stores (only the very last
    # chunk may be ragged -> at most one masked store per row tile).
    # TODO(synk): switch this static unroll to lax.fori_loop over a
    # VMEM-staged `cur` when the chunk count gets large enough to bloat the
    # program / vreg live ranges.
    for c0 in chunk_starts:
        w = min(chunk_w, final_w - c0)
        seg = final_cols(c0, w, xt_f, final_dtype)
        col = prefix + c0          # == aligned_prefix + (c0 - peel), mult of 128
        o_ref[:, col:col + w] = seg.astype(out_dtype)


def _vmem_capacity_bytes() -> int:
    try:
        return int(pltpu.get_tpu_info().vmem_capacity_bytes)
    except Exception:
        return 64 * 1024 * 1024     # conservative default (v7x per-TC size)


def _choose_tm(m: int, d: int, degree: int, out_dim: int, itemsize: int,
               chunk_cols: int, budget: int) -> int:
    """Row tile: as large as the VMEM budget allows, honoring the (8,128) rule."""
    if m <= 8:
        return max(1, m)            # single block; row dim == full array extent
    prefix = sum(d ** k for k in range(1, degree))
    final_w = d ** degree
    chunk_w = max(128, (chunk_cols // 128) * 128)
    # Per-row VMEM bytes: double-buffered I/O blocks + in-kernel intermediates
    # (<=f32 prefix slab, cur chain, tiled-x copies, ~2 live final strips).
    comp = 4 * (prefix + 128 + d ** max(degree - 1, 1)
                + 3 * min(chunk_w + 2 * d, final_w))
    per_row = 2 * d * itemsize + 2 * out_dim * itemsize + comp
    tm = int(budget // max(per_row, 1))
    tm = max(8, (min(1024, tm) // 8) * 8)
    tm = min(tm, (m // 8) * 8)      # never exceed the array's row extent
    # Keep >= 2 grid steps for larger inputs so a 2-TC chip (v7x) can shard
    # rows via dimension_semantics=("parallel",); the extra ~0.35us step is
    # negligible at this size even on single-TC v5e/v6e.
    if m >= 256 and tm >= m:
        half = _ceil_div(_ceil_div(m, 2), 8) * 8
        tm = min(tm, half)
    return max(8, tm)


def polynomial_features(x: jax.Array, degree: int, *, tm: int | None = None,
                        chunk_cols: int | None = None) -> jax.Array:
    """Pallas version of PolynomialFeatures(degree)(x).  x: [..., D]."""
    assert degree >= 1
    *batch, d = x.shape
    m = int(np.prod(batch)) if batch else 1
    out_dim = sum(d ** k for k in range(1, degree + 1))
    itemsize = jnp.dtype(x.dtype).itemsize

    # Generation-aware VMEM sizing: ~40% of physical VMEM for the data blocks,
    # scoped limit well below physical (128 MiB on v5e/v6e, 64 MiB/TC on v7x).
    vmem_cap = _vmem_capacity_bytes()
    budget = (vmem_cap * 2) // 5
    vmem_limit = int(min(vmem_cap * 4 // 5, vmem_cap - (4 << 20)))
    if chunk_cols is None:
        # Longer final-degree store bursts where VMEM headroom allows.
        chunk_cols = 512 if vmem_cap <= (64 << 20) else 1024

    if tm is None:
        tm = _choose_tm(m, d, degree, out_dim, itemsize, chunk_cols, budget)
    grid0 = pl.cdiv(m, tm)

    x2 = x.reshape(m, d)

    cost = pl.CostEstimate(
        flops=m * sum(d ** k for k in range(2, degree + 1)),
        transcendentals=0,
        bytes_accessed=m * (d + out_dim) * itemsize,
    )

    # Ragged M: output keeps its exact (m, out_dim) shape; Pallas clips the
    # last partial row block (no extra XLA pad/slice pass over the output).
    out = pl.pallas_call(
        functools.partial(_poly_kernel, degree=degree, chunk_cols=chunk_cols),
        out_shape=jax.ShapeDtypeStruct((m, out_dim), x.dtype),
        grid=(grid0,),
        in_specs=[pl.BlockSpec((tm, d), lambda i: (i, 0))],
        out_specs=pl.BlockSpec((tm, out_dim), lambda i: (i, 0)),
        compiler_params=pltpu.CompilerParams(
            dimension_semantics=("parallel",),
            vmem_limit_bytes=vmem_limit),
        cost_estimate=cost,
    )(x2)

    return out.reshape(*batch, out_dim)


def polynomial_features_ref(x: jax.Array, degree: int) -> jax.Array:
    """Pure-JAX reference mirroring the PyTorch forward exactly."""
    parts = [x]
    for _ in range(1, degree):
        p = jnp.einsum('...i,...j->...ij', parts[-1], x)
        parts.append(p.reshape(*p.shape[:-2], -1))
    return jnp.concatenate(parts, axis=-1)


if __name__ == "__main__":
    degree = 3
    B, N, D = 2, 8, 8                                 # small shapes: batch=2, seq=8, hidden=8
    key = jax.random.PRNGKey(0)
    x = jax.random.normal(key, (B, N, D), dtype=jnp.float32)

    out = jax.block_until_ready(polynomial_features(x, degree))
    ref = polynomial_features_ref(x, degree)
    assert out.shape == (B, N, D + D ** 2 + D ** 3), out.shape
    np.testing.assert_allclose(np.asarray(out), np.asarray(ref),
                               rtol=1e-5, atol=1e-5)

    # Ragged row count (M=15) exercises the clipped partial last block
    # (no wrapper pad + output slice pass anymore).
    x2 = jax.random.normal(jax.random.PRNGKey(1), (3, 5, 8), dtype=jnp.float32)
    out2 = jax.block_until_ready(polynomial_features(x2, 2))
    ref2 = polynomial_features_ref(x2, 2)
    np.testing.assert_allclose(np.asarray(out2), np.asarray(ref2),
                               rtol=1e-5, atol=1e-5)

    # bf16 path: f32 power chain, bf16 final-degree bulk (loose tolerance —
    # the kernel is more accurate than a pure-bf16 chain, not bit-identical).
    xb = jax.random.normal(jax.random.PRNGKey(2), (4, 8, 16), dtype=jnp.bfloat16)
    outb = jax.block_until_ready(polynomial_features(xb, 3))
    refb = polynomial_features_ref(xb.astype(jnp.float32), 3)
    np.testing.assert_allclose(np.asarray(outb, dtype=np.float32),
                               np.asarray(refb), rtol=0.06, atol=0.05)

    print("KERNEL_OK")
</pallas_src>

<mosaic_0001>
module attributes {stable_mosaic.version = 11 : i64} {
  func.func @_poly_kernel(%arg0: i32, %arg1: memref<16x8xf32, #tpu.memory_space<vmem>>, %arg2: memref<16x584xf32, #tpu.memory_space<vmem>>) attributes {dimension_semantics = [#tpu.dimension_semantics<parallel>], iteration_bounds = array<i64: 1>, scalar_prefetch = 0 : i64, scratch_operands = 0 : i64, tpu.core_type = #tpu.core_type<tc>, window_params = [{transform_indices = @transform_0, window_bounds = array<i64: 16, 8>}, {transform_indices = @transform_1, window_bounds = array<i64: 16, 584>}]} {
    %c0 = arith.constant 0 : index
    %c0_0 = arith.constant 0 : index
    %0 = vector.load %arg1[%c0, %c0_0] : memref<16x8xf32, #tpu.memory_space<vmem>>, vector<16x8xf32>
    %1 = vector.shape_cast %0 : vector<16x8xf32> to vector<16x1x8xf32>
    %2 = vector.shape_cast %1 : vector<16x1x8xf32> to vector<16x1x8xf32>
    %3 = vector.broadcast %2 : vector<16x1x8xf32> to vector<16x8x8xf32>
    %4 = vector.shape_cast %3 : vector<16x8x8xf32> to vector<16x64xf32>
    %5 = vector.shape_cast %0 : vector<16x8xf32> to vector<16x1x8xf32>
    %6 = vector.shape_cast %5 : vector<16x1x8xf32> to vector<16x1x8xf32>
    %7 = vector.broadcast %6 : vector<16x1x8xf32> to vector<16x57x8xf32>
    %8 = vector.shape_cast %7 : vector<16x57x8xf32> to vector<16x456xf32>
    %9 = vector.shape_cast %0 : vector<16x8xf32> to vector<16x8x1xf32>
    %10 = vector.shape_cast %9 : vector<16x8x1xf32> to vector<16x8x1xf32>
    %11 = vector.broadcast %10 : vector<16x8x1xf32> to vector<16x8x8xf32>
    %12 = vector.shape_cast %11 : vector<16x8x8xf32> to vector<16x64xf32>
    %13 = arith.mulf %12, %4 : vector<16x64xf32>
    %14 = vector.extract_strided_slice %13 {offsets = [0, 0], sizes = [16, 7], strides = [1, 1]} : vector<16x64xf32> to vector<16x7xf32>
    %15 = vector.shape_cast %14 : vector<16x7xf32> to vector<16x7x1xf32>
    %16 = vector.shape_cast %15 : vector<16x7x1xf32> to vector<16x7x1xf32>
    %17 = vector.broadcast %16 : vector<16x7x1xf32> to vector<16x7x8xf32>
    %18 = vector.shape_cast %17 : vector<16x7x8xf32> to vector<16x56xf32>
    %19 = vector.extract_strided_slice %4 {offsets = [0, 0], sizes = [16, 56], strides = [1, 1]} : vector<16x64xf32> to vector<16x56xf32>
    %20 = arith.mulf %18, %19 : vector<16x56xf32>
    %21 = tpu.concatenate %0, %13, %20 in 1 : vector<16x8xf32>, vector<16x64xf32>, vector<16x56xf32> -> vector<16x128xf32>
    %c0_1 = arith.constant 0 : index
    %c0_2 = arith.constant 0 : index
    %22 = vector.load %arg2[%c0_1, %c0_2] : memref<16x584xf32, #tpu.memory_space<vmem>>, vector<16x128xf32>
    tpu.vector_store %arg2[%c0_1, %c0_2], %21 {strides = array<i32>} : memref<16x584xf32, #tpu.memory_space<vmem>>, vector<16x128xf32>,
    %23 = vector.extract_strided_slice %13 {offsets = [0, 7], sizes = [16, 57], strides = [1, 1]} : vector<16x64xf32> to vector<16x57xf32>
    %24 = vector.shape_cast %23 : vector<16x57xf32> to vector<16x57x1xf32>
    %25 = vector.shape_cast %24 : vector<16x57x1xf32> to vector<16x57x1xf32>
    %26 = vector.broadcast %25 : vector<16x57x1xf32> to vector<16x57x8xf32>
    %27 = vector.shape_cast %26 : vector<16x57x8xf32> to vector<16x456xf32>
    %28 = arith.mulf %27, %8 : vector<16x456xf32>
    %c0_3 = arith.constant 0 : index
    %c128 = arith.constant 128 : index
    %29 = vector.load %arg2[%c0_3, %c128] : memref<16x584xf32, #tpu.memory_space<vmem>>, vector<16x456xf32>
    tpu.vector_store %arg2[%c0_3, %c128], %28 {strides = array<i32>} : memref<16x584xf32, #tpu.memory_space<vmem>>, vector<16x456xf32>,
    return
  }
  func.func @transform_0(%arg0: i32) -> (i32, i32) {
    %c0_i32 = arith.constant 0 : i32
    %c0_i32_0 = arith.constant 0 : i32
    return %arg0, %c0_i32 : i32, i32
  }
  func.func @transform_1(%arg0: i32) -> (i32, i32) {
    %c0_i32 = arith.constant 0 : i32
    %c0_i32_0 = arith.constant 0 : i32
    return %arg0, %c0_i32 : i32, i32
  }
}

</mosaic_0001>

<bundles_post_ra>
// kernel: tpu_custom_call.1
= control target key start
LH: loop header
LB: loop body
LE: loop exit
PB: predicated region body
PF: predicated region fallthrough
CT: control target
= control target key end

     0   :  { %vm60_vm0 = vcmask 1047556   ;;  %v4396_v16 = vmov 1983009808   ;;  %v4397_v21 = vmov 1934713408   ;;  %s7282_s0 = inlined_call_operand.vmem [shape: f32[16,8], index: 0, kind: input, shape index: {}]   ;;  %s7283_s1 = inlined_call_operand.hbm [shape: f32[16,584], index: 1, kind: output, shape index: {}]  }
   0x1   :  { %v4428_v0 = vld [vmem:[%s7282_s0] sm:$0xff]  ;;  %v65_v17 = vunpack.c.l.s4 %v4396_v16  ;;  %v113_v22 = vunpack.c.l.s4 %v4397_v21  ;;  %v4465_v27 = vld [vmem:[%s7282_s0 + $0x8] sm:$0xff] }
   0x2   :  { %v13_v1 = vrot.slane %v4428_v0, 1  ;;  %v14_v2 = vrot.slane %v4428_v0, 2  ;;  %v15_v3 = vrot.slane %v4428_v0, 3  ;;  %v16_v4 = vrot.slane %v4428_v0, 4 }
   0x3   :  { %v17_v5 = vrot.slane %v4428_v0, 5  ;;  %v18_v6 = vrot.slane %v4428_v0, 6  ;;  %v19_v7 = vrot.slane %v4428_v0, 7  ;;  %v4438_v8 = vperm.slane %v4428_v0, 0 }
   0x4   :  { %v4440_v9 = vperm.slane %v13_v1, 0  ;;  %v4442_v10 = vperm.slane %v14_v2, 0  ;;  %v4444_v11 = vperm.slane %v15_v3, 0  ;;  %v4446_v12 = vperm.slane %v16_v4, 0 }
   0x5   :  { %v4448_v13 = vperm.slane %v17_v5, 0  ;;  %v4450_v14 = vperm.slane %v18_v6, 0  ;;  %v4452_v15 = vperm.slane %v19_v7, 0  ;;  %v4457_v23 = vunpack.c.0.s8 %v65_v17 }
   0x6   :  { %v59_v18 = vrot.slane %v4442_v10, 4  ;;  %v72_v19 = vrot.slane %v4444_v11, 4  ;;  %v74_v20 = vrot.slane %v4440_v9, 4  ;;  %v4471_v30 = vunpack.c.0.s8 %v113_v22 }
   0x7   :  { %v84_v24 = vrot.slane %v4450_v14, 4  ;;  %v96_v25 = vrot.slane %v4452_v15, 4  ;;  %v98_v26 = vrot.slane %v4448_v13, 4  ;;  %v20_v31 = vrot.slane %v4465_v27, 1 }
   0x8   :  { %v61_v28 = vsel %vm60_vm0, %v59_v18, %v4438_v8  ;;  %v73_v29 = vsel %vm60_vm0, %v72_v19, %v4440_v9 }
   0x9   :  { %6 = vsyncpa [#allocation3], 0  ;;  %v67_v32 = vperm.slane %v61_v28, %v4457_v23  ;;  %v79_v33 = vperm.slane %v73_v29, %v4457_v23  ;;  %v85_v34 = vsel %vm60_vm0, %v84_v24, %v4446_v12  ;;  %v97_v35 = vsel %vm60_vm0, %v96_v25, %v4448_v13  ;;  %s4398_s10 = smov 8   ;;  %s4399_s11 = smov 24  }
   0xa   :  { %v91_v36 = vperm.slane %v85_v34, %v4457_v23  ;;  %v103_v37 = vperm.slane %v97_v35, %v4457_v23  ;;  %v21_v38 = vrot.slane %v4465_v27, 2  ;;  %v22_v39 = vrot.slane %v4465_v27, 3  ;;  %s4400_s12 = smov 16   ;;  %s4401_s13 = smov 32  }
   0xb   :  { %v110_v40 = vrot.slane %v67_v32, 4  ;;  %v108_v41 = vrot.slane %v79_v33, 4  ;;  %v23_v42 = vrot.slane %v4465_v27, 4  ;;  %v24_v43 = vrot.slane %v4465_v27, 5  ;;  %s4402_s14 = smov 40   ;;  %s4403_s15 = smov 48  }
   0xc   :  { %v134_v44 = vrot.slane %v91_v36, 4  ;;  %v132_v45 = vrot.slane %v103_v37, 4  ;;  %v25_v46 = vrot.slane %v4465_v27, 6  ;;  %v26_v47 = vrot.slane %v4465_v27, 7  ;;  %s4404_s16 = smov 56   ;;  %s4405_s17 = smov 64  }
   0xd   :  { %v111_v48 = vsel %vm60_vm0, %v79_v33, %v110_v40  ;;  %v109_v49 = vsel %vm60_vm0, %v108_v41, %v67_v32  ;;  %v4491_v50 = vperm.slane %v4465_v27, 0  ;;  %v36_v51 = vperm.slane %v20_v31, 0  ;;  %s4406_s18 = smov 72   ;;  %s4407_s19 = smov 80  }
   0xe   :  { %v119_v52 = vperm.slane %v111_v48, %v4471_v30  ;;  %v135_v53 = vsel %vm60_vm0, %v103_v37, %v134_v44  ;;  %v4496_v54 = vperm.slane %v109_v49, %v4471_v30  ;;  %v133_v55 = vsel %vm60_vm0, %v132_v45, %v91_v36  ;;  %s4408_s20 = smov 88   ;;  %s4409_s21 = smov 96  }
   0xf   :  { %v143_v56 = vperm.slane %v135_v53, %v4471_v30  ;;  %v4501_v57 = vperm.slane %v133_v55, %v4471_v30  ;;  %v37_v58 = vperm.slane %v21_v38, 0  ;;  %v38_v59 = vperm.slane %v22_v39, 0  ;;  %s4410_s22 = smov 104   ;;  %s4411_s23 = smov 112  }
  0x10   :  { %v158_v60 = vrot.slane %v4496_v54, 4  ;;  %v162_v61 = vrot.slane %v119_v52, 4  ;;  %v39_v62 = vperm.slane %v23_v42, 0  ;;  %v40_v63 = vperm.slane %v24_v43, 0  ;;  %s4412_s24 = smov 120   ;;  %s4223_s30 = sshll.u32 %s7283_s1, 4  ;;  %s4224_s30 = int_to_ptr.hbm [resolvable:$true] %s4223_s30 }
  0x11   :  { %v160_v1 = vrot.slane %v143_v56, 4  ;;  %v41_v2 = vperm.slane %v25_v46, 0  ;;  %v42_v3 = vperm.slane %v26_v47, 0  ;;  %v172_v4 = vrot.slane %v37_v58, 4  ;;  %s4413_s2 = smov [#allocation2]   ;;  %s4414_s4 = smov 640  }
  0x12   :  { %v4506_v5 = vsel %vm60_vm0, %v4501_v57, %v158_v60  ;;  %v4509_v6 = vsel %vm60_vm0, %v143_v56, %v162_v61  ;;  %v184_v7 = vrot.slane %v38_v59, 4  ;;  %v174_v16 = vrot.slane %v4491_v50, 4  ;;  %s4221_s3 = sshll.u32 %s4413_s2, 4  ;;  %s4222_s3 = int_to_ptr.vmem [resolvable:$true] %s4221_s3 }
  0x13   :  { %v4513_v17 = vsel %vm60_vm0, %v160_v1, %v119_v52  ;;  %286 = vrot.lane.b32.xlu0 %v4506_v5, %s4398_s10  ;;  %302 = vrot.lane.b32.xlu2 %v4509_v6, %s4399_s11  ;;  %v173_v18 = vsel %vm60_vm0, %v172_v4, %v4491_v50  ;;  %v196_v19 = vrot.slane %v41_v2, 4  ;;  %v208_v21 = vrot.slane %v42_v3, 4 }
  0x14   :  { %294 = vrot.lane.b32.xlu1 %v4513_v17, %s4400_s12  ;;  %v179_v22 = vperm.slane %v173_v18, %v4457_v23  ;;  %v185_v24 = vsel %vm60_vm0, %v184_v7, %v36_v51  ;;  %v175_v25 = vsel %vm60_vm0, %v37_v58, %v174_v16  ;;  %v186_v28 = vrot.slane %v36_v51, 4 }
  0x15   :  { %v191_v29 = vperm.slane %v185_v24, %v4457_v23  ;;  %v197_v31 = vsel %vm60_vm0, %v196_v19, %v39_v62  ;;  %v209_v32 = vsel %vm60_vm0, %v208_v21, %v40_v63  ;;  %v4530_v33 = vperm.slane %v175_v25, %v4457_v23 }
  0x16   :  { %v203_v34 = vperm.slane %v197_v31, %v4457_v23  ;;  %v215_v35 = vperm.slane %v209_v32, %v4457_v23  ;;  %v222_v36 = vrot.slane %v179_v22, 4  ;;  %v187_v37 = vsel %vm60_vm0, %v38_v59, %v186_v28 }
  0x17   :  { %v220_v38 = vrot.slane %v191_v29, 4  ;;  %v195_v39 = vperm.slane %v187_v37, %v4457_v23  ;;  %v198_v40 = vrot.slane %v39_v62, 4  ;;  %v210_v41 = vrot.slane %v40_v63, 4 }
  0x18   :  { %v223_v42 = vsel %vm60_vm0, %v191_v29, %v222_v36  ;;  %v246_v43 = vrot.slane %v203_v34, 4  ;;  %v244_v44 = vrot.slane %v215_v35, 4  ;;  %v62_v45 = vrot.slane %v4438_v8, 4 }
  0x19   :  { %v231_v46 = vperm.slane %v223_v42, %v4471_v30  ;;  %v221_v47 = vsel %vm60_vm0, %v220_v38, %v179_v22  ;;  %v199_v48 = vsel %vm60_vm0, %v41_v2, %v198_v40  ;;  %v211_v49 = vsel %vm60_vm0, %v42_v3, %v210_v41 }
  0x1a   :  { %v247_v51 = vsel %vm60_vm0, %v215_v35, %v246_v43  ;;  %v4544_v52 = vperm.slane %v221_v47, %v4471_v30  ;;  %v245_v53 = vsel %vm60_vm0, %v244_v44, %v203_v34  ;;  %v207_v55 = vperm.slane %v199_v48, %v4457_v23 }
  0x1b   :  { %v255_v56 = vperm.slane %v247_v51, %v4471_v30  ;;  %v4550_v58 = vperm.slane %v245_v53, %v4471_v30  ;;  %v274_v59 = vrot.slane %v231_v46, 4  ;;  %v219_v60 = vperm.slane %v211_v49, %v4457_v23 }
  0x1c   :  { %v270_v61 = vrot.slane %v4544_v52, 4  ;;  %v232_v62 = vrot.slane %v195_v39, 4  ;;  %v63_v63 = vsel %vm60_vm0, %v4442_v10, %v62_v45  ;;  %v75_v1 = vsel %vm60_vm0, %v4444_v11, %v74_v20 }
  0x1d   :  { %v272_v2 = vrot.slane %v255_v56, 4  ;;  %v4561_v3 = vsel %vm60_vm0, %v255_v56, %v274_v59  ;;  %v256_v4 = vrot.slane %v219_v60, 4  ;;  %v71_v7 = vperm.slane %v63_v63, %v4457_v23 }
  0x1e   :  { %v4566_v16 = vsel %vm60_vm0, %v4550_v58, %v270_v61  ;;  %304 = vrot.lane.b32.xlu2 %v4561_v3, %s4399_s11  ;;  %v233_v9 = vsel %vm60_vm0, %v232_v62, %v4530_v33  ;;  %v83_v10 = vperm.slane %v75_v1, %v4457_v23  ;;  %v86_v11 = vrot.slane %v4446_v12, 4 }
  0x1f   :  { %v4575_v20 = vsel %vm60_vm0, %v272_v2, %v231_v46  ;;  %288 = vrot.lane.b32.xlu0 %v4566_v16, %s4398_s10  ;;  %v257_v18 = vsel %vm60_vm0, %v256_v4, %v207_v55  ;;  %v99_v19 = vsel %vm60_vm0, %v4452_v15, %v98_v26  ;;  %v239_v25 = vperm.slane %v233_v9, %v4471_v30 }
  0x20   :  { %296 = vrot.lane.b32.xlu1 %v4575_v20, %s4400_s12  ;;  %v263_v21 = vperm.slane %v257_v18, %v4471_v30  ;;  %v87_v12 = vsel %vm60_vm0, %v4450_v14, %v86_v11  ;;  %v107_v22 = vperm.slane %v99_v19, %v4457_v23  ;;  %v120_v24 = vrot.slane %v83_v10, 4 }
  0x21   :  { %v95_v28 = vperm.slane %v87_v12, %v4457_v23  ;;  %v122_v29 = vrot.slane %v71_v7, 4  ;;  %v234_v13 = vrot.slane %v4530_v33, 4  ;;  %v258_v32 = vrot.slane %v207_v55, 4 }
  0x22   :  { %v276_v31 = vrot.slane %v263_v21, 4  ;;  %v121_v15 = vsel %vm60_vm0, %v120_v24, %v71_v7  ;;  %v144_v26 = vrot.slane %v107_v22, 4  ;;  %v278_v53 = vrot.slane %v239_v25, 4 }
  0x23   :  { %v127_v34 = vperm.slane %v121_v15, %v4471_v30  ;;  %v146_v35 = vrot.slane %v95_v28, 4  ;;  %v123_v36 = vsel %vm60_vm0, %v83_v10, %v122_v29  ;;  %v235_v42 = vsel %vm60_vm0, %v195_v39, %v234_v13 }
  0x24   :  { %v145_v14 = vsel %vm60_vm0, %v144_v26, %v95_v28  ;;  %v277_v37 = vsel %vm60_vm0, %v276_v31, %v239_v25  ;;  %v259_v43 = vsel %vm60_vm0, %v219_v60, %v258_v32  ;;  %v131_v47 = vperm.slane %v123_v36, %v4471_v30 }
  0x25   :  { %v151_v38 = vperm.slane %v145_v14, %v4471_v30  ;;  %v166_v40 = vrot.slane %v127_v34, 4  ;;  %v147_v41 = vsel %vm60_vm0, %v107_v22, %v146_v35  ;;  %v267_v46 = vperm.slane %v259_v43, %v4471_v30 }
  0x26   :  { %v155_v33 = vperm.slane %v147_v41, %v4471_v30  ;;  %v243_v39 = vperm.slane %v235_v42, %v4471_v30  ;;  %v279_v59 = vsel %vm60_vm0, %v263_v21, %v278_v53  ;;  %v156_v61 = vrot.slane %v4501_v57, 4 }
  0x27   :  { %v164_v44 = vrot.slane %v151_v38, 4  ;;  %v167_v45 = vsel %vm60_vm0, %v151_v38, %v166_v40  ;;  %v280_v51 = vrot.slane %v267_v46, 4  ;;  %v170_v62 = vrot.slane %v131_v47, 4 }
  0x28   :  { %312 = vrot.lane.b32.xlu1 %v277_v37, %s4401_s13  ;;  %318 = vrot.lane.b32.xlu2 %v167_v45, %s4402_s14  ;;  %v168_v49 = vrot.slane %v155_v33, 4  ;;  %v282_v60 = vrot.slane %v243_v39, 4  ;;  %v4621_v1 = vsel %vm60_vm0, %v156_v61, %v4496_v54  ;;  %v436_v57 = vlaneseq }
  0x29   :  { %v165_v48 = vsel %vm60_vm0, %v164_v44, %v127_v34  ;;  %v281_v56 = vsel %vm60_vm0, %v280_v51, %v243_v39  ;;  %v171_v2 = vsel %vm60_vm0, %v155_v33, %v170_v62  ;;  %v268_v4 = vrot.slane %v4550_v58, 4 }
  0x2a   :  { %310 = vrot.lane.b32.xlu0 %v165_v48, %s4401_s13  ;;  %v169_v55 = vsel %vm60_vm0, %v168_v49, %v131_v47  ;;  %v283_v63 = vsel %vm60_vm0, %v267_v46, %v282_v60  ;;  %v4629_v7 = vshrl.u32 %v436_v57, 7  ;;  %v470_v58 = vperm.slane %v4428_v0, 5 }
  0x2b   :  { %v4635_v54 = vsel %vm60_vm0, %v268_v4, %v4544_v52  ;;  %v463_v52 = vperm.slane %v4428_v0, 4  ;;  %v484_v9 = vperm.slane %v4428_v0, 7  ;;  %v505_v11 = vperm.slane %v4465_v27, 2 }
  0x2c   :  { %4255 = vset.pattern.permute.xlu1 %v4629_v7  ;;  %4254 = vset.pattern.permute.xlu0 %v4629_v7  ;;  %v519_v19 = vperm.slane %v4465_v27, 4  ;;  %v533_v21 = vperm.slane %v4465_v27, 6  ;;  %v540_v24 = vperm.slane %v4465_v27, 7  ;;  %vm340_vm1 = vcmask 64512  }
  0x2d   :  { %4256 = vset.pattern.permute.xlu2 %v4629_v7  ;;  %vm343_vm2 = vcmask 130048   ;;  %vm346_vm3 = vcmask 195584   ;;  %vm349_vm4 = vcmask 261120   ;;  %vm352_vm5 = vcmask 326656  }
  0x2e   :  { %vm355_vm6 = vcmask 392192   ;;  %vm358_vm7 = vcmask 457728   ;;  %vm414_vm8 = vcmask 588800   ;;  %vm411_vm9 = vcmask 523264  }
  0x2f   :  { %vm417_vm10 = vcmask 654336   ;;  %vm420_vm11 = vcmask 719872   ;;  %vm423_vm12 = vcmask 785408   ;;  %vm426_vm13 = vcmask 850944  }
  0x30   :  { %326 = vrot.lane.b32.xlu1 %v169_v55, %s4403_s15  ;;  %328 = vrot.lane.b32.xlu2 %v281_v56, %s4403_s15  ;;  %vm429_vm14 = vcmask 916480   ;;  %vm432_vm15 = vcmask 982016  }
  0x32   :  { %320 = vrot.lane.b32.xlu0 %v279_v59, %s4402_s14 }
  0x38   :  { %336 = vrot.lane.b32.xlu1 %v283_v63, %s4404_s16  ;;  %363 = vrot.lane.b32.xlu2 %v4621_v1, %s4405_s17 }
  0x3a   :  { %334 = vrot.lane.b32.xlu0 %v171_v2, %s4404_s16 }
  0x40   :  { %369 = vrot.lane.b32.xlu1 %v4506_v5, %s4406_s18  ;;  %371 = vrot.lane.b32.xlu2 %v4566_v16, %s4406_s18  ;;  %v442_v5 = vperm.slane %v4428_v0, 1  ;;  %v477_v16 = vperm.slane %v4428_v0, 6 }
  0x42   :  { %365 = vrot.lane.b32.xlu0 %v4635_v54, %s4405_s17 }
  0x48   :  { %377 = vrot.lane.b32.xlu1 %v4575_v20, %s4407_s19  ;;  %381 = vrot.lane.b32.xlu2 %v4509_v6, %s4408_s20  ;;  %v449_v6 = vperm.slane %v4428_v0, 2  ;;  %v512_v20 = vperm.slane %v4465_v27, 3 }
  0x4a   :  { %375 = vrot.lane.b32.xlu0 %v4513_v17, %s4407_s19  ;;  %v456_v17 = vperm.slane %v4428_v0, 3  ;;  %v526_v0 = vperm.slane %v4465_v27, 5 }
  0x50   :  { %387 = vrot.lane.b32.xlu1 %v165_v48, %s4409_s21  ;;  %389 = vrot.lane.b32.xlu2 %v277_v37, %s4409_s21 }
  0x52   :  { %383 = vrot.lane.b32.xlu0 %v4561_v3, %s4408_s20 }
  0x58   :  { %395 = vrot.lane.b32.xlu1 %v279_v59, %s4410_s22  ;;  %399 = vrot.lane.b32.xlu2 %v169_v55, %s4411_s23 }
  0x5a   :  { %393 = vrot.lane.b32.xlu0 %v167_v45, %s4410_s22 }
  0x60   :  { %405 = vrot.lane.b32.xlu1 %v171_v2, %s4412_s24  ;;  %407 = vrot.lane.b32.xlu2 %v283_v63, %s4412_s24 }
  0x62   :  { %401 = vrot.lane.b32.xlu0 %v281_v56, %s4411_s23 }
  0x68   :  { %447 = vperm.xlu1 %4255, %v442_v5   ;;  %454 = vperm.xlu2 %4256, %v449_v6  }
  0x6a   :  { %440 = vperm.xlu0 %4254, %v4438_v8   ;;  %v498_v8 = vperm.slane %v4465_v27, 1 }
  0x6d   :  { %v4666_v3 = vpop.permute.xlu2 %302 }
  0x70   :  { %461 = vperm.xlu1 %4255, %v456_v17   ;;  %468 = vperm.xlu2 %4256, %v463_v52  }
  0x72   :  { %475 = vperm.xlu0 %4254, %v470_v58  }
  0x78   :  { %482 = vperm.xlu1 %4255, %v477_v16   ;;  %489 = vperm.xlu2 %4256, %v484_v9   ;;  %v4670_v10 = vpop.permute.xlu2 %304 }
  0x7a   :  { %496 = vperm.xlu0 %4254, %v4491_v50  }
  0x80   :  { %503 = vperm.xlu1 %4255, %v498_v8   ;;  %510 = vperm.xlu2 %4256, %v505_v11  }
  0x82   :  { %517 = vperm.xlu0 %4254, %v512_v20   ;;  %v4676_v18 = vpop.permute.xlu2 %318 }
  0x85   :  { %v4681_v12 = vpop.permute.xlu0 %286 }
  0x86   :  { %v4683_v50 = vpop.permute.xlu1 %294 }
  0x88   :  { %524 = vperm.xlu1 %4255, %v519_v19   ;;  %531 = vperm.xlu2 %4256, %v526_v0  }
  0x8a   :  { %538 = vperm.xlu0 %4254, %v533_v21   ;;  %v4685_v22 = vpop.permute.xlu2 %328 }
  0x90   :  { %545 = vperm.xlu1 %4255, %v540_v24  }
  0x91   :  { %v4688_v25 = vpop.permute.xlu0 %288 }
  0x92   :  { %v4690_v28 = vpop.permute.xlu1 %296  ;;  %v4692_v29 = vpop.permute.xlu2 %363 }
  0x93   :  { %7353 = vst [vmem:[#allocation5_spill] sm:$0xff] %v4692_v29 }
  0x9a   :  { %v4694_v13 = vpop.permute.xlu1 %312  ;;  %v4698_v15 = vpop.permute.xlu2 %371 }
  0x9b   :  { %7354 = vst [vmem:[#allocation6_spill] sm:$0xff] %v4698_v15 }
  0x9c   :  { %v4696_v31 = vpop.permute.xlu0 %310 }
  0xa2   :  { %v4700_v26 = vpop.permute.xlu1 %326  ;;  %v4704_v34 = vpop.permute.xlu2 %381 }
  0xa3   :  { %7355 = vst [vmem:[#allocation7_spill] sm:$0xff] %v4704_v34 }
  0xa4   :  { %v4702_v32 = vpop.permute.xlu0 %320 }
  0xaa   :  { %v4706_v27 = vpop.permute.xlu1 %336  ;;  %v4710_v14 = vpop.permute.xlu2 %389 }
  0xab   :  { %7356 = vst [vmem:[#allocation8_spill] sm:$0xff] %v4710_v14 }
  0xac   :  { %v4708_v35 = vpop.permute.xlu0 %334 }
  0xb2   :  { %v4712_v36 = vpop.permute.xlu1 %369  ;;  %v4716_v38 = vpop.permute.xlu2 %399 }
  0xb3   :  { %7357 = vst [vmem:[#allocation9_spill] sm:$0xff] %v4712_v36 }
  0xb4   :  { %v4714_v37 = vpop.permute.xlu0 %365  ;;  %7359 = vst [vmem:[#allocation11_spill] sm:$0xff] %v4716_v38 }
  0xb5   :  { %7358 = vst [vmem:[#allocation10_spill] sm:$0xff] %v4714_v37 }
  0xba   :  { %v4718_v40 = vpop.permute.xlu1 %377  ;;  %v4724_v42 = vpop.permute.xlu2 %407 }
  0xbb   :  { %7360 = vst [vmem:[#allocation12_spill] sm:$0xff] %v4718_v40 }
  0xbc   :  { %v4720_v41 = vpop.permute.xlu0 %375  ;;  %7363 = vst [vmem:[#allocation15_spill] sm:$0xff] %v4724_v42 }
  0xbd   :  { %7361 = vst [vmem:[#allocation13_spill] sm:$0xff] %v4720_v41 }
  0xc2   :  { %v4722_v33 = vpop.permute.xlu1 %387  ;;  %v4732_v46 = vpop.permute.xlu2 %454 }
  0xc3   :  { %7362 = vst [vmem:[#allocation14_spill] sm:$0xff] %v4722_v33  ;;  %v547_v53 = vrot.slane %v4732_v46, 4 }
  0xc4   :  { %v4726_v43 = vpop.permute.xlu0 %383 }
  0xc5   :  { %7364 = vst [vmem:[#allocation16_spill] sm:$0xff] %v4726_v43 }
  0xca   :  { %v4728_v44 = vpop.permute.xlu1 %395  ;;  %v4738_v49 = vpop.permute.xlu2 %468 }
  0xcb   :  { %7365 = vst [vmem:[#allocation17_spill] sm:$0xff] %v4728_v44 }
  0xcc   :  { %v4730_v45 = vpop.permute.xlu0 %393 }
  0xcd   :  { %7366 = vst [vmem:[#allocation18_spill] sm:$0xff] %v4730_v45 }
  0xd2   :  { %v4734_v47 = vpop.permute.xlu1 %405  ;;  %v490_v55 = vpop.permute.xlu2 %489 }
  0xd3   :  { %7367 = vst [vmem:[#allocation19_spill] sm:$0xff] %v4734_v47  ;;  %v583_v59 = vrot.slane %v490_v55, 4 }
  0xd4   :  { %v4736_v48 = vpop.permute.xlu0 %401 }
  0xd5   :  { %7368 = vst [vmem:[#allocation20_spill] sm:$0xff] %v4736_v48 }
  0xda   :  { %v448_v39 = vpop.permute.xlu1 %447 }
  0xdc   :  { %v4740_v51 = vpop.permute.xlu0 %440 }
  0xdd   :  { %v548_v62 = vsel %vm60_vm0, %v547_v53, %v4740_v51 }
  0xde   :  { %v554_v4 = vperm.slane %v548_v62, %v4457_v23 }
  0xe0   :  { %v597_v11 = vrot.slane %v554_v4, 4 }
  0xe2   :  { %v462_v56 = vpop.permute.xlu1 %461 }
  0xe3   :  { %v559_v60 = vrot.slane %v462_v56, 4 }
  0xe4   :  { %v476_v61 = vpop.permute.xlu0 %475 }
  0xe5   :  { %v560_v63 = vsel %vm60_vm0, %v559_v60, %v448_v39  ;;  %v584_v57 = vsel %vm60_vm0, %v583_v59, %v476_v61 }
  0xe6   :  { %v566_v2 = vperm.slane %v560_v63, %v4457_v23  ;;  %v590_v6 = vperm.slane %v584_v57, %v4457_v23 }
  0xe8   :  { %v595_v5 = vrot.slane %v566_v2, 4  ;;  %v619_v20 = vrot.slane %v590_v6, 4  ;;  %v598_v60 = vsel %vm60_vm0, %v566_v2, %v597_v11 }
  0xea   :  { %v483_v17 = vpop.permute.xlu1 %482  ;;  %v596_v52 = vsel %vm60_vm0, %v595_v5, %v554_v4 }
  0xeb   :  { %v571_v58 = vrot.slane %v483_v17, 4  ;;  %v602_v8 = vperm.slane %v596_v52, %v4471_v30 }
  0xec   :  { %v4751_v16 = vpop.permute.xlu0 %496 }
  0xed   :  { %v572_v9 = vsel %vm60_vm0, %v571_v58, %v4738_v49  ;;  %v645_v53 = vrot.slane %v602_v8, 4  ;;  %v4767_v58 = vperm.slane %v598_v60, %v4471_v30 }
  0xee   :  { %v578_v19 = vperm.slane %v572_v9, %v4457_v23 }
  0xf0   :  { %v621_v0 = vrot.slane %v578_v19, 4  ;;  %v620_v21 = vsel %vm60_vm0, %v619_v20, %v578_v19  ;;  %v511_v20 = vpop.permute.xlu2 %510 }
  0xf1   :  { %v626_v24 = vperm.slane %v620_v21, %v4471_v30 }
  0xf2   :  { %v504_v59 = vpop.permute.xlu1 %503  ;;  %v622_v62 = vsel %vm60_vm0, %v590_v6, %v621_v0  ;;  %v659_v6 = vrot.slane %v511_v20, 4 }
  0xf3   :  { %v646_v63 = vsel %vm60_vm0, %v626_v24, %v645_v53  ;;  %v643_v57 = vrot.slane %v626_v24, 4  ;;  %v4763_v5 = vperm.slane %v622_v62, %v4471_v30  ;;  %v561_v24 = vrot.slane %v448_v39, 4 }
  0xf4   :  { %v518_v4 = vpop.permute.xlu0 %517  ;;  %773 = vrot.lane.b32.xlu2 %v646_v63, %s4398_s10  ;;  %v660_v19 = vsel %vm60_vm0, %v659_v6, %v4751_v16  ;;  %v573_v6 = vrot.slane %v4738_v49, 4 }
  0xf5   :  { %v671_v52 = vrot.slane %v518_v4, 4  ;;  %v647_v9 = vrot.slane %v4763_v5, 4  ;;  %v4771_v2 = vsel %vm60_vm0, %v643_v57, %v602_v8  ;;  %v666_v53 = vperm.slane %v660_v19, %v4457_v23 }
  0xf6   :  { %v585_v8 = vrot.slane %v476_v61, 4  ;;  %v562_v57 = vsel %vm60_vm0, %v462_v56, %v561_v24  ;;  %v574_v56 = vsel %vm60_vm0, %v483_v17, %v573_v6 }
  0xf7   :  { %v648_v11 = vsel %vm60_vm0, %v647_v9, %v4767_v58  ;;  %v672_v0 = vsel %vm60_vm0, %v671_v52, %v504_v59  ;;  %v709_v42 = vrot.slane %v666_v53, 4  ;;  %v4786_v52 = vperm.slane %v562_v57, %v4457_v23 }
  0xf8   :  { %781 = vrot.lane.b32.xlu1 %v648_v11, %s4400_s12  ;;  %v678_v60 = vperm.slane %v672_v0, %v4457_v23  ;;  %v549_v11 = vrot.slane %v4740_v51, 4  ;;  %v586_v39 = vsel %vm60_vm0, %v490_v55, %v585_v8  ;;  %v532_v19 = vpop.permute.xlu2 %531  ;;  %v673_v8 = vrot.slane %v504_v59, 4 }
  0xf9   :  { %v4795_v49 = vperm.slane %v586_v39, %v4457_v23  ;;  %v697_v57 = vrot.slane %v532_v19, 4  ;;  %v607_v55 = vrot.slane %v4786_v52, 4  ;;  %v582_v17 = vperm.slane %v574_v56, %v4457_v23 }
  0xfa   :  { %v525_v21 = vpop.permute.xlu1 %524  ;;  %v707_v48 = vrot.slane %v678_v60, 4  ;;  %v710_v44 = vsel %vm60_vm0, %v678_v60, %v709_v42  ;;  %v550_v51 = vsel %vm60_vm0, %v4732_v46, %v549_v11  ;;  %v661_v59 = vrot.slane %v4751_v16, 4 }
  0xfb   :  { %v685_v24 = vrot.slane %v525_v21, 4  ;;  %v718_v42 = vperm.slane %v710_v44, %v4471_v30  ;;  %v558_v46 = vperm.slane %v550_v51, %v4457_v23 }
  0xfc   :  { %v539_v62 = vpop.permute.xlu0 %538  ;;  %v708_v14 = vsel %vm60_vm0, %v707_v48, %v666_v53  ;;  %v631_v53 = vrot.slane %v4795_v49, 4 }
  0xfd   :  { %v683_v63 = vrot.slane %v539_v62, 4  ;;  %v686_v11 = vsel %vm60_vm0, %v539_v62, %v685_v24  ;;  %v714_v48 = vperm.slane %v708_v14, %v4471_v30  ;;  %v608_v51 = vsel %vm60_vm0, %v607_v55, %v558_v46 }
  0xfe   :  { %v694_v62 = vperm.slane %v686_v11, %v4457_v23  ;;  %v632_v24 = vsel %vm60_vm0, %v631_v53, %v582_v17  ;;  %v614_v55 = vperm.slane %v608_v51, %v4471_v30 }
  0xff   :  { %v684_v9 = vsel %vm60_vm0, %v683_v63, %v525_v21 }
 0x100   :  { %v690_v0 = vperm.slane %v684_v9, %v4457_v23  ;;  %v745_v53 = vrot.slane %v694_v62, 4 }
 0x102   :  { %v546_v61 = vpop.permute.xlu1 %545  ;;  %v733_v21 = vrot.slane %v690_v0, 4 }
 0x103   :  { %v695_v63 = vrot.slane %v546_v61, 4  ;;  %v698_v6 = vsel %vm60_vm0, %v546_v61, %v697_v57 }
 0x104   :  { %v706_v61 = vperm.slane %v698_v6, %v4457_v23  ;;  %v638_v6 = vperm.slane %v632_v24, %v4471_v30 }
 0x105   :  { %v696_v9 = vsel %vm60_vm0, %v695_v63, %v532_v19  ;;  %v674_v19 = vsel %vm60_vm0, %v518_v4, %v673_v8  ;;  %v761_v63 = vrot.slane %v718_v42, 4  ;;  %v662_v4 = vsel %vm60_vm0, %v511_v20, %v661_v59 }
 0x106   :  { %v702_v60 = vperm.slane %v696_v9, %v4457_v23  ;;  %v682_v8 = vperm.slane %v674_v19, %v4457_v23  ;;  %v670_v59 = vperm.slane %v662_v4, %v4457_v23  ;;  %v746_v19 = vsel %vm60_vm0, %v706_v61, %v745_v53 }
 0x107   :  { %v754_v24 = vperm.slane %v746_v19, %v4471_v30 }
 0x108   :  { %v731_v39 = vrot.slane %v702_v60, 4  ;;  %v734_v44 = vsel %vm60_vm0, %v702_v60, %v733_v21  ;;  %v757_v21 = vrot.slane %v714_v48, 4 }
 0x109   :  { %v742_v56 = vperm.slane %v734_v44, %v4471_v30  ;;  %v719_v44 = vrot.slane %v682_v8, 4 }
 0x10a   :  { %v732_v14 = vsel %vm60_vm0, %v731_v39, %v690_v0  ;;  %v743_v39 = vrot.slane %v706_v61, 4 }
 0x10b   :  { %v762_v16 = vsel %vm60_vm0, %v742_v56, %v761_v63  ;;  %v759_v57 = vrot.slane %v742_v56, 4  ;;  %v738_v9 = vperm.slane %v732_v14, %v4471_v30  ;;  %v651_v56 = vrot.slane %v638_v6, 4 }
 0x10c   :  { %791 = vrot.lane.b32.xlu1 %v762_v16, %s4399_s11  ;;  %v744_v63 = vsel %vm60_vm0, %v743_v39, %v694_v62  ;;  %v649_v14 = vrot.slane %v4767_v58, 4  ;;  %v721_v16 = vrot.slane %v670_v59, 4  ;;  %v767_v62 = vrot.slane %v754_v24, 4 }
 0x10d   :  { %v760_v60 = vsel %vm60_vm0, %v759_v57, %v718_v42  ;;  %v758_v0 = vsel %vm60_vm0, %v738_v9, %v757_v21  ;;  %v755_v11 = vrot.slane %v738_v9, 4  ;;  %v653_v42 = vrot.slane %v614_v55, 4 }
 0x10e   :  { %783 = vrot.lane.b32.xlu2 %v760_v60, %s4400_s12  ;;  %775 = vrot.lane.b32.xlu0 %v758_v0, %s4398_s10  ;;  %v652_v57 = vsel %vm60_vm0, %v651_v56, %v614_v55  ;;  %v650_v61 = vsel %vm60_vm0, %v4763_v5, %v649_v14  ;;  %v750_v9 = vperm.slane %v744_v63, %v4471_v30  ;;  %v633_v21 = vrot.slane %v582_v17, 4 }
 0x10f   :  { %v4829_v20 = vsel %vm60_vm0, %v755_v11, %v714_v48  ;;  %v654_v51 = vsel %vm60_vm0, %v638_v6, %v653_v42  ;;  %v720_v48 = vsel %vm60_vm0, %v719_v44, %v670_v59  ;;  %v722_v58 = vsel %vm60_vm0, %v682_v8, %v721_v16 }
 0x110   :  { %v726_v4 = vperm.slane %v720_v48, %v4471_v30  ;;  %v609_v60 = vrot.slane %v558_v46, 4  ;;  %v730_v0 = vperm.slane %v722_v58, %v4471_v30  ;;  %v763_v11 = vrot.slane %v750_v9, 4 }
 0x111   :  { %v634_v55 = vsel %vm60_vm0, %v4795_v49, %v633_v21 }
 0x112   :  { %v768_v5 = vsel %vm60_vm0, %v767_v62, %v730_v0  ;;  %v765_v6 = vrot.slane %v726_v4, 4  ;;  %v610_v17 = vsel %vm60_vm0, %v4786_v52, %v609_v60  ;;  %v764_v53 = vsel %vm60_vm0, %v763_v11, %v726_v4 }
 0x113   :  { %v642_v46 = vperm.slane %v634_v55, %v4471_v30  ;;  %v618_v49 = vperm.slane %v610_v17, %v4471_v30  ;;  %v769_v19 = vrot.slane %v730_v0, 4 }
 0x114   :  { %805 = vrot.lane.b32.xlu1 %v654_v51, %s4402_s14  ;;  %v766_v8 = vsel %vm60_vm0, %v750_v9, %v765_v6 }
 0x115   :  { %v655_v39 = vrot.slane %v642_v46, 4  ;;  %v657_v59 = vrot.slane %v618_v49, 4  ;;  %v770_v42 = vsel %vm60_vm0, %v754_v24, %v769_v19 }
 0x116   :  { %797 = vrot.lane.b32.xlu2 %v652_v57, %s4401_s13  ;;  %789 = vrot.lane.b32.xlu0 %v650_v61, %s4399_s11  ;;  %v341_v61 = vsel %vm340_vm1, %v4621_v1, %v4681_v12  ;;  %v342_v12 = vsel %vm340_vm1, %v4635_v54, %v4688_v25 }
 0x117   :  { %v658_v44 = vsel %vm60_vm0, %v642_v46, %v657_v59  ;;  %v656_v52 = vsel %vm60_vm0, %v655_v39, %v618_v49  ;;  %v344_v58 = vsel %vm343_vm2, %v341_v61, %v4683_v50 }
 0x118   :  { %v347_v1 = vsel %vm346_vm3, %v344_v58, %v4666_v3 }
 0x11c   :  { %815 = vrot.lane.b32.xlu1 %v768_v5, %s4403_s15 }
 0x11e   :  { %807 = vrot.lane.b32.xlu2 %v766_v8, %s4402_s14  ;;  %799 = vrot.lane.b32.xlu0 %v764_v53, %s4401_s13 }
 0x126   :  { %821 = vrot.lane.b32.xlu2 %v658_v44, %s4404_s16  ;;  %813 = vrot.lane.b32.xlu0 %v656_v52, %s4403_s15 }
 0x12e   :  { %823 = vrot.lane.b32.xlu0 %v770_v42, %s4404_s16 }
 0x14e   :  { %v774_v56 = vpop.permute.xlu2 %773 }
 0x14f   :  { %v827_v21 = vsel %vm340_vm1, %v4771_v2, %v774_v56  ;;  %v350_v2 = vsel %vm349_vm4, %v347_v1, %v4696_v31  ;;  %v4992_v1 = vadd.s32 63, %v4629_v7 }
 0x150   :  { %v353_v3 = vsel %vm352_vm5, %v350_v2, %v4676_v18  ;;  %v5002_v2 = vadd.s32 7, %v4629_v7 }
 0x151   :  { %v356_v25 = vsel %vm355_vm6, %v353_v3, %v4700_v26 }
 0x152   :  { %v4897_v17 = vsel %vm358_vm7, %v356_v25, %v4708_v35 }
 0x153   :  { %7369 = vst [vmem:[#allocation21_spill] sm:$0xff] %v4897_v17 }
 0x168   :  { %v784_v63 = vpop.permute.xlu2 %783 }
 0x16a   :  { %v782_v14 = vpop.permute.xlu1 %781 }
 0x16b   :  { %v829_v62 = vsel %vm343_vm2, %v827_v21, %v782_v14 }
 0x170   :  { %v798_v16 = vpop.permute.xlu2 %797 }
 0x178   :  { %v808_v9 = vpop.permute.xlu2 %807 }
 0x17e   :  { %v792_v57 = vpop.permute.xlu1 %791 }
 0x180   :  { %v776_v51 = vpop.permute.xlu0 %775  ;;  %v822_v31 = vpop.permute.xlu2 %821 }
 0x181   :  { %v828_v60 = vsel %vm340_vm1, %v4829_v20, %v776_v51  ;;  %v345_v20 = vsel %vm343_vm2, %v342_v12, %v4690_v28  ;;  %v4995_v12 = vadd.s32 55, %v4629_v7 }
 0x182   :  { %v830_v11 = vsel %vm343_vm2, %v828_v60, %v784_v63  ;;  %v348_v18 = vsel %vm346_vm3, %v345_v20, %v4670_v10  ;;  %v4983_v60 = vadd.s32 31, %v4629_v7 }
 0x183   :  { %v832_v5 = vsel %vm346_vm3, %v830_v11, %v792_v57  ;;  %v351_v26 = vsel %vm349_vm4, %v348_v18, %v4694_v13 }
 0x184   :  { %v354_v46 = vsel %vm352_vm5, %v351_v26, %v4702_v32 }
 0x185   :  { %v357_v10 = vsel %vm355_vm6, %v354_v46, %v4685_v22 }
 0x186   :  { %v806_v50 = vpop.permute.xlu1 %805  ;;  %v4918_v13 = vsel %vm358_vm7, %v357_v10, %v4706_v27 }
 0x187   :  { %7370 = vst [vmem:[#allocation22_spill] sm:$0xff] %v4918_v13 }
 0x188   :  { %v790_v48 = vpop.permute.xlu0 %789 }
 0x189   :  { %v831_v4 = vsel %vm346_vm3, %v829_v62, %v790_v48  ;;  %v4971_v62 = vadd.s32 15, %v4629_v7 }
 0x18a   :  { %v833_v0 = vsel %vm349_vm4, %v831_v4, %v798_v16  ;;  %v4980_v4 = vadd.s32 39, %v4629_v7 }
 0x18b   :  { %v835_v54 = vsel %vm352_vm5, %v833_v0, %v806_v50 }
 0x18e   :  { %v816_v39 = vpop.permute.xlu1 %815 }
 0x190   :  { %v800_v24 = vpop.permute.xlu0 %799 }
 0x191   :  { %v834_v28 = vsel %vm349_vm4, %v832_v5, %v800_v24  ;;  %v4966_v24 = vadd.s32 23, %v4629_v7  ;;  %v5018_v5 = vadd.s32 47, %v4629_v7 }
 0x192   :  { %v836_v49 = vsel %vm352_vm5, %v834_v28, %v808_v9 }
 0x193   :  { %v838_v44 = vsel %vm355_vm6, %v836_v49, %v816_v39 }
 0x198   :  { %v814_v55 = vpop.permute.xlu0 %813 }
 0x199   :  { %v837_v6 = vsel %vm355_vm6, %v835_v54, %v814_v55 }
 0x19a   :  { %v839_v8 = vsel %vm358_vm7, %v837_v6, %v822_v31 }
 0x19b   :  { %v841_v53 = vmul.f32 %v839_v8, %v4897_v17 }
 0x19d   :  { %1239 = vrot.lane.b32.xlu2 %v841_v53, %s4398_s10  ;;  %v4910_v35 = vperm.slane %v841_v53, 0  ;;  %v4922_v19 = vperm.slane %v841_v53, 1  ;;  %v4926_v42 = vperm.slane %v841_v53, 3  ;;  %v4929_v22 = vperm.slane %v841_v53, 2 }
 0x19e   :  { %v4931_v56 = vperm.slane %v841_v53, 4  ;;  %v4935_v27 = vperm.slane %v841_v53, 6  ;;  %v4938_v63 = vperm.slane %v841_v53, 5  ;;  %v4940_v51 = vperm.slane %v841_v53, 7 }
 0x19f   :  { %848 = vperm.xlu1 %4255, %v4910_v35  }
 0x1a0   :  { %v824_v59 = vpop.permute.xlu0 %823 }
 0x1a1   :  { %v840_v32 = vsel %vm358_vm7, %v838_v44, %v824_v59 }
 0x1a2   :  { %v842_v52 = vmul.f32 %v840_v32, %v4918_v13 }
 0x1a4   :  { %1241 = vrot.lane.b32.xlu0 %v842_v52, %s4398_s10  ;;  %v4944_v14 = vperm.slane %v842_v52, 1  ;;  %v4947_v16 = vperm.slane %v842_v52, 0  ;;  %v4949_v48 = vperm.slane %v842_v52, 2  ;;  %v4953_v57 = vperm.slane %v842_v52, 4 }
 0x1a5   :  { %855 = vperm.xlu2 %4256, %v4922_v19   ;;  %v4956_v61 = vperm.slane %v842_v52, 3  ;;  %v4958_v9 = vperm.slane %v842_v52, 5  ;;  %v4962_v21 = vperm.slane %v842_v52, 7  ;;  %v4968_v58 = vperm.slane %v842_v52, 6 }
 0x1a7   :  { %869 = vperm.xlu1 %4255, %v4926_v42  }
 0x1ac   :  { %862 = vperm.xlu0 %4254, %v4929_v22  }
 0x1ad   :  { %876 = vperm.xlu2 %4256, %v4931_v56  }
 0x1af   :  { %890 = vperm.xlu1 %4255, %v4935_v27  }
 0x1b4   :  { %883 = vperm.xlu0 %4254, %v4938_v63  }
 0x1b5   :  { %897 = vperm.xlu2 %4256, %v4940_v51  }
 0x1b7   :  { %911 = vperm.xlu1 %4255, %v4944_v14  }
 0x1bc   :  { %904 = vperm.xlu0 %4254, %v4947_v16  }
 0x1bd   :  { %918 = vperm.xlu2 %4256, %v4949_v48  }
 0x1bf   :  { %932 = vperm.xlu1 %4255, %v4953_v57  }
 0x1c4   :  { %925 = vperm.xlu0 %4254, %v4956_v61  }
 0x1c5   :  { %939 = vperm.xlu2 %4256, %v4958_v9  }
 0x1c7   :  { %953 = vperm.xlu1 %4255, %v4962_v21  }
 0x1cc   :  { %946 = vperm.xlu0 %4254, %v4968_v58  }
 0x1cd   :  { %4258 = vset.pattern.permute.xlu2 %v4966_v24 }
 0x1cf   :  { %4257 = vset.pattern.permute.xlu1 %v4971_v62 }
 0x1d4   :  { %4265 = vset.pattern.permute.xlu0 %v4966_v24 }
 0x1d5   :  { %1275 = vperm.xlu2 %4258, %v4910_v35  }
 0x1d7   :  { %1269 = vperm.xlu1 %4257, %v4910_v35  }
 0x1dc   :  { %1323 = vperm.xlu0 %4265, %v4922_v19  }
 0x1dd   :  { %4260 = vset.pattern.permute.xlu2 %v4980_v4 }
 0x1df   :  { %4259 = vset.pattern.permute.xlu1 %v4983_v60 }
 0x1e4   :  { %1563 = vperm.xlu0 %4265, %v4935_v27  }
 0x1e5   :  { %1287 = vperm.xlu2 %4260, %v4910_v35  }
 0x1e7   :  { %1281 = vperm.xlu1 %4259, %v4910_v35  }
 0x1ed   :  { %4262 = vset.pattern.permute.xlu2 %v4992_v1 }
 0x1ef   :  { %4261 = vset.pattern.permute.xlu1 %v4995_v12 }
 0x1f5   :  { %1305 = vperm.xlu2 %4262, %v4910_v35  }
 0x1f7   :  { %1299 = vperm.xlu1 %4261, %v4910_v35   ;;  %v5006_v50 = vpop.permute.xlu2 %1239 }
 0x1fd   :  { %4264 = vset.pattern.permute.xlu2 %v4971_v62 }
 0x1ff   :  { %4263 = vset.pattern.permute.xlu1 %v5002_v2  ;;  %v856_v0 = vpop.permute.xlu2 %855 }
 0x200   :  { %v969_v55 = vrot.slane %v856_v0, 4 }
 0x205   :  { %1317 = vperm.xlu2 %4264, %v4922_v19  }
 0x207   :  { %1311 = vperm.xlu1 %4263, %v4922_v19   ;;  %v877_v3 = vpop.permute.xlu2 %876 }
 0x20d   :  { %4267 = vset.pattern.permute.xlu2 %v4980_v4 }
 0x20f   :  { %4266 = vset.pattern.permute.xlu1 %v4983_v60  ;;  %v898_v7 = vpop.permute.xlu2 %897 }
 0x211   :  { %v849_v11 = vpop.permute.xlu1 %848 }
 0x212   :  { %v957_v28 = vrot.slane %v849_v11, 4 }
 0x215   :  { %1335 = vperm.xlu2 %4267, %v4922_v19  }
 0x216   :  { %v5013_v20 = vpop.permute.xlu0 %1241 }
 0x217   :  { %1329 = vperm.xlu1 %4266, %v4922_v19   ;;  %v919_v43 = vpop.permute.xlu2 %918 }
 0x219   :  { %v870_v54 = vpop.permute.xlu1 %869 }
 0x21a   :  { %v967_v25 = vrot.slane %v870_v54, 4  ;;  %v970_v31 = vsel %vm60_vm0, %v870_v54, %v969_v55 }
 0x21b   :  { %v5022_v8 = vperm.slane %v970_v31, %v4457_v23 }
 0x21c   :  { %v968_v6 = vsel %vm60_vm0, %v967_v25, %v856_v0  ;;  %v991_v25 = vrot.slane %v898_v7, 4 }
 0x21d   :  { %4269 = vset.pattern.permute.xlu2 %v4995_v12  ;;  %v974_v18 = vperm.slane %v968_v6, %v4457_v23  ;;  %v1015_v39 = vrot.slane %v5022_v8, 4  ;;  %v981_v6 = vrot.slane %v877_v3, 4 }
 0x21e   :  { %v863_v53 = vpop.permute.xlu0 %862 }
 0x21f   :  { %v955_v26 = vrot.slane %v863_v53, 4  ;;  %v958_v46 = vsel %vm60_vm0, %v863_v53, %v957_v28  ;;  %4268 = vset.pattern.permute.xlu1 %v5018_v5  ;;  %v1003_v44 = vrot.slane %v974_v18, 4 }
 0x220   :  { %v5029_v49 = vperm.slane %v958_v46, %v4457_v23 }
 0x221   :  { %v956_v10 = vsel %vm60_vm0, %v955_v26, %v849_v11  ;;  %v891_v59 = vpop.permute.xlu1 %890 }
 0x222   :  { %v962_v32 = vperm.slane %v956_v10, %v4457_v23  ;;  %v979_v52 = vrot.slane %v891_v59, 4  ;;  %v1016_v0 = vsel %vm60_vm0, %v1015_v39, %v5029_v49  ;;  %v982_v10 = vsel %vm60_vm0, %v891_v59, %v981_v6 }
 0x224   :  { %v980_v55 = vsel %vm60_vm0, %v979_v52, %v877_v3  ;;  %v1004_v54 = vsel %vm60_vm0, %v1003_v44, %v962_v32  ;;  %v1005_v11 = vrot.slane %v962_v32, 4 }
 0x225   :  { %v986_v31 = vperm.slane %v980_v55, %v4457_v23  ;;  %1347 = vperm.xlu2 %4269, %v4922_v19   ;;  %v1010_v55 = vperm.slane %v1004_v54, %v4471_v30 }
 0x226   :  { %v884_v28 = vpop.permute.xlu0 %883 }
 0x227   :  { %v1029_v53 = vrot.slane %v986_v31, 4  ;;  %v992_v26 = vsel %vm60_vm0, %v991_v25, %v884_v28  ;;  %v993_v46 = vrot.slane %v884_v28, 4  ;;  %1341 = vperm.xlu1 %4268, %v4922_v19   ;;  %v1006_v25 = vsel %vm60_vm0, %v974_v18, %v1005_v11 }
 0x228   :  { %v998_v39 = vperm.slane %v992_v26, %v4457_v23  ;;  %v5055_v26 = vperm.slane %v982_v10, %v4457_v23  ;;  %v1053_v6 = vrot.slane %v1010_v55, 4  ;;  %v5064_v11 = vperm.slane %v1006_v25, %v4471_v30 }
 0x229   :  { %v994_v44 = vsel %vm60_vm0, %v898_v7, %v993_v46  ;;  %v912_v52 = vpop.permute.xlu1 %911  ;;  %v1022_v46 = vperm.slane %v1016_v0, %v4471_v30 }
 0x22a   :  { %v5047_v47 = vperm.slane %v994_v44, %v4457_v23  ;;  %v1027_v3 = vrot.slane %v998_v39, 4  ;;  %v1030_v32 = vsel %vm60_vm0, %v998_v39, %v1029_v53  ;;  %v1065_v44 = vrot.slane %v919_v43, 4 }
 0x22b   :  { %v5052_v28 = vperm.slane %v1030_v32, %v4471_v30  ;;  %v1061_v25 = vrot.slane %v1022_v46, 4  ;;  %v1079_v45 = vrot.slane %v912_v52, 4 }
 0x22c   :  { %v1039_v7 = vrot.slane %v5047_v47, 4  ;;  %v1028_v59 = vsel %vm60_vm0, %v1027_v3, %v986_v31 }
 0x22d   :  { %4271 = vset.pattern.permute.xlu2 %v4971_v62  ;;  %v1034_v54 = vperm.slane %v1028_v59, %v4471_v30  ;;  %v1055_v53 = vrot.slane %v5052_v28, 4 }
 0x22e   :  { %v905_v18 = vpop.permute.xlu0 %904  ;;  %v1040_v39 = vsel %vm60_vm0, %v1039_v7, %v5055_v26 }
 0x22f   :  { %v1067_v10 = vrot.slane %v905_v18, 4  ;;  %4270 = vset.pattern.permute.xlu1 %v5002_v2  ;;  %v5070_v31 = vsel %vm60_vm0, %v1034_v54, %v1053_v6  ;;  %v1051_v3 = vrot.slane %v1034_v54, 4  ;;  %v5074_v32 = vsel %vm60_vm0, %v1055_v53, %v5064_v11  ;;  %v940_v54 = vpop.permute.xlu2 %939 }
 0x230   :  { %v1046_v59 = vperm.slane %v1040_v39, %v4471_v30  ;;  %v1066_v38 = vsel %vm60_vm0, %v1065_v44, %v905_v18 }
 0x231   :  { %v933_v0 = vpop.permute.xlu1 %932  ;;  %v1068_v7 = vsel %vm60_vm0, %v919_v43, %v1067_v10  ;;  %v5080_v40 = vsel %vm60_vm0, %v1051_v3, %v1010_v55  ;;  %v1072_v53 = vperm.slane %v1066_v38, %v4457_v23  ;;  %v1103_v10 = vrot.slane %v940_v54, 4 }
 0x232   :  { %v1059_v15 = vrot.slane %v1046_v59, 4  ;;  %v5083_v6 = vsel %vm60_vm0, %v1046_v59, %v1061_v25  ;;  %v1076_v33 = vperm.slane %v1068_v7, %v4457_v23  ;;  %v1091_v29 = vrot.slane %v933_v0, 4 }
 0x233   :  { %v1115_v3 = vrot.slane %v1072_v53, 4 }
 0x234   :  { %v5089_v39 = vsel %vm60_vm0, %v1059_v15, %v1022_v46  ;;  %v1127_v59 = vrot.slane %v1076_v33, 4 }
 0x235   :  { %1365 = vperm.xlu2 %4271, %v4929_v22  }
 0x236   :  { %v926_v18 = vpop.permute.xlu0 %925 }
 0x237   :  { %v1077_v43 = vrot.slane %v926_v18, 4  ;;  %v1080_v55 = vsel %vm60_vm0, %v926_v18, %v1079_v45  ;;  %1359 = vperm.xlu1 %4270, %v4929_v22  }
 0x238   :  { %v1088_v44 = vperm.slane %v1080_v55, %v4457_v23 }
 0x239   :  { %v1078_v38 = vsel %vm60_vm0, %v1077_v43, %v912_v52  ;;  %v954_v25 = vpop.permute.xlu1 %953 }
 0x23a   :  { %v1084_v7 = vperm.slane %v1078_v38, %v4457_v23  ;;  %v1125_v34 = vrot.slane %v1088_v44, 4  ;;  %v1101_v37 = vrot.slane %v954_v25, 4  ;;  %v1104_v15 = vsel %vm60_vm0, %v954_v25, %v1103_v10 }
 0x23b   :  { %v1112_v46 = vperm.slane %v1104_v15, %v4457_v23  ;;  %v1128_v45 = vsel %vm60_vm0, %v1088_v44, %v1127_v59 }
 0x23c   :  { %v1113_v18 = vrot.slane %v1084_v7, 4  ;;  %v1102_v41 = vsel %vm60_vm0, %v1101_v37, %v940_v54  ;;  %v1126_v55 = vsel %vm60_vm0, %v1125_v34, %v1076_v33  ;;  %v1116_v36 = vsel %vm60_vm0, %v1084_v7, %v1115_v3 }
 0x23d   :  { %4273 = vset.pattern.permute.xlu2 %v4983_v60  ;;  %v1108_v52 = vperm.slane %v1102_v41, %v4457_v23  ;;  %v1132_v44 = vperm.slane %v1126_v55, %v4471_v30  ;;  %v1149_v37 = vrot.slane %v1112_v46, 4 }
 0x23e   :  { %v947_v43 = vpop.permute.xlu0 %946  ;;  %v1114_v38 = vsel %vm60_vm0, %v1113_v18, %v1072_v53 }
 0x23f   :  { %v1089_v10 = vrot.slane %v947_v43, 4  ;;  %v1092_v25 = vsel %vm60_vm0, %v947_v43, %v1091_v29  ;;  %4272 = vset.pattern.permute.xlu1 %v4966_v24  ;;  %v1120_v54 = vperm.slane %v1114_v38, %v4471_v30  ;;  %v1137_v3 = vrot.slane %v1108_v52, 4 }
 0x240   :  { %v1100_v34 = vperm.slane %v1092_v25, %v4457_v23  ;;  %v1124_v29 = vperm.slane %v1116_v36, %v4471_v30  ;;  %v1171_v15 = vrot.slane %v1132_v44, 4 }
 0x241   :  { %v1090_v33 = vsel %vm60_vm0, %v1089_v10, %v933_v0  ;;  %v1163_v38 = vrot.slane %v1120_v54, 4 }
 0x242   :  { %v1096_v41 = vperm.slane %v1090_v33, %v4457_v23  ;;  %v1150_v59 = vsel %vm60_vm0, %v1149_v37, %v1100_v34  ;;  %v1151_v53 = vrot.slane %v1100_v34, 4 }
 0x243   :  { %v1156_v7 = vperm.slane %v1150_v59, %v4471_v30 }
 0x244   :  { %v1139_v18 = vrot.slane %v1096_v41, 4  ;;  %v1138_v55 = vsel %vm60_vm0, %v1137_v3, %v1096_v41  ;;  %v1152_v43 = vsel %vm60_vm0, %v1112_v46, %v1151_v53  ;;  %v1167_v46 = vrot.slane %v1124_v29, 4 }
 0x245   :  { %1377 = vperm.xlu2 %4273, %v4929_v22   ;;  %v1144_v0 = vperm.slane %v1138_v55, %v4471_v30  ;;  %v5120_v10 = vsel %vm60_vm0, %v1156_v7, %v1171_v15  ;;  %v1160_v25 = vperm.slane %v1152_v43, %v4471_v30  ;;  %v1136_v3 = vperm.slane %v1128_v45, %v4471_v30 }
 0x246   :  { %v1140_v37 = vsel %vm60_vm0, %v1108_v52, %v1139_v18  ;;  %v1057_v55 = vrot.slane %v5064_v11, 4  ;;  %v1169_v43 = vrot.slane %v1156_v7, 4 }
 0x247   :  { %1371 = vperm.xlu1 %4272, %v4929_v22   ;;  %v1164_v36 = vsel %vm60_vm0, %v1144_v0, %v1163_v38  ;;  %v1161_v34 = vrot.slane %v1144_v0, 4  ;;  %v1148_v33 = vperm.slane %v1140_v37, %v4471_v30  ;;  %v1173_v41 = vrot.slane %v1160_v25, 4 }
 0x248   :  { %1179 = vrot.lane.b32.xlu0 %v1164_v36, %s4398_s10  ;;  %v1058_v45 = vsel %vm60_vm0, %v5052_v28, %v1057_v55  ;;  %v1170_v11 = vsel %vm60_vm0, %v1169_v43, %v1132_v44 }
 0x249   :  { %v5130_v59 = vsel %vm60_vm0, %v1161_v34, %v1120_v54  ;;  %v1165_v53 = vrot.slane %v1148_v33, 4  ;;  %v5133_v15 = vsel %vm60_vm0, %v1148_v33, %v1167_v46  ;;  %v5136_v52 = vsel %vm60_vm0, %v1173_v41, %v1136_v3  ;;  %v5224_v37 = vpop.permute.xlu1 %1269 }
 0x24a   :  { %v1041_v54 = vrot.slane %v5055_v26, 4  ;;  %7377 = vst [vmem:[#allocation29_spill] sm:$0xff] %v5224_v37 }
 0x24b   :  { %v5139_v18 = vsel %vm60_vm0, %v1165_v53, %v1124_v29  ;;  %v1017_v29 = vrot.slane %v5029_v49, 4 }
 0x24c   :  { %v1042_v0 = vsel %vm60_vm0, %v5047_v47, %v1041_v54 }
 0x24d   :  { %4275 = vset.pattern.permute.xlu2 %v4995_v12  ;;  %v1050_v38 = vperm.slane %v1042_v0, %v4471_v30  ;;  %v1018_v28 = vsel %vm60_vm0, %v5022_v8, %v1017_v29 }
 0x24e   :  { %v1026_v47 = vperm.slane %v1018_v28, %v4471_v30  ;;  %v5211_v8 = vpop.permute.xlu0 %1323 }
 0x24f   :  { %4274 = vset.pattern.permute.xlu1 %v5018_v5  ;;  %v1063_v26 = vrot.slane %v1050_v38, 4  ;;  %7373 = vst [vmem:[#allocation25_spill] sm:$0xff] %v5211_v8 }
 0x250   :  { %1193 = vrot.lane.b32.xlu0 %v1058_v45, %s4399_s11 }
 0x251   :  { %v1064_v49 = vsel %vm60_vm0, %v1063_v26, %v1026_v47 }
 0x255   :  { %1395 = vperm.xlu2 %4275, %v4929_v22  }
 0x256   :  { %v5219_v7 = vpop.permute.xlu0 %1563 }
 0x257   :  { %1389 = vperm.xlu1 %4274, %v4929_v22   ;;  %7375 = vst [vmem:[#allocation27_spill] sm:$0xff] %v5219_v7 }
 0x258   :  { %1203 = vrot.lane.b32.xlu0 %v1170_v11, %s4401_s13 }
 0x259   :  { %v5233_v34 = vpop.permute.xlu1 %1281 }
 0x25a   :  { %7379 = vst [vmem:[#allocation31_spill] sm:$0xff] %v5233_v34 }
 0x25d   :  { %4277 = vset.pattern.permute.xlu2 %v5002_v2 }
 0x25f   :  { %4276 = vset.pattern.permute.xlu1 %v4992_v1 }
 0x260   :  { %1217 = vrot.lane.b32.xlu0 %v1064_v49, %s4403_s15 }
 0x265   :  { %1407 = vperm.xlu2 %4277, %v4926_v42  }
 0x267   :  { %1401 = vperm.xlu1 %4276, %v4929_v22  }
 0x268   :  { %1803 = vperm.xlu0 %4265, %v4956_v61  }
 0x269   :  { %v5242_v3 = vpop.permute.xlu1 %1299 }
 0x26a   :  { %7381 = vst [vmem:[#allocation33_spill] sm:$0xff] %v5242_v3 }
 0x26d   :  { %4279 = vset.pattern.permute.xlu2 %v4983_v60 }
 0x26f   :  { %4278 = vset.pattern.permute.xlu1 %v4966_v24 }
 0x270   :  { %4330 = vset.pattern.permute.xlu0 %v4992_v1 }
 0x275   :  { %1425 = vperm.xlu2 %4279, %v4926_v42  }
 0x277   :  { %1419 = vperm.xlu1 %4278, %v4926_v42  }
 0x278   :  { %1353 = vperm.xlu0 %4330, %v4922_v19   ;;  %v5202_v19 = vpop.permute.xlu2 %1275 }
 0x279   :  { %7371 = vst [vmem:[#allocation23_spill] sm:$0xff] %v5202_v19  ;;  %v5251_v55 = vpop.permute.xlu1 %1311 }
 0x27d   :  { %4281 = vset.pattern.permute.xlu2 %v5018_v5 }
 0x27f   :  { %4280 = vset.pattern.permute.xlu1 %v4980_v4 }
 0x280   :  { %1593 = vperm.xlu0 %4330, %v4935_v27  }
 0x285   :  { %1437 = vperm.xlu2 %4281, %v4926_v42  }
 0x287   :  { %1431 = vperm.xlu1 %4280, %v4926_v42  }
 0x288   :  { %1833 = vperm.xlu0 %4330, %v4956_v61  }
 0x289   :  { %v5258_v54 = vpop.permute.xlu1 %1329 }
 0x28a   :  { %7384 = vst [vmem:[#allocation36_spill] sm:$0xff] %v5258_v54 }
 0x28d   :  { %4283 = vset.pattern.permute.xlu2 %v5002_v2 }
 0x28f   :  { %4282 = vset.pattern.permute.xlu1 %v4992_v1 }
 0x290   :  { %4335 = vset.pattern.permute.xlu0 %v4980_v4 }
 0x295   :  { %1455 = vperm.xlu2 %4283, %v4931_v56  }
 0x297   :  { %1449 = vperm.xlu1 %4282, %v4926_v42  }
 0x298   :  { %1383 = vperm.xlu0 %4335, %v4929_v22   ;;  %v5207_v22 = vpop.permute.xlu2 %1287 }
 0x299   :  { %7372 = vst [vmem:[#allocation24_spill] sm:$0xff] %v5207_v22  ;;  %v5269_v0 = vpop.permute.xlu1 %1341 }
 0x29d   :  { %4285 = vset.pattern.permute.xlu2 %v4966_v24 }
 0x29f   :  { %4284 = vset.pattern.permute.xlu1 %v4971_v62 }
 0x2a0   :  { %1623 = vperm.xlu0 %4335, %v4940_v51   ;;  %v5214_v44 = vpop.permute.xlu2 %1305 }
 0x2a1   :  { %7374 = vst [vmem:[#allocation26_spill] sm:$0xff] %v5214_v44 }
 0x2a5   :  { %1467 = vperm.xlu2 %4285, %v4931_v56  }
 0x2a7   :  { %1461 = vperm.xlu1 %4284, %v4931_v56  }
 0x2a8   :  { %1863 = vperm.xlu0 %4335, %v4953_v57   ;;  %v5221_v25 = vpop.permute.xlu2 %1317 }
 0x2a9   :  { %7376 = vst [vmem:[#allocation28_spill] sm:$0xff] %v5221_v25  ;;  %v5281_v38 = vpop.permute.xlu1 %1359 }
 0x2ad   :  { %4287 = vset.pattern.permute.xlu2 %v5018_v5 }
 0x2af   :  { %4286 = vset.pattern.permute.xlu1 %v4980_v4 }
 0x2b0   :  { %4340 = vset.pattern.permute.xlu0 %v4971_v62  ;;  %v5230_v36 = vpop.permute.xlu2 %1335 }
 0x2b1   :  { %7378 = vst [vmem:[#allocation30_spill] sm:$0xff] %v5230_v36 }
 0x2b5   :  { %1485 = vperm.xlu2 %4287, %v4931_v56  }
 0x2b7   :  { %1479 = vperm.xlu1 %4286, %v4931_v56  }
 0x2b8   :  { %1413 = vperm.xlu0 %4340, %v4926_v42   ;;  %v5239_v46 = vpop.permute.xlu2 %1347 }
 0x2b9   :  { %7380 = vst [vmem:[#allocation32_spill] sm:$0xff] %v5239_v46  ;;  %v5292_v28 = vpop.permute.xlu1 %1371 }
 0x2ba   :  { %7389 = vst [vmem:[#allocation41_spill] sm:$0xff] %v5292_v28 }
 0x2bd   :  { %4289 = vset.pattern.permute.xlu2 %v4992_v1 }
 0x2bf   :  { %4288 = vset.pattern.permute.xlu1 %v4995_v12 }
 0x2c0   :  { %1653 = vperm.xlu0 %4340, %v4947_v16   ;;  %v5246_v41 = vpop.permute.xlu2 %1365 }
 0x2c1   :  { %7382 = vst [vmem:[#allocation34_spill] sm:$0xff] %v5246_v41 }
 0x2c5   :  { %1497 = vperm.xlu2 %4289, %v4931_v56  }
 0x2c7   :  { %1491 = vperm.xlu1 %4288, %v4931_v56  }
 0x2c8   :  { %1893 = vperm.xlu0 %4340, %v4958_v9   ;;  %v5255_v45 = vpop.permute.xlu2 %1377 }
 0x2c9   :  { %7383 = vst [vmem:[#allocation35_spill] sm:$0xff] %v5255_v45 }
 0x2cd   :  { %4291 = vset.pattern.permute.xlu2 %v4966_v24 }
 0x2cf   :  { %4290 = vset.pattern.permute.xlu1 %v4971_v62 }
 0x2d0   :  { %4345 = vset.pattern.permute.xlu0 %v4995_v12  ;;  %v5264_v43 = vpop.permute.xlu2 %1395 }
 0x2d1   :  { %7385 = vst [vmem:[#allocation37_spill] sm:$0xff] %v5264_v43 }
 0x2d5   :  { %1515 = vperm.xlu2 %4291, %v4938_v63  }
 0x2d7   :  { %1509 = vperm.xlu1 %4290, %v4938_v63  }
 0x2d8   :  { %1443 = vperm.xlu0 %4345, %v4926_v42   ;;  %v5228_v42 = vpop.permute.xlu0 %1179  ;;  %v5277_v11 = vpop.permute.xlu2 %1407 }
 0x2dd   :  { %4293 = vset.pattern.permute.xlu2 %v4980_v4 }
 0x2df   :  { %4292 = vset.pattern.permute.xlu1 %v4983_v60 }
 0x2e0   :  { %1683 = vperm.xlu0 %4345, %v4947_v16   ;;  %v5237_v33 = vpop.permute.xlu0 %1193 }
 0x2e5   :  { %1527 = vperm.xlu2 %4293, %v4938_v63  }
 0x2e7   :  { %1521 = vperm.xlu1 %4292, %v4938_v63  }
 0x2e8   :  { %1923 = vperm.xlu0 %4345, %v4958_v9   ;;  %v5249_v53 = vpop.permute.xlu0 %1203 }
 0x2ed   :  { %4295 = vset.pattern.permute.xlu2 %v4992_v1 }
 0x2ef   :  { %4294 = vset.pattern.permute.xlu1 %v4995_v12 }
 0x2f0   :  { %4350 = vset.pattern.permute.xlu0 %v4983_v60 }
 0x2f5   :  { %1545 = vperm.xlu2 %4295, %v4938_v63  }
 0x2f7   :  { %1539 = vperm.xlu1 %4294, %v4938_v63  }
 0x2f8   :  { %1473 = vperm.xlu0 %4350, %v4931_v56   ;;  %v5261_v56 = vpop.permute.xlu0 %1217 }
 0x2fd   :  { %4297 = vset.pattern.permute.xlu2 %v4971_v62 }
 0x2ff   :  { %4296 = vset.pattern.permute.xlu1 %v5002_v2 }
 0x300   :  { %1713 = vperm.xlu0 %4350, %v4944_v14   ;;  %v5275_v29 = vpop.permute.xlu0 %1803 }
 0x301   :  { %7386 = vst [vmem:[#allocation38_spill] sm:$0xff] %v5275_v29 }
 0x305   :  { %1557 = vperm.xlu2 %4297, %v4935_v27  }
 0x307   :  { %1551 = vperm.xlu1 %4296, %v4935_v27  }
 0x308   :  { %1953 = vperm.xlu0 %4350, %v4968_v58  }
 0x30d   :  { %1177 = vrot.lane.b32.xlu2 %v5070_v31, %s4398_s10  ;;  %v5286_v31 = vpop.permute.xlu0 %1353 }
 0x30e   :  { %4299 = vset.pattern.permute.xlu2 %v4980_v4  ;;  %7387 = vst [vmem:[#allocation39_spill] sm:$0xff] %v5286_v31 }
 0x30f   :  { %1185 = vrot.lane.b32.xlu1 %v5074_v32, %s4400_s12  ;;  %v5288_v32 = vpop.permute.xlu2 %1425 }
 0x310   :  { %4355 = vset.pattern.permute.xlu0 %v5002_v2  ;;  %4298 = vset.pattern.permute.xlu1 %v4983_v60  ;;  %7388 = vst [vmem:[#allocation40_spill] sm:$0xff] %v5288_v32 }
 0x315   :  { %1187 = vrot.lane.b32.xlu2 %v5139_v18, %s4400_s12  ;;  %v5297_v18 = vpop.permute.xlu0 %1593 }
 0x316   :  { %7390 = vst [vmem:[#allocation42_spill] sm:$0xff] %v5297_v18 }
 0x317   :  { %1195 = vrot.lane.b32.xlu1 %v5133_v15, %s4399_s11  ;;  %v5299_v26 = vpop.permute.xlu2 %1437  ;;  %v5303_v15 = vpop.permute.xlu1 %1389 }
 0x318   :  { %1263 = vperm.xlu0 %4355, %v4910_v35  }
 0x31d   :  { %1201 = vrot.lane.b32.xlu2 %v5089_v39, %s4401_s13 }
 0x31f   :  { %1209 = vrot.lane.b32.xlu1 %v5083_v6, %s4402_s14  ;;  %v5308_v39 = vpop.permute.xlu2 %1455  ;;  %v5311_v6 = vpop.permute.xlu0 %1833 }
 0x320   :  { %1503 = vperm.xlu0 %4355, %v4938_v63   ;;  %7391 = vst [vmem:[#allocation43_spill] sm:$0xff] %v5311_v6  ;;  %v5313_v47 = vpop.permute.xlu1 %1401 }
 0x321   :  { %7392 = vst [vmem:[#allocation44_spill] sm:$0xff] %v5313_v47 }
 0x325   :  { %1211 = vrot.lane.b32.xlu2 %v5120_v10, %s4402_s14 }
 0x327   :  { %1219 = vrot.lane.b32.xlu1 %v5136_v52, %s4403_s15  ;;  %v5317_v10 = vpop.permute.xlu2 %1467  ;;  %v5320_v49 = vpop.permute.xlu0 %1383 }
 0x328   :  { %1743 = vperm.xlu0 %4355, %v4949_v48   ;;  %7393 = vst [vmem:[#allocation45_spill] sm:$0xff] %v5317_v10  ;;  %v5322_v52 = vpop.permute.xlu1 %1419 }
 0x329   :  { %7394 = vst [vmem:[#allocation46_spill] sm:$0xff] %v5320_v49 }
 0x32a   :  { %7395 = vst [vmem:[#allocation47_spill] sm:$0xff] %v5322_v52  ;;  %v2039_v52 = vrot.slane %v5277_v11, 4 }
 0x32d   :  { %1575 = vperm.xlu2 %4299, %v4935_v27  }
 0x32f   :  { %1569 = vperm.xlu1 %4298, %v4935_v27   ;;  %v5326_v44 = vpop.permute.xlu2 %1485  ;;  %v5332_v47 = vpop.permute.xlu0 %1623 }
 0x330   :  { %1983 = vperm.xlu0 %4355, %v4962_v21   ;;  %v5329_v6 = vpop.permute.xlu1 %1431  ;;  %7397 = vst [vmem:[#allocation49_spill] sm:$0xff] %v5332_v47 }
 0x331   :  { %7396 = vst [vmem:[#allocation48_spill] sm:$0xff] %v5329_v6 }
 0x335   :  { %4301 = vset.pattern.permute.xlu2 %v4995_v12 }
 0x337   :  { %4300 = vset.pattern.permute.xlu1 %v5018_v5  ;;  %v5335_v31 = vpop.permute.xlu2 %1497  ;;  %v5342_v46 = vpop.permute.xlu0 %1863 }
 0x338   :  { %4360 = vset.pattern.permute.xlu0 %v5018_v5  ;;  %7398 = vst [vmem:[#allocation50_spill] sm:$0xff] %v5335_v31  ;;  %v5338_v18 = vpop.permute.xlu1 %1449 }
 0x339   :  { %7399 = vst [vmem:[#allocation51_spill] sm:$0xff] %v5338_v18 }
 0x33a   :  { %7400 = vst [vmem:[#allocation52_spill] sm:$0xff] %v5342_v46 }
 0x33d   :  { %1587 = vperm.xlu2 %4301, %v4935_v27  }
 0x33f   :  { %1581 = vperm.xlu1 %4300, %v4935_v27   ;;  %v5344_v3 = vpop.permute.xlu2 %1515 }
 0x340   :  { %1293 = vperm.xlu0 %4360, %v4910_v35   ;;  %7401 = vst [vmem:[#allocation53_spill] sm:$0xff] %v5344_v3  ;;  %v5347_v27 = vpop.permute.xlu1 %1461  ;;  %v5351_v35 = vpop.permute.xlu0 %1413  ;;  %v2251_v3 = vrot.slane %v5246_v41, 4 }
 0x341   :  { %7402 = vst [vmem:[#allocation54_spill] sm:$0xff] %v5347_v27 }
 0x342   :  { %7403 = vst [vmem:[#allocation55_spill] sm:$0xff] %v5351_v35 }
 0x345   :  { %4303 = vset.pattern.permute.xlu2 %v4971_v62 }
 0x347   :  { %4302 = vset.pattern.permute.xlu1 %v5002_v2  ;;  %v5353_v31 = vpop.permute.xlu2 %1527 }
 0x348   :  { %1533 = vperm.xlu0 %4360, %v4938_v63   ;;  %7404 = vst [vmem:[#allocation56_spill] sm:$0xff] %v5353_v31  ;;  %v5356_v18 = vpop.permute.xlu1 %1479  ;;  %v5360_v63 = vpop.permute.xlu0 %1653 }
 0x349   :  { %7405 = vst [vmem:[#allocation57_spill] sm:$0xff] %v5356_v18 }
 0x34a   :  { %7406 = vst [vmem:[#allocation58_spill] sm:$0xff] %v5360_v63 }
 0x34d   :  { %1605 = vperm.xlu2 %4303, %v4940_v51  }
 0x34f   :  { %1599 = vperm.xlu1 %4302, %v4940_v51   ;;  %v5362_v43 = vpop.permute.xlu2 %1545 }
 0x350   :  { %1773 = vperm.xlu0 %4360, %v4949_v48   ;;  %7407 = vst [vmem:[#allocation59_spill] sm:$0xff] %v5362_v43  ;;  %v5365_v46 = vpop.permute.xlu1 %1491  ;;  %v5372_v47 = vpop.permute.xlu0 %1893 }
 0x351   :  { %7408 = vst [vmem:[#allocation60_spill] sm:$0xff] %v5365_v46 }
 0x352   :  { %7410 = vst [vmem:[#allocation62_spill] sm:$0xff] %v5372_v47  ;;  %v2252_v47 = vsel %vm60_vm0, %v2251_v3, %v5224_v37 }
 0x353   :  { %v5435_v7 = vperm.slane %v2252_v47, %v4457_v23 }
 0x355   :  { %4305 = vset.pattern.permute.xlu2 %v4983_v60  ;;  %7422 = vst [vmem:[#allocation74_spill] sm:$0xff] %v5435_v7 }
 0x357   :  { %4304 = vset.pattern.permute.xlu1 %v4966_v24 }
 0x358   :  { %2013 = vperm.xlu0 %4360, %v4962_v21   ;;  %v5374_v18 = vpop.permute.xlu1 %1509  ;;  %v5378_v43 = vpop.permute.xlu0 %1443 }
 0x359   :  { %7411 = vst [vmem:[#allocation63_spill] sm:$0xff] %v5374_v18 }
 0x35a   :  { %7412 = vst [vmem:[#allocation64_spill] sm:$0xff] %v5378_v43 }
 0x35d   :  { %1617 = vperm.xlu2 %4305, %v4940_v51  }
 0x35f   :  { %1611 = vperm.xlu1 %4304, %v4940_v51   ;;  %v5369_v31 = vpop.permute.xlu2 %1557 }
 0x360   :  { %4367 = vset.pattern.permute.xlu0 %v4992_v1  ;;  %7409 = vst [vmem:[#allocation61_spill] sm:$0xff] %v5369_v31  ;;  %v5380_v22 = vpop.permute.xlu1 %1521  ;;  %v5389_v49 = vpop.permute.xlu0 %1683  ;;  %v2275_v10 = vrot.slane %v5369_v31, 4 }
 0x361   :  { %7413 = vst [vmem:[#allocation65_spill] sm:$0xff] %v5380_v22 }
 0x362   :  { %7415 = vst [vmem:[#allocation67_spill] sm:$0xff] %v5389_v49  ;;  %v2276_v3 = vsel %vm60_vm0, %v2275_v10, %v5347_v27 }
 0x365   :  { %4307 = vset.pattern.permute.xlu2 %v4995_v12 }
 0x367   :  { %4306 = vset.pattern.permute.xlu1 %v5018_v5  ;;  %v5382_v46 = vpop.permute.xlu2 %1177 }
 0x368   :  { %v5397_v43 = vpop.permute.xlu0 %1923 }
 0x369   :  { %v5386_v36 = vpop.permute.xlu1 %1539  ;;  %7416 = vst [vmem:[#allocation68_spill] sm:$0xff] %v5397_v43 }
 0x36a   :  { %7414 = vst [vmem:[#allocation66_spill] sm:$0xff] %v5386_v36 }
 0x36d   :  { %1635 = vperm.xlu2 %4307, %v4940_v51  }
 0x36f   :  { %1629 = vperm.xlu1 %4306, %v4940_v51   ;;  %v5391_v6 = vpop.permute.xlu2 %1187 }
 0x370   :  { %v5405_v54 = vpop.permute.xlu0 %1473 }
 0x371   :  { %7417 = vst [vmem:[#allocation69_spill] sm:$0xff] %v5405_v54  ;;  %v2263_v54 = vrot.slane %v5351_v35, 4  ;;  %v5445_v35 = vperm.slane %v2276_v3, %v4457_v23 }
 0x373   :  { %7424 = vst [vmem:[#allocation76_spill] sm:$0xff] %v5445_v35  ;;  %v2325_v8 = vrot.slane %v5445_v35, 4 }
 0x375   :  { %4309 = vset.pattern.permute.xlu2 %v5002_v2 }
 0x377   :  { %4308 = vset.pattern.permute.xlu1 %v4992_v1  ;;  %v5399_v22 = vpop.permute.xlu2 %1201 }
 0x379   :  { %v5394_v34 = vpop.permute.xlu1 %1551 }
 0x37d   :  { %1647 = vperm.xlu2 %4309, %v4947_v16  }
 0x37f   :  { %1641 = vperm.xlu1 %4308, %v4940_v51   ;;  %v5407_v45 = vpop.permute.xlu2 %1211  ;;  %v5413_v51 = vpop.permute.xlu0 %1713 }
 0x380   :  { %7418 = vst [vmem:[#allocation70_spill] sm:$0xff] %v5413_v51 }
 0x381   :  { %v5403_v36 = vpop.permute.xlu1 %1185 }
 0x385   :  { %4311 = vset.pattern.permute.xlu2 %v4983_v60 }
 0x387   :  { %4310 = vset.pattern.permute.xlu1 %v4966_v24  ;;  %v5416_v43 = vpop.permute.xlu2 %1575  ;;  %v5426_v29 = vpop.permute.xlu0 %1953 }
 0x388   :  { %7419 = vst [vmem:[#allocation71_spill] sm:$0xff] %v5416_v43  ;;  %v2264_v43 = vsel %vm60_vm0, %v2263_v54, %v5221_v25 }
 0x389   :  { %v5411_v32 = vpop.permute.xlu1 %1195  ;;  %7420 = vst [vmem:[#allocation72_spill] sm:$0xff] %v5426_v29  ;;  %v5438_v63 = vperm.slane %v2264_v43, %v4457_v23  ;;  %v2301_v29 = vrot.slane %v5435_v7, 4 }
 0x38b   :  { %7423 = vst [vmem:[#allocation75_spill] sm:$0xff] %v5438_v63  ;;  %v2302_v43 = vsel %vm60_vm0, %v5438_v63, %v2301_v29 }
 0x38c   :  { %v2310_v27 = vperm.slane %v2302_v43, %v4471_v30 }
 0x38d   :  { %1665 = vperm.xlu2 %4311, %v4947_v16  }
 0x38e   :  { %v2353_v29 = vrot.slane %v2310_v27, 4 }
 0x38f   :  { %1659 = vperm.xlu1 %4310, %v4947_v16  }
 0x391   :  { %v5421_v49 = vpop.permute.xlu1 %1209 }
 0x395   :  { %4313 = vset.pattern.permute.xlu2 %v5018_v5 }
 0x397   :  { %4312 = vset.pattern.permute.xlu1 %v4980_v4  ;;  %v5428_v51 = vpop.permute.xlu2 %1587 }
 0x398   :  { %7421 = vst [vmem:[#allocation73_spill] sm:$0xff] %v5428_v51  ;;  %v1264_v51 = vpop.permute.xlu0 %1263 }
 0x399   :  { %v5447_v54 = vpop.permute.xlu1 %1219  ;;  %v2029_v43 = vrot.slane %v1264_v51, 4 }
 0x39d   :  { %1677 = vperm.xlu2 %4313, %v4947_v16  }
 0x39f   :  { %1671 = vperm.xlu1 %4312, %v4947_v16  }
 0x3a0   :  { %v1504_v25 = vpop.permute.xlu0 %1503 }
 0x3a1   :  { %v2065_v28 = vrot.slane %v1504_v25, 4 }
 0x3a5   :  { %4315 = vset.pattern.permute.xlu2 %v5002_v2 }
 0x3a7   :  { %4314 = vset.pattern.permute.xlu1 %v4992_v1  ;;  %v5450_v47 = vpop.permute.xlu2 %1605 }
 0x3a8   :  { %7425 = vst [vmem:[#allocation77_spill] sm:$0xff] %v5450_v47  ;;  %v2287_v31 = vrot.slane %v5450_v47, 4  ;;  %v5494_v37 = vpop.permute.xlu0 %1743 }
 0x3a9   :  { %7430 = vst [vmem:[#allocation82_spill] sm:$0xff] %v5494_v37 }
 0x3aa   :  { %v2288_v10 = vsel %vm60_vm0, %v2287_v31, %v5374_v18  ;;  %v5470_v18 = vpop.permute.xlu1 %1569 }
 0x3ab   :  { %v5460_v3 = vperm.slane %v2288_v10, %v4457_v23  ;;  %7428 = vst [vmem:[#allocation80_spill] sm:$0xff] %v5470_v18 }
 0x3ad   :  { %7426 = vst [vmem:[#allocation78_spill] sm:$0xff] %v5460_v3  ;;  %1695 = vperm.xlu2 %4315, %v4944_v14   ;;  %v2326_v19 = vsel %vm60_vm0, %v5460_v3, %v2325_v8  ;;  %v2030_v8 = vsel %vm60_vm0, %v5281_v38, %v2029_v43  ;;  %v2051_v43 = vrot.slane %v5394_v34, 4 }
 0x3ae   :  { %v2334_v41 = vperm.slane %v2326_v19, %v4471_v30  ;;  %v2027_v19 = vrot.slane %v5281_v38, 4 }
 0x3af   :  { %1689 = vperm.xlu1 %4314, %v4947_v16   ;;  %v2041_v16 = vrot.slane %v5251_v55, 4 }
 0x3b0   :  { %v5468_v47 = vsel %vm60_vm0, %v2334_v41, %v2353_v29  ;;  %v2351_v31 = vrot.slane %v2334_v41, 4  ;;  %v2028_v29 = vsel %vm60_vm0, %v2027_v19, %v1264_v51 }
 0x3b1   :  { %7427 = vst [vmem:[#allocation79_spill] sm:$0xff] %v5468_v47  ;;  %v2042_v41 = vsel %vm60_vm0, %v5277_v11, %v2041_v16  ;;  %v2034_v47 = vperm.slane %v2028_v29, %v4457_v23 }
 0x3b2   :  { %v5473_v10 = vsel %vm60_vm0, %v2351_v31, %v2310_v27  ;;  %v2038_v27 = vperm.slane %v2030_v8, %v4457_v23  ;;  %v2040_v31 = vsel %vm60_vm0, %v2039_v52, %v5251_v55  ;;  %v5489_v18 = vpop.permute.xlu1 %1581  ;;  %v2050_v38 = vperm.slane %v2042_v41, %v4457_v23 }
 0x3b3   :  { %7429 = vst [vmem:[#allocation81_spill] sm:$0xff] %v5473_v10  ;;  %v2053_v10 = vrot.slane %v5308_v39, 4  ;;  %v2046_v11 = vperm.slane %v2040_v31, %v4457_v23  ;;  %v2052_v55 = vsel %vm60_vm0, %v2051_v43, %v5308_v39  ;;  %v2077_v19 = vrot.slane %v2034_v47, 4 }
 0x3b4   :  { %v2089_v8 = vrot.slane %v2038_v27, 4  ;;  %v2087_v52 = vrot.slane %v2050_v38, 4  ;;  %v2058_v29 = vperm.slane %v2052_v55, %v4457_v23 }
 0x3b5   :  { %4317 = vset.pattern.permute.xlu2 %v4966_v24  ;;  %v2054_v51 = vsel %vm60_vm0, %v5394_v34, %v2053_v10  ;;  %v2075_v41 = vrot.slane %v2046_v11, 4  ;;  %v2078_v35 = vsel %vm60_vm0, %v2046_v11, %v2077_v19 }
 0x3b6   :  { %v2062_v16 = vperm.slane %v2054_v51, %v4457_v23  ;;  %v2090_v31 = vsel %vm60_vm0, %v2050_v38, %v2089_v8  ;;  %v2088_v34 = vsel %vm60_vm0, %v2087_v52, %v2038_v27  ;;  %v2101_v37 = vrot.slane %v2058_v29, 4  ;;  %v5515_v27 = vpop.permute.xlu0 %1983 }
 0x3b7   :  { %4316 = vset.pattern.permute.xlu1 %v4971_v62  ;;  %v2076_v10 = vsel %vm60_vm0, %v2075_v41, %v2034_v47  ;;  %v2098_v3 = vperm.slane %v2090_v31, %v4471_v30  ;;  %v2094_v38 = vperm.slane %v2088_v34, %v4471_v30 }
 0x3b8   :  { %v2113_v63 = vrot.slane %v2062_v16, 4  ;;  %v2082_v8 = vperm.slane %v2076_v10, %v4471_v30 }
 0x3b9   :  { %v2137_v31 = vrot.slane %v2098_v3, 4 }
 0x3bd   :  { %1707 = vperm.xlu2 %4317, %v4944_v14  }
 0x3bf   :  { %1701 = vperm.xlu1 %4316, %v4944_v14  }
 0x3c1   :  { %v1600_v7 = vpop.permute.xlu1 %1599 }
 0x3c2   :  { %v2063_v39 = vrot.slane %v1600_v7, 4  ;;  %v2066_v43 = vsel %vm60_vm0, %v1600_v7, %v2065_v28  ;;  %v2086_v28 = vperm.slane %v2078_v35, %v4471_v30 }
 0x3c3   :  { %v2074_v51 = vperm.slane %v2066_v43, %v4457_v23  ;;  %v2125_v43 = vrot.slane %v2082_v8, 4 }
 0x3c4   :  { %v2064_v55 = vsel %vm60_vm0, %v2063_v39, %v1504_v25  ;;  %v2133_v39 = vrot.slane %v2094_v38, 4 }
 0x3c5   :  { %v2070_v47 = vperm.slane %v2064_v55, %v4457_v23  ;;  %v2111_v52 = vrot.slane %v2074_v51, 4  ;;  %v2114_v7 = vsel %vm60_vm0, %v2074_v51, %v2113_v63  ;;  %4319 = vset.pattern.permute.xlu2 %v5018_v5 }
 0x3c6   :  { %v2122_v11 = vperm.slane %v2114_v7, %v4471_v30 }
 0x3c7   :  { %v2099_v19 = vrot.slane %v2070_v47, 4  ;;  %4318 = vset.pattern.permute.xlu1 %v4980_v4  ;;  %v2102_v25 = vsel %vm60_vm0, %v2070_v47, %v2101_v37  ;;  %v2112_v41 = vsel %vm60_vm0, %v2111_v52, %v2062_v16  ;;  %v2129_v16 = vrot.slane %v2086_v28, 4 }
 0x3c8   :  { %v2110_v34 = vperm.slane %v2102_v25, %v4471_v30  ;;  %v2118_v10 = vperm.slane %v2112_v41, %v4471_v30  ;;  %v2135_v51 = vrot.slane %v2122_v11, 4  ;;  %v5529_v35 = vsel %vm60_vm0, %v2122_v11, %v2137_v31 }
 0x3c9   :  { %v2100_v63 = vsel %vm60_vm0, %v2099_v19, %v2058_v29  ;;  %7431 = vst [vmem:[#allocation83_spill] sm:$0xff] %v5529_v35  ;;  %v1294_v19 = vpop.permute.xlu0 %1293 }
 0x3ca   :  { %v2127_v55 = vrot.slane %v2110_v34, 4  ;;  %v2106_v7 = vperm.slane %v2100_v63, %v4471_v30  ;;  %v5533_v37 = vsel %vm60_vm0, %v2118_v10, %v2133_v39  ;;  %v5540_v25 = vsel %vm60_vm0, %v2110_v34, %v2129_v16 }
 0x3cb   :  { %v2131_v29 = vrot.slane %v2118_v10, 4  ;;  %v5545_v11 = vsel %vm60_vm0, %v2135_v51, %v2098_v3  ;;  %v3149_v34 = vrot.slane %v1294_v19, 4  ;;  %v3147_v10 = vrot.slane %v5303_v15, 4 }
 0x3cc   :  { %v2128_v47 = vsel %vm60_vm0, %v2127_v55, %v2086_v28  ;;  %v5537_v52 = vsel %vm60_vm0, %v2106_v7, %v2125_v43  ;;  %v2123_v41 = vrot.slane %v2106_v7, 4  ;;  %v3159_v39 = vrot.slane %v5299_v26, 4 }
 0x3cd   :  { %1725 = vperm.xlu2 %4319, %v4944_v14   ;;  %3681 = vrot.lane.b32.xlu0 %v2128_v47, %s4400_s12  ;;  %v5548_v31 = vsel %vm60_vm0, %v2131_v29, %v2094_v38  ;;  %v3150_v63 = vsel %vm60_vm0, %v5303_v15, %v3149_v34  ;;  %v3148_v3 = vsel %vm60_vm0, %v3147_v10, %v1294_v19  ;;  %v3161_v38 = vrot.slane %v5269_v0, 4 }
 0x3ce   :  { %v5552_v28 = vsel %vm60_vm0, %v2123_v41, %v2082_v8  ;;  %v3158_v43 = vperm.slane %v3150_v63, %v4457_v23  ;;  %v3160_v8 = vsel %vm60_vm0, %v3159_v39, %v5269_v0  ;;  %v3171_v55 = vrot.slane %v5489_v18, 4 }
 0x3cf   :  { %1719 = vperm.xlu1 %4318, %v4944_v14   ;;  %7432 = vst [vmem:[#allocation84_spill] sm:$0xff] %v5552_v28  ;;  %v3162_v51 = vsel %vm60_vm0, %v5299_v26, %v3161_v38  ;;  %v3154_v15 = vperm.slane %v3148_v3, %v4457_v23  ;;  %v3173_v16 = vrot.slane %v5326_v44, 4  ;;  %v3166_v47 = vperm.slane %v3160_v8, %v4457_v23 }
 0x3d0   :  { %v3209_v29 = vrot.slane %v3158_v43, 4  ;;  %v3170_v19 = vperm.slane %v3162_v51, %v4457_v23  ;;  %v3172_v0 = vsel %vm60_vm0, %v3171_v55, %v5326_v44 }
 0x3d1   :  { %v5569_v7 = vpop.permute.xlu1 %1611  ;;  %v3174_v41 = vsel %vm60_vm0, %v5489_v18, %v3173_v16  ;;  %v3197_v26 = vrot.slane %v3154_v15, 4  ;;  %v1534_v34 = vpop.permute.xlu0 %1533  ;;  %v3195_v10 = vrot.slane %v3166_v47, 4  ;;  %v3178_v38 = vperm.slane %v3172_v0, %v4457_v23 }
 0x3d2   :  { %7433 = vst [vmem:[#allocation85_spill] sm:$0xff] %v5569_v7  ;;  %v3182_v39 = vperm.slane %v3174_v41, %v4457_v23  ;;  %v3210_v63 = vsel %vm60_vm0, %v3170_v19, %v3209_v29  ;;  %v3207_v3 = vrot.slane %v3170_v19, 4  ;;  %v3185_v8 = vrot.slane %v1534_v34, 4 }
 0x3d3   :  { %v3196_v18 = vsel %vm60_vm0, %v3195_v10, %v3154_v15  ;;  %v3198_v51 = vsel %vm60_vm0, %v3166_v47, %v3197_v26  ;;  %v3218_v41 = vperm.slane %v3210_v63, %v4471_v30  ;;  %v3221_v29 = vrot.slane %v3178_v38, 4 }
 0x3d4   :  { %v3208_v28 = vsel %vm60_vm0, %v3207_v3, %v3158_v43  ;;  %v3233_v7 = vrot.slane %v3182_v39, 4  ;;  %v3202_v19 = vperm.slane %v3196_v18, %v4471_v30  ;;  %v3206_v15 = vperm.slane %v3198_v51, %v4471_v30 }
 0x3d5   :  { %4321 = vset.pattern.permute.xlu2 %v4992_v1  ;;  %v3214_v10 = vperm.slane %v3208_v28, %v4471_v30  ;;  %v3257_v3 = vrot.slane %v3218_v41, 4 }
 0x3d7   :  { %4320 = vset.pattern.permute.xlu1 %v4995_v12 }
 0x3dd   :  { %1737 = vperm.xlu2 %4321, %v4944_v14  }
 0x3df   :  { %1731 = vperm.xlu1 %4320, %v4944_v14  }
 0x3e1   :  { %v1630_v44 = vpop.permute.xlu1 %1629 }
 0x3e2   :  { %v3183_v55 = vrot.slane %v1630_v44, 4  ;;  %v3186_v16 = vsel %vm60_vm0, %v1630_v44, %v3185_v8 }
 0x3e3   :  { %v3194_v14 = vperm.slane %v3186_v16, %v4457_v23 }
 0x3e4   :  { %v3184_v0 = vsel %vm60_vm0, %v3183_v55, %v1534_v34  ;;  %v3249_v55 = vrot.slane %v3206_v15, 4 }
 0x3e5   :  { %v3190_v47 = vperm.slane %v3184_v0, %v4457_v23  ;;  %v3231_v26 = vrot.slane %v3194_v14, 4  ;;  %4323 = vset.pattern.permute.xlu2 %v4966_v24  ;;  %v3234_v43 = vsel %vm60_vm0, %v3194_v14, %v3233_v7  ;;  %v3245_v7 = vrot.slane %v3202_v19, 4 }
 0x3e6   :  { %v3242_v63 = vperm.slane %v3234_v43, %v4471_v30  ;;  %v3253_v0 = vrot.slane %v3214_v10, 4 }
 0x3e7   :  { %v3219_v8 = vrot.slane %v3190_v47, 4  ;;  %4322 = vset.pattern.permute.xlu1 %v4971_v62  ;;  %v3232_v18 = vsel %vm60_vm0, %v3231_v26, %v3182_v39  ;;  %v3222_v34 = vsel %vm60_vm0, %v3190_v47, %v3221_v29 }
 0x3e8   :  { %v3238_v51 = vperm.slane %v3232_v18, %v4471_v30  ;;  %v3230_v44 = vperm.slane %v3222_v34, %v4471_v30  ;;  %v5603_v16 = vsel %vm60_vm0, %v3242_v63, %v3257_v3  ;;  %v3255_v14 = vrot.slane %v3242_v63, 4 }
 0x3e9   :  { %7434 = vst [vmem:[#allocation86_spill] sm:$0xff] %v5603_v16  ;;  %v3220_v28 = vsel %vm60_vm0, %v3219_v8, %v3178_v38 }
 0x3ea   :  { %v3226_v43 = vperm.slane %v3220_v28, %v4471_v30  ;;  %v3251_v35 = vrot.slane %v3238_v51, 4  ;;  %v5608_v39 = vsel %vm60_vm0, %v3230_v44, %v3249_v55  ;;  %v3247_v29 = vrot.slane %v3230_v44, 4 }
 0x3eb   :  { %7435 = vst [vmem:[#allocation87_spill] sm:$0xff] %v5608_v39  ;;  %v5611_v47 = vsel %vm60_vm0, %v3255_v14, %v3218_v41  ;;  %v5614_v26 = vsel %vm60_vm0, %v3238_v51, %v3253_v0  ;;  %v1224_v41 = vsel %vm340_vm1, %v5130_v59, %v5228_v42 }
 0x3ec   :  { %7436 = vst [vmem:[#allocation88_spill] sm:$0xff] %v5611_v47  ;;  %v5617_v3 = vsel %vm60_vm0, %v3226_v43, %v3245_v7  ;;  %v3243_v38 = vrot.slane %v3226_v43, 4  ;;  %v5620_v63 = vsel %vm60_vm0, %v3251_v35, %v3214_v10  ;;  %v5623_v8 = vsel %vm60_vm0, %v3247_v29, %v3206_v15 }
 0x3ed   :  { %7437 = vst [vmem:[#allocation89_spill] sm:$0xff] %v5614_v26  ;;  %1755 = vperm.xlu2 %4323, %v4949_v48   ;;  %v1223_v35 = vsel %vm340_vm1, %v5080_v40, %v5382_v46  ;;  %v1226_v15 = vsel %vm343_vm2, %v1224_v41, %v5391_v6 }
 0x3ee   :  { %7438 = vst [vmem:[#allocation90_spill] sm:$0xff] %v5617_v3  ;;  %v5627_v18 = vsel %vm60_vm0, %v3243_v38, %v3202_v19  ;;  %v1225_v19 = vsel %vm343_vm2, %v1223_v35, %v5403_v36  ;;  %v1228_v10 = vsel %vm346_vm3, %v1226_v15, %v5411_v32  ;;  %v4368_v38 = vld [vmem:[%s7282_s0 + $0x8] sm:$0xff] }
 0x3ef   :  { %7439 = vst [vmem:[#allocation91_spill] sm:$0xff] %v5620_v63  ;;  %1749 = vperm.xlu1 %4322, %v4949_v48   ;;  %v1227_v34 = vsel %vm346_vm3, %v1225_v19, %v5237_v33  ;;  %v1230_v51 = vsel %vm349_vm4, %v1228_v10, %v5249_v53  ;;  %v5664_v53 = vpop.permute.xlu2 %1617  ;;  %v1254_v41 = vsel %vm340_vm1, %v4368_v38, %v5013_v20  ;;  %v4369_v20 = vld [vmem:[%s7282_s0] sm:$0xff] }
 0x3f0   :  { %7440 = vst [vmem:[#allocation92_spill] sm:$0xff] %v5623_v8  ;;  %v1229_v40 = vsel %vm349_vm4, %v1227_v34, %v5399_v22  ;;  %v1232_v42 = vsel %vm352_vm5, %v1230_v51, %v5407_v45  ;;  %v1253_v51 = vsel %vm340_vm1, %v4369_v20, %v5006_v50 }
 0x3f1   :  { %7441 = vst [vmem:[#allocation93_spill] sm:$0xff] %v5627_v18  ;;  %v1231_v59 = vsel %vm352_vm5, %v1229_v40, %v5421_v49  ;;  %v1234_v36 = vsel %vm355_vm6, %v1232_v42, %v5447_v54  ;;  %v5688_v49 = vpop.permute.xlu1 %1641  ;;  %v7486_v18 = vld [vmem:[#allocation45_spill] sm:$0xff] }
 0x3f2   :  { %v1233_v33 = vsel %vm355_vm6, %v1231_v59, %v5261_v56  ;;  %v1236_v46 = vmul.f32 %v1234_v36, %v4918_v13  ;;  %7444 = vst [vmem:[#allocation96_spill] sm:$0xff] %v5688_v49 }
 0x3f3   :  { %v1235_v22 = vmul.f32 %v1233_v33, %v4897_v17  ;;  %v7487_v17 = vld [vmem:[#allocation38_spill] sm:$0xff] }
 0x3f5   :  { %4325 = vset.pattern.permute.xlu2 %v4980_v4 }
 0x3f7   :  { %4324 = vset.pattern.permute.xlu1 %v4983_v60  ;;  %v5669_v45 = vpop.permute.xlu2 %1635 }
 0x3f8   :  { %7442 = vst [vmem:[#allocation94_spill] sm:$0xff] %v5669_v45 }
 0x3fd   :  { %1767 = vperm.xlu2 %4325, %v4949_v48  }
 0x3ff   :  { %1761 = vperm.xlu1 %4324, %v4949_v48   ;;  %v5673_v56 = vpop.permute.xlu2 %1647 }
 0x401   :  { %v5694_v44 = vpop.permute.xlu1 %1659 }
 0x405   :  { %4327 = vset.pattern.permute.xlu2 %v4992_v1 }
 0x406   :  { %1249 = vrot.lane.b32.xlu2 %v1236_v46, %s4406_s18 }
 0x407   :  { %4326 = vset.pattern.permute.xlu1 %v4995_v12  ;;  %v5677_v32 = vpop.permute.xlu2 %1665 }
 0x408   :  { %1247 = vrot.lane.b32.xlu1 %v1235_v22, %s4406_s18  ;;  %7443 = vst [vmem:[#allocation95_spill] sm:$0xff] %v5677_v32 }
 0x40e   :  { %1785 = vperm.xlu2 %4327, %v4949_v48  }
 0x40f   :  { %v5681_v6 = vpop.permute.xlu2 %1677 }
 0x410   :  { %1779 = vperm.xlu1 %4326, %v4949_v48  }
 0x411   :  { %v5700_v28 = vpop.permute.xlu1 %1671 }
 0x412   :  { %7445 = vst [vmem:[#allocation97_spill] sm:$0xff] %v5700_v28 }
 0x416   :  { %4329 = vset.pattern.permute.xlu2 %v4971_v62 }
 0x417   :  { %v5685_v48 = vpop.permute.xlu2 %1695 }
 0x418   :  { %4328 = vset.pattern.permute.xlu1 %v5002_v2 }
 0x41e   :  { %1797 = vperm.xlu2 %4329, %v4956_v61  }
 0x41f   :  { %v5691_v54 = vpop.permute.xlu2 %1707 }
 0x420   :  { %1791 = vperm.xlu1 %4328, %v4956_v61  }
 0x421   :  { %v5706_v14 = vpop.permute.xlu1 %1689 }
 0x422   :  { %7447 = vst [vmem:[#allocation99_spill] sm:$0xff] %v5706_v14 }
 0x426   :  { %4332 = vset.pattern.permute.xlu2 %v4980_v4 }
 0x427   :  { %v5697_v55 = vpop.permute.xlu2 %1725 }
 0x428   :  { %4331 = vset.pattern.permute.xlu1 %v4983_v60 }
 0x42e   :  { %1815 = vperm.xlu2 %4332, %v4956_v61  }
 0x430   :  { %1809 = vperm.xlu1 %4331, %v4956_v61  }
 0x431   :  { %v5712_v43 = vpop.permute.xlu1 %1701 }
 0x432   :  { %v2377_v32 = vrot.slane %v5712_v43, 4 }
 0x436   :  { %4334 = vset.pattern.permute.xlu2 %v4995_v12 }
 0x437   :  { %v5703_v7 = vpop.permute.xlu2 %1737 }
 0x438   :  { %4333 = vset.pattern.permute.xlu1 %v5018_v5  ;;  %7446 = vst [vmem:[#allocation98_spill] sm:$0xff] %v5703_v7 }
 0x43e   :  { %1827 = vperm.xlu2 %4334, %v4956_v61  }
 0x440   :  { %1821 = vperm.xlu1 %4333, %v4956_v61  }
 0x441   :  { %v5718_v29 = vpop.permute.xlu1 %1719 }
 0x442   :  { %7449 = vst [vmem:[#allocation101_spill] sm:$0xff] %v5718_v29 }
 0x446   :  { %4337 = vset.pattern.permute.xlu2 %v4971_v62 }
 0x447   :  { %v5709_v0 = vpop.permute.xlu2 %1755 }
 0x448   :  { %4336 = vset.pattern.permute.xlu1 %v5002_v2 }
 0x44e   :  { %1845 = vperm.xlu2 %4337, %v4953_v57  }
 0x450   :  { %1839 = vperm.xlu1 %4336, %v4953_v57  }
 0x451   :  { %v5727_v15 = vpop.permute.xlu1 %1731 }
 0x456   :  { %4339 = vset.pattern.permute.xlu2 %v4983_v60 }
 0x457   :  { %v5715_v61 = vpop.permute.xlu2 %1767 }
 0x458   :  { %7448 = vst [vmem:[#allocation100_spill] sm:$0xff] %v5715_v61  ;;  %4338 = vset.pattern.permute.xlu1 %v4966_v24 }
 0x45e   :  { %1857 = vperm.xlu2 %4339, %v4953_v57  }
 0x460   :  { %1851 = vperm.xlu1 %4338, %v4953_v57   ;;  %v1250_v35 = vpop.permute.xlu2 %1249 }
 0x461   :  { %v1256_v19 = vsel %vm414_vm8, %v1254_v41, %v1250_v35  ;;  %v5732_v10 = vpop.permute.xlu1 %1749 }
 0x462   :  { %1258 = vst [vmem:[#allocation2 + $0x28] sm:$0xff] %v1256_v19 }
 0x466   :  { %4342 = vset.pattern.permute.xlu2 %v4995_v12 }
 0x468   :  { %4341 = vset.pattern.permute.xlu1 %v5018_v5 }
 0x46e   :  { %1875 = vperm.xlu2 %4342, %v4953_v57  }
 0x470   :  { %1869 = vperm.xlu1 %4341, %v4953_v57  }
 0x471   :  { %v5736_v34 = vpop.permute.xlu1 %1761 }
 0x472   :  { %7450 = vst [vmem:[#allocation102_spill] sm:$0xff] %v5736_v34 }
 0x476   :  { %4344 = vset.pattern.permute.xlu2 %v5002_v2 }
 0x478   :  { %4343 = vset.pattern.permute.xlu1 %v4992_v1 }
 0x47a   :  { %v1248_v40 = vpop.permute.xlu1 %1247 }
 0x47b   :  { %v1255_v59 = vsel %vm414_vm8, %v1253_v51, %v1248_v40  ;;  %v2175_v51 = vrot.slane %v5515_v27, 4 }
 0x47c   :  { %1257 = vst [vmem:[#allocation2] sm:$0xff] %v1255_v59 }
 0x47e   :  { %1887 = vperm.xlu2 %4344, %v4958_v9  }
 0x480   :  { %1881 = vperm.xlu1 %4343, %v4953_v57   ;;  %v5761_v57 = vpop.permute.xlu2 %1785 }
 0x481   :  { %7451 = vst [vmem:[#allocation103_spill] sm:$0xff] %v5761_v57 }
 0x486   :  { %4347 = vset.pattern.permute.xlu2 %v4983_v60 }
 0x488   :  { %4346 = vset.pattern.permute.xlu1 %v4966_v24  ;;  %v5765_v50 = vpop.permute.xlu2 %1797 }
 0x48e   :  { %1905 = vperm.xlu2 %4347, %v4958_v9  }
 0x490   :  { %1899 = vperm.xlu1 %4346, %v4958_v9  }
 0x496   :  { %4349 = vset.pattern.permute.xlu2 %v5018_v5 }
 0x498   :  { %4348 = vset.pattern.permute.xlu1 %v4980_v4 }
 0x49e   :  { %1917 = vperm.xlu2 %4349, %v4958_v9  }
 0x4a0   :  { %1911 = vperm.xlu1 %4348, %v4958_v9  }
 0x4a6   :  { %4352 = vset.pattern.permute.xlu2 %v5002_v2  ;;  %v5769_v2 = vpop.permute.xlu2 %1815 }
 0x4a7   :  { %7452 = vst [vmem:[#allocation104_spill] sm:$0xff] %v5769_v2 }
 0x4a8   :  { %4351 = vset.pattern.permute.xlu1 %v4992_v1 }
 0x4ae   :  { %1935 = vperm.xlu2 %4352, %v4968_v58  }
 0x4b0   :  { %1929 = vperm.xlu1 %4351, %v4958_v9   ;;  %v5773_v9 = vpop.permute.xlu2 %1827 }
 0x4b6   :  { %4354 = vset.pattern.permute.xlu2 %v4966_v24 }
 0x4b8   :  { %4353 = vset.pattern.permute.xlu1 %v4971_v62  ;;  %v5777_v42 = vpop.permute.xlu2 %1845 }
 0x4be   :  { %1947 = vperm.xlu2 %4354, %v4968_v58  }
 0x4c0   :  { %1941 = vperm.xlu1 %4353, %v4968_v58   ;;  %v5781_v36 = vpop.permute.xlu2 %1857 }
 0x4c1   :  { %7453 = vst [vmem:[#allocation105_spill] sm:$0xff] %v5781_v36 }
 0x4c6   :  { %4357 = vset.pattern.permute.xlu2 %v5018_v5  ;;  %v5785_v5 = vpop.permute.xlu1 %1779 }
 0x4c8   :  { %4356 = vset.pattern.permute.xlu1 %v4980_v4  ;;  %v5787_v33 = vpop.permute.xlu2 %1875 }
 0x4ce   :  { %1965 = vperm.xlu2 %4357, %v4968_v58   ;;  %v1792_v46 = vpop.permute.xlu1 %1791 }
 0x4d0   :  { %1959 = vperm.xlu1 %4356, %v4968_v58  }
 0x4d6   :  { %4359 = vset.pattern.permute.xlu2 %v4992_v1  ;;  %v5793_v38 = vpop.permute.xlu1 %1809 }
 0x4d8   :  { %4358 = vset.pattern.permute.xlu1 %v4995_v12  ;;  %v1888_v22 = vpop.permute.xlu2 %1887 }
 0x4d9   :  { %v2176_v59 = vsel %vm60_vm0, %v2175_v51, %v1888_v22 }
 0x4da   :  { %v2182_v49 = vperm.slane %v2176_v59, %v4457_v23 }
 0x4dc   :  { %v2211_v16 = vrot.slane %v2182_v49, 4 }
 0x4de   :  { %1977 = vperm.xlu2 %4359, %v4968_v58  }
 0x4e0   :  { %1971 = vperm.xlu1 %4358, %v4968_v58   ;;  %v7455_v58 = vld [vmem:[#allocation82_spill] sm:$0xff] }
 0x4e1   :  { %v2139_v35 = vrot.slane %v7455_v58, 4 }
 0x4e3   :  { %v2140_v20 = vsel %vm60_vm0, %v2139_v35, %v5673_v56 }
 0x4e6   :  { %4362 = vset.pattern.permute.xlu2 %v4966_v24  ;;  %v2151_v24 = vrot.slane %v1792_v46, 4 }
 0x4e8   :  { %4361 = vset.pattern.permute.xlu1 %v4971_v62  ;;  %v5795_v41 = vpop.permute.xlu2 %1905  ;;  %v1822_v62 = vpop.permute.xlu1 %1821 }
 0x4e9   :  { %7454 = vst [vmem:[#allocation106_spill] sm:$0xff] %v5795_v41 }
 0x4ee   :  { %1995 = vperm.xlu2 %4362, %v4962_v21  }
 0x4f0   :  { %1989 = vperm.xlu1 %4361, %v4962_v21   ;;  %v1840_v57 = vpop.permute.xlu1 %1839 }
 0x4f1   :  { %v2165_v47 = vrot.slane %v1840_v57, 4 }
 0x4f6   :  { %4364 = vset.pattern.permute.xlu2 %v4980_v4  ;;  %v2152_v4 = vsel %vm60_vm0, %v2151_v24, %v5685_v48 }
 0x4f7   :  { %v2158_v40 = vperm.slane %v2152_v4, %v4457_v23 }
 0x4f8   :  { %4363 = vset.pattern.permute.xlu1 %v4983_v60  ;;  %v5800_v19 = vpop.permute.xlu2 %1917  ;;  %v2146_v60 = vperm.slane %v2140_v20, %v4457_v23 }
 0x4f9   :  { %v2187_v7 = vrot.slane %v2158_v40, 4 }
 0x4fa   :  { %v2189_v14 = vrot.slane %v2146_v60, 4 }
 0x4fb   :  { %v2188_v51 = vsel %vm60_vm0, %v2187_v7, %v2146_v60 }
 0x4fc   :  { %v2190_v24 = vsel %vm60_vm0, %v2158_v40, %v2189_v14  ;;  %v5823_v14 = vperm.slane %v2188_v51, %v4471_v30 }
 0x4fd   :  { %v2198_v8 = vperm.slane %v2190_v24, %v4471_v30 }
 0x4fe   :  { %2007 = vperm.xlu2 %4364, %v4962_v21  }
 0x4ff   :  { %v2241_v60 = vrot.slane %v2198_v8, 4 }
 0x500   :  { %2001 = vperm.xlu1 %4363, %v4962_v21  }
 0x506   :  { %4366 = vset.pattern.permute.xlu2 %v4992_v1  ;;  %v2177_v1 = vrot.slane %v1888_v22, 4 }
 0x508   :  { %4365 = vset.pattern.permute.xlu1 %v4995_v12  ;;  %v1936_v35 = vpop.permute.xlu2 %1935 }
 0x509   :  { %v2163_v26 = vrot.slane %v1936_v35, 4  ;;  %v2166_v45 = vsel %vm60_vm0, %v1936_v35, %v2165_v47  ;;  %v2178_v47 = vsel %vm60_vm0, %v5515_v27, %v2177_v1 }
 0x50b   :  { %v2164_v20 = vsel %vm60_vm0, %v2163_v26, %v1840_v57  ;;  %v2141_v26 = vrot.slane %v5673_v56, 4  ;;  %v2174_v57 = vperm.slane %v2166_v45, %v4457_v23  ;;  %v2237_v56 = vrot.slane %v5823_v14, 4 }
 0x50c   :  { %v2170_v4 = vperm.slane %v2164_v20, %v4457_v23  ;;  %v2186_v45 = vperm.slane %v2178_v47, %v4457_v23  ;;  %v1774_v20 = vpop.permute.xlu0 %1773 }
 0x50d   :  { %v2142_v27 = vsel %vm60_vm0, %v7455_v58, %v2141_v26  ;;  %v7456_v58 = vld [vmem:[#allocation78_spill] sm:$0xff]  ;;  %v3261_v26 = vrot.slane %v5681_v6, 4 }
 0x50e   :  { %v2213_v59 = vrot.slane %v2170_v4, 4  ;;  %2025 = vperm.xlu2 %4366, %v4962_v21   ;;  %v2212_v12 = vsel %vm60_vm0, %v2211_v16, %v2170_v4  ;;  %v2153_v16 = vrot.slane %v5685_v48, 4  ;;  %v3271_v48 = vrot.slane %v1822_v62, 4 }
 0x50f   :  { %v5833_v40 = vperm.slane %v2212_v12, %v4471_v30  ;;  %v2150_v4 = vperm.slane %v2142_v27, %v4457_v23  ;;  %v2223_v1 = vrot.slane %v2186_v45, 4  ;;  %v2323_v12 = vrot.slane %v7456_v58, 4  ;;  %v7457_v27 = vld [vmem:[#allocation76_spill] sm:$0xff] }
 0x510   :  { %2019 = vperm.xlu1 %4365, %v4962_v21   ;;  %v2214_v7 = vsel %vm60_vm0, %v2182_v49, %v2213_v59  ;;  %v2225_v21 = vrot.slane %v2174_v57, 4  ;;  %v2154_v49 = vsel %vm60_vm0, %v1792_v46, %v2153_v16  ;;  %v3273_v46 = vrot.slane %v5697_v55, 4 }
 0x511   :  { %v2222_v22 = vperm.slane %v2214_v7, %v4471_v30  ;;  %v2238_v24 = vsel %vm60_vm0, %v5833_v40, %v2237_v56  ;;  %v2162_v51 = vperm.slane %v2154_v49, %v4457_v23  ;;  %v5854_v7 = vpop.permute.xlu1 %1851  ;;  %v2224_v47 = vsel %vm60_vm0, %v2223_v1, %v2174_v57 }
 0x512   :  { %v2226_v59 = vsel %vm60_vm0, %v2186_v45, %v2225_v21  ;;  %v3274_v16 = vsel %vm60_vm0, %v1822_v62, %v3273_v46  ;;  %v5866_v21 = vperm.slane %v2224_v47, %v4471_v30  ;;  %v2324_v57 = vsel %vm60_vm0, %v2323_v12, %v7457_v27  ;;  %v7458_v46 = vld [vmem:[#allocation75_spill] sm:$0xff] }
 0x513   :  { %v2242_v35 = vsel %vm60_vm0, %v2222_v22, %v2241_v60  ;;  %v3272_v60 = vsel %vm60_vm0, %v3271_v48, %v5697_v55  ;;  %v5861_v56 = vperm.slane %v2226_v59, %v4471_v30  ;;  %v2199_v45 = vrot.slane %v2162_v51, 4 }
 0x514   :  { %3691 = vrot.lane.b32.xlu0 %v2242_v35, %s4399_s11  ;;  %v2239_v35 = vrot.slane %v2222_v22, 4  ;;  %v3259_v49 = vrot.slane %v1774_v20, 4  ;;  %v3278_v55 = vperm.slane %v3272_v60, %v4457_v23  ;;  %v3282_v62 = vperm.slane %v3274_v16, %v4457_v23  ;;  %v2014_v59 = vpop.permute.xlu0 %2013 }
 0x515   :  { %v2247_v1 = vrot.slane %v5861_v56, 4  ;;  %v2200_v12 = vsel %vm60_vm0, %v2199_v45, %v2150_v4  ;;  %v2299_v47 = vrot.slane %v7458_v46, 4 }
 0x516   :  { %3675 = vrot.lane.b32.xlu2 %v2238_v24, %s4398_s10  ;;  %v3262_v24 = vsel %vm60_vm0, %v1774_v20, %v3261_v26  ;;  %v2240_v48 = vsel %vm60_vm0, %v2239_v35, %v2198_v8  ;;  %v3307_v26 = vrot.slane %v3278_v55, 4  ;;  %v3319_v60 = vrot.slane %v3282_v62, 4 }
 0x517   :  { %v3270_v8 = vperm.slane %v3262_v24, %v4457_v23  ;;  %v5892_v35 = vperm.slane %v2324_v57, %v4471_v30  ;;  %v7459_v24 = vld [vmem:[#allocation74_spill] sm:$0xff] }
 0x518   :  { %3673 = vrot.lane.b32.xlu1 %v5537_v52, %s4398_s10  ;;  %v2201_v52 = vrot.slane %v2150_v4, 4  ;;  %v5879_v58 = vpop.permute.xlu2 %1947  ;;  %v2300_v57 = vsel %vm60_vm0, %v2299_v47, %v7459_v24 }
 0x519   :  { %v1870_v16 = vpop.permute.xlu1 %1869  ;;  %v2347_v46 = vrot.slane %v5892_v35, 4  ;;  %v2306_v47 = vperm.slane %v2300_v57, %v4471_v30 }
 0x51a   :  { %v2202_v22 = vsel %vm60_vm0, %v2162_v51, %v2201_v52  ;;  %v2243_v51 = vrot.slane %v5866_v21, 4  ;;  %v3295_v52 = vrot.slane %v2014_v59, 4 }
 0x51b   :  { %v5887_v20 = vperm.slane %v2202_v22, %v4471_v30  ;;  %v2348_v24 = vsel %vm60_vm0, %v2347_v46, %v2306_v47 }
 0x51c   :  { %3705 = vrot.lane.b32.xlu0 %v5533_v37, %s4402_s14  ;;  %v3297_v37 = vrot.slane %v5800_v19, 4 }
 0x51d   :  { %v2248_v45 = vsel %vm60_vm0, %v2247_v1, %v5887_v20 }
 0x51e   :  { %3689 = vrot.lane.b32.xlu2 %v5540_v25, %s4399_s11  ;;  %v3260_v25 = vsel %vm60_vm0, %v3259_v49, %v5681_v6  ;;  %v3298_v4 = vsel %vm60_vm0, %v2014_v59, %v3297_v37  ;;  %v2206_v6 = vperm.slane %v2200_v12, %v4471_v30  ;;  %v3296_v49 = vsel %vm60_vm0, %v3295_v52, %v5800_v19 }
 0x51f   :  { %v3266_v27 = vperm.slane %v3260_v25, %v4457_v23  ;;  %v3306_v37 = vperm.slane %v3298_v4, %v4457_v23  ;;  %v3320_v59 = vsel %vm60_vm0, %v3319_v60, %v3270_v8  ;;  %v3285_v12 = vrot.slane %v1870_v16, 4 }
 0x520   :  { %3683 = vrot.lane.b32.xlu1 %v2240_v48, %s4400_s12  ;;  %v2244_v22 = vsel %vm60_vm0, %v2243_v51, %v2206_v6  ;;  %v3321_v48 = vrot.slane %v3270_v8, 4  ;;  %v3302_v51 = vperm.slane %v3296_v49, %v4457_v23  ;;  %v3326_v8 = vperm.slane %v3320_v59, %v4471_v30 }
 0x521   :  { %v3308_v1 = vsel %vm60_vm0, %v3307_v26, %v3266_v27  ;;  %v3309_v25 = vrot.slane %v3266_v27, 4  ;;  %v1882_v60 = vpop.permute.xlu1 %1881 }
 0x522   :  { %v3322_v19 = vsel %vm60_vm0, %v3282_v62, %v3321_v48  ;;  %v3314_v26 = vperm.slane %v3308_v1, %v4471_v30  ;;  %v3331_v48 = vrot.slane %v3302_v51, 4 }
 0x523   :  { %v3310_v62 = vsel %vm60_vm0, %v3278_v55, %v3309_v25  ;;  %v3330_v57 = vperm.slane %v3322_v19, %v4471_v30  ;;  %v3365_v25 = vrot.slane %v3326_v8, 4 }
 0x524   :  { %3715 = vrot.lane.b32.xlu0 %v2248_v45, %s4403_s15  ;;  %v3318_v59 = vperm.slane %v3310_v62, %v4471_v30 }
 0x526   :  { %3699 = vrot.lane.b32.xlu2 %v2244_v22, %s4401_s13  ;;  %v3343_v22 = vrot.slane %v3306_v37, 4 }
 0x528   :  { %v1966_v52 = vpop.permute.xlu2 %1965  ;;  %3697 = vrot.lane.b32.xlu1 %v5548_v31, %s4401_s13  ;;  %v2245_v31 = vrot.slane %v2206_v6, 4 }
 0x529   :  { %v3283_v4 = vrot.slane %v1966_v52, 4  ;;  %v3286_v45 = vsel %vm60_vm0, %v1966_v52, %v3285_v12 }
 0x52a   :  { %v3294_v27 = vperm.slane %v3286_v45, %v4457_v23  ;;  %v3357_v45 = vrot.slane %v3314_v26, 4  ;;  %v2246_v6 = vsel %vm60_vm0, %v5866_v21, %v2245_v31 }
 0x52b   :  { %v3284_v49 = vsel %vm60_vm0, %v3283_v4, %v1870_v16 }
 0x52c   :  { %v3290_v12 = vperm.slane %v3284_v49, %v4457_v23  ;;  %v3344_v1 = vsel %vm60_vm0, %v3343_v22, %v3294_v27  ;;  %v3345_v52 = vrot.slane %v3294_v27, 4  ;;  %3729 = vrot.lane.b32.xlu0 %v2348_v24, %s4405_s17 }
 0x52d   :  { %v3350_v55 = vperm.slane %v3344_v1, %v4471_v30 }
 0x52e   :  { %v3333_v16 = vrot.slane %v3290_v12, 4  ;;  %3713 = vrot.lane.b32.xlu2 %v5545_v11, %s4403_s15  ;;  %v3332_v46 = vsel %vm60_vm0, %v3331_v48, %v3290_v12  ;;  %v3346_v19 = vsel %vm60_vm0, %v3306_v37, %v3345_v52  ;;  %v3369_v11 = vrot.slane %v3330_v57, 4  ;;  %v5948_v48 = vpop.permute.xlu1 %1899 }
 0x52f   :  { %v3338_v4 = vperm.slane %v3332_v46, %v4471_v30  ;;  %v5936_v22 = vsel %vm60_vm0, %v3350_v55, %v3365_v25  ;;  %v3363_v27 = vrot.slane %v3350_v55, 4  ;;  %v3354_v62 = vperm.slane %v3346_v19, %v4471_v30 }
 0x530   :  { %7460 = vst [vmem:[#allocation82_spill] sm:$0xff] %v5936_v22  ;;  %3707 = vrot.lane.b32.xlu1 %v2246_v6, %s4402_s14  ;;  %v3334_v49 = vsel %vm60_vm0, %v3302_v51, %v3333_v16  ;;  %v3361_v12 = vrot.slane %v3318_v59, 4  ;;  %v2249_v55 = vrot.slane %v5887_v20, 4  ;;  %v7468_v20 = vld [vmem:[#allocation83_spill] sm:$0xff]  ;;  %v7480_v22 = vld [vmem:[#allocation54_spill] sm:$0xff] }
 0x531   :  { %v3342_v24 = vperm.slane %v3334_v49, %v4471_v30  ;;  %v5943_v21 = vsel %vm60_vm0, %v3338_v4, %v3357_v45  ;;  %v3355_v31 = vrot.slane %v3338_v4, 4  ;;  %v5946_v37 = vsel %vm60_vm0, %v3363_v27, %v3326_v8 }
 0x532   :  { %7461 = vst [vmem:[#allocation78_spill] sm:$0xff] %v5943_v21  ;;  %v5951_v1 = vsel %vm60_vm0, %v3354_v62, %v3369_v11  ;;  %v3367_v52 = vrot.slane %v3354_v62, 4  ;;  %v2250_v8 = vsel %vm60_vm0, %v5861_v56, %v2249_v55  ;;  %v2375_v49 = vrot.slane %v5765_v50, 4  ;;  %v7471_v11 = vld [vmem:[#allocation41_spill] sm:$0xff]  ;;  %v7474_v55 = vld [vmem:[#allocation63_spill] sm:$0xff] }
 0x533   :  { %7462 = vst [vmem:[#allocation76_spill] sm:$0xff] %v5946_v37  ;;  %v3359_v51 = vrot.slane %v3342_v24, 4  ;;  %v5955_v25 = vsel %vm60_vm0, %v3355_v31, %v3314_v26  ;;  %v5958_v45 = vsel %vm60_vm0, %v3342_v24, %v3361_v12  ;;  %v2475_v24 = vrot.slane %v7471_v11, 4  ;;  %v7472_v31 = vld [vmem:[#allocation29_spill] sm:$0xff] }
 0x534   :  { %7463 = vst [vmem:[#allocation75_spill] sm:$0xff] %v5951_v1  ;;  %v5961_v16 = vsel %vm60_vm0, %v3367_v52, %v3330_v57  ;;  %v2349_v57 = vrot.slane %v2306_v47, 4  ;;  %v2253_v12 = vrot.slane %v7472_v31, 4  ;;  %v2376_v47 = vsel %vm60_vm0, %v2375_v49, %v5712_v43  ;;  %v7478_v1 = vld [vmem:[#allocation77_spill] sm:$0xff] }
 0x535   :  { %7464 = vst [vmem:[#allocation74_spill] sm:$0xff] %v5955_v25  ;;  %v5966_v6 = vsel %vm60_vm0, %v3359_v51, %v3318_v59  ;;  %v2289_v51 = vrot.slane %v7474_v55, 4  ;;  %v2382_v49 = vperm.slane %v2376_v47, %v4457_v23  ;;  %v7479_v55 = vld [vmem:[#allocation25_spill] sm:$0xff]  ;;  %v2277_v39 = vrot.slane %v7480_v22, 4 }
 0x536   :  { %7465 = vst [vmem:[#allocation107_spill] sm:$0xff] %v5958_v45  ;;  %3723 = vrot.lane.b32.xlu2 %v2250_v8, %s4404_s16  ;;  %v5971_v19 = vpop.permute.xlu1 %1911  ;;  %v2350_v27 = vsel %vm60_vm0, %v5892_v35, %v2349_v57  ;;  %v7475_v8 = vld [vmem:[#allocation28_spill] sm:$0xff]  ;;  %v2363_v57 = vrot.slane %v5732_v10, 4 }
 0x537   :  { %7466 = vst [vmem:[#allocation108_spill] sm:$0xff] %v5961_v16  ;;  %v7477_v16 = vld [vmem:[#allocation23_spill] sm:$0xff]  ;;  %v2290_v45 = vsel %vm60_vm0, %v7478_v1, %v2289_v51  ;;  %v7483_v51 = vld [vmem:[#allocation58_spill] sm:$0xff] }
 0x538   :  { %7467 = vst [vmem:[#allocation109_spill] sm:$0xff] %v5966_v6  ;;  %v1978_v46 = vpop.permute.xlu2 %1977  ;;  %3721 = vrot.lane.b32.xlu1 %v7468_v20, %s4404_s16  ;;  %v7476_v20 = vld [vmem:[#allocation34_spill] sm:$0xff]  ;;  %v2476_v31 = vsel %vm60_vm0, %v2475_v24, %v7477_v16  ;;  %v7482_v24 = vld [vmem:[#allocation61_spill] sm:$0xff]  ;;  %v2298_v47 = vperm.slane %v2290_v45, %v4457_v23  ;;  %v2364_v21 = vsel %vm60_vm0, %v2363_v57, %v7483_v51  ;;  %v7484_v6 = vld [vmem:[#allocation27_spill] sm:$0xff] }
 0x539   :  { %v3645_v26 = vrot.slane %v1978_v46, 4  ;;  %7469 = vst [vmem:[#allocation83_spill] sm:$0xff] %v5971_v19  ;;  %v2265_v46 = vrot.slane %v7475_v8, 4  ;;  %v6013_v25 = vperm.slane %v2476_v31, %v4457_v23  ;;  %v2278_v1 = vsel %vm60_vm0, %v7482_v24, %v2277_v39 }
 0x53a   :  { %v2286_v3 = vperm.slane %v2278_v1, %v4457_v23  ;;  %v2335_v28 = vrot.slane %v2298_v47, 4 }
 0x53b   :  { %v5974_v4 = vsel %vm60_vm0, %v3645_v26, %v1882_v60  ;;  %v7473_v60 = vld [vmem:[#allocation47_spill] sm:$0xff]  ;;  %v2254_v26 = vsel %vm60_vm0, %v7476_v20, %v2253_v12  ;;  %v2525_v13 = vrot.slane %v6013_v25, 4 }
 0x53c   :  { %v2487_v52 = vrot.slane %v7473_v60, 4  ;;  %v2262_v12 = vperm.slane %v2254_v26, %v4457_v23  ;;  %v7481_v20 = vld [vmem:[#allocation55_spill] sm:$0xff]  ;;  %v2411_v26 = vrot.slane %v2382_v49, 4 }
 0x53d   :  { %v2266_v63 = vsel %vm60_vm0, %v7481_v20, %v2265_v46  ;;  %v2489_v20 = vrot.slane %v7479_v55, 4 }
 0x53e   :  { %3737 = vrot.lane.b32.xlu2 %v2350_v27, %s4406_s18  ;;  %v5979_v56 = vpop.permute.xlu1 %1929  ;;  %v2488_v8 = vsel %vm60_vm0, %v2487_v52, %v7479_v55  ;;  %v2499_v52 = vrot.slane %v7484_v6, 4  ;;  %v2274_v39 = vperm.slane %v2266_v63, %v4457_v23  ;;  %v2313_v45 = vrot.slane %v2262_v12, 4 }
 0x53f   :  { %v6022_v22 = vperm.slane %v2488_v8, %v4457_v23  ;;  %v2370_v8 = vperm.slane %v2364_v21, %v4457_v23  ;;  %v6040_v63 = vsel %vm60_vm0, %v7473_v60, %v2489_v20 }
 0x540   :  { %v2500_v57 = vsel %vm60_vm0, %v2499_v52, %v7486_v18  ;;  %v2311_v61 = vrot.slane %v2274_v39, 4  ;;  %v2314_v2 = vsel %vm60_vm0, %v2274_v39, %v2313_v45  ;;  %v3650_v45 = vperm.slane %v5974_v4, %v4457_v23 }
 0x541   :  { %v2412_v52 = vsel %vm60_vm0, %v2411_v26, %v2370_v8  ;;  %v6046_v21 = vperm.slane %v2500_v57, %v4457_v23  ;;  %v2413_v60 = vrot.slane %v2370_v8, 4  ;;  %v2336_v57 = vsel %vm60_vm0, %v2335_v28, %v2286_v3 }
 0x542   :  { %v2418_v1 = vperm.slane %v2412_v52, %v4471_v30  ;;  %v2378_v52 = vsel %vm60_vm0, %v5765_v50, %v2377_v32  ;;  %v6071_v43 = vperm.slane %v2336_v57, %v4471_v30 }
 0x543   :  { %v2414_v34 = vsel %vm60_vm0, %v2382_v49, %v2413_v60  ;;  %v6087_v39 = vperm.slane %v2378_v52, %v4457_v23 }
 0x544   :  { %v6077_v49 = vperm.slane %v2414_v34, %v4471_v30 }
 0x545   :  { %v2423_v4 = vrot.slane %v6087_v39, 4 }
 0x546   :  { %v5981_v59 = vpop.permute.xlu1 %1941 }
 0x547   :  { %v2387_v37 = vrot.slane %v5981_v59, 4 }
 0x548   :  { %v5991_v35 = vpop.permute.xlu2 %1995 }
 0x549   :  { %v2388_v46 = vsel %vm60_vm0, %v2387_v37, %v5777_v42  ;;  %v6050_v37 = vsel %vm60_vm0, %v6022_v22, %v2525_v13 }
 0x54a   :  { %v2394_v31 = vperm.slane %v2388_v46, %v4457_v23  ;;  %v7488_v46 = vld [vmem:[#allocation62_spill] sm:$0xff] }
 0x54b   :  { %v2401_v29 = vrot.slane %v7488_v46, 4 }
 0x54e   :  { %v5983_v62 = vpop.permute.xlu1 %1959 }
 0x54f   :  { %7470 = vst [vmem:[#allocation110_spill] sm:$0xff] %v5983_v62  ;;  %v2437_v62 = vrot.slane %v2394_v31, 4 }
 0x556   :  { %v5998_v27 = vpop.permute.xlu1 %1971 }
 0x558   :  { %v6029_v24 = vpop.permute.xlu2 %2007 }
 0x559   :  { %7485 = vst [vmem:[#allocation41_spill] sm:$0xff] %v6029_v24  ;;  %v2337_v24 = vrot.slane %v2286_v3, 4 }
 0x562   :  { %v1990_v55 = vpop.permute.xlu1 %1989 }
 0x563   :  { %v2399_v19 = vrot.slane %v1990_v55, 4  ;;  %v2402_v13 = vsel %vm60_vm0, %v1990_v55, %v2401_v29 }
 0x564   :  { %v6074_v29 = vperm.slane %v2402_v13, %v4457_v23 }
 0x565   :  { %v2400_v20 = vsel %vm60_vm0, %v2399_v19, %v7488_v46  ;;  %v2312_v19 = vsel %vm60_vm0, %v2311_v61, %v2262_v12  ;;  %v2338_v46 = vsel %vm60_vm0, %v2298_v47, %v2337_v24  ;;  %v2389_v12 = vrot.slane %v5777_v42, 4 }
 0x566   :  { %v2406_v26 = vperm.slane %v2400_v20, %v4457_v23  ;;  %v2365_v47 = vrot.slane %v7483_v51, 4  ;;  %v2235_v24 = vrot.slane %v5833_v40, 4  ;;  %v2447_v51 = vrot.slane %v6074_v29, 4 }
 0x567   :  { %v2346_v40 = vperm.slane %v2338_v46, %v4471_v30 }
 0x568   :  { %v2435_v41 = vrot.slane %v2406_v26, 4  ;;  %v2026_v8 = vpop.permute.xlu2 %2025  ;;  %v2438_v36 = vsel %vm60_vm0, %v2406_v26, %v2437_v62  ;;  %v2461_v62 = vrot.slane %v2418_v1, 4  ;;  %v2366_v60 = vsel %vm60_vm0, %v5732_v10, %v2365_v47 }
 0x569   :  { %v3651_v3 = vrot.slane %v2026_v8, 4  ;;  %v6068_v28 = vperm.slane %v2438_v36, %v4471_v30  ;;  %v2355_v26 = vrot.slane %v6071_v43, 4  ;;  %v2236_v8 = vsel %vm60_vm0, %v2235_v24, %v5823_v14 }
 0x56a   :  { %v2436_v61 = vsel %vm60_vm0, %v2435_v41, %v2394_v31  ;;  %v2390_v41 = vsel %vm60_vm0, %v5981_v59, %v2389_v12  ;;  %v2587_v59 = vrot.slane %v5709_v0, 4  ;;  %v2374_v14 = vperm.slane %v2366_v60, %v4457_v23 }
 0x56b   :  { %v3652_v32 = vsel %vm60_vm0, %v3651_v3, %v5979_v56  ;;  %v2463_v50 = vrot.slane %v6068_v28, 4  ;;  %v2442_v36 = vperm.slane %v2436_v61, %v4471_v30  ;;  %v6109_v57 = vperm.slane %v2390_v41, %v4457_v23 }
 0x56c   :  { %v3656_v34 = vperm.slane %v3652_v32, %v4457_v23  ;;  %v2322_v61 = vperm.slane %v2314_v2, %v4471_v30  ;;  %v2318_v32 = vperm.slane %v2312_v19, %v4471_v30  ;;  %v3497_v24 = vrot.slane %v5727_v15, 4 }
 0x56d   :  { %v2464_v42 = vsel %vm60_vm0, %v2463_v50, %v6077_v49  ;;  %v2462_v56 = vsel %vm60_vm0, %v2442_v36, %v2461_v62  ;;  %v2459_v31 = vrot.slane %v2442_v36, 4  ;;  %v7491_v62 = vld [vmem:[#allocation85_spill] sm:$0xff]  ;;  %v2448_v50 = vsel %vm60_vm0, %v2447_v51, %v6109_v57  ;;  %v7492_v36 = vld [vmem:[#allocation67_spill] sm:$0xff] }
 0x56e   :  { %v3663_v55 = vrot.slane %v3656_v34, 4  ;;  %3747 = vrot.lane.b32.xlu2 %v2464_v42, %s4407_s19  ;;  %3739 = vrot.lane.b32.xlu0 %v2462_v56, %s4406_s18  ;;  %v2511_v12 = vrot.slane %v7491_v62, 4  ;;  %v3485_v47 = vrot.slane %v7492_v36, 4  ;;  %v2588_v34 = vsel %vm60_vm0, %v2587_v59, %v5694_v44  ;;  %v7493_v59 = vld [vmem:[#allocation53_spill] sm:$0xff] }
 0x56f   :  { %v2460_v20 = vsel %vm60_vm0, %v2459_v31, %v2418_v1  ;;  %v7490_v1 = vrot.slane %v7487_v17, 4  ;;  %v3483_v41 = vrot.slane %v5785_v5, 4  ;;  %v2356_v42 = vsel %vm60_vm0, %v2355_v26, %v2318_v32 }
 0x570   :  { %v3676_v13 = vpop.permute.xlu2 %3675  ;;  %3731 = vrot.lane.b32.xlu1 %v2460_v20, %s4405_s17  ;;  %v6115_v46 = vsel %vm60_vm0, %v3663_v55, %v3650_v45  ;;  %v2424_v56 = vsel %vm60_vm0, %v2423_v4, %v2374_v14  ;;  %v2359_v19 = vrot.slane %v2346_v40, 4  ;;  %v3486_v31 = vsel %vm60_vm0, %v5785_v5, %v3485_v47  ;;  %v7494_v4 = vld [vmem:[#allocation79_spill] sm:$0xff] }
 0x571   :  { %7489 = vst [vmem:[#allocation29_spill] sm:$0xff] %v6115_v46  ;;  %v2600_v52 = vsel %vm60_vm0, %v7490_v1, %v5691_v54  ;;  %v6123_v3 = vsel %vm340_vm1, %v2236_v8, %v3676_v13  ;;  %v3495_v45 = vrot.slane %v5773_v9, 4  ;;  %v3498_v51 = vsel %vm60_vm0, %v5773_v9, %v3497_v24  ;;  %v7495_v13 = vld [vmem:[#allocation68_spill] sm:$0xff] }
 0x572   :  { %v6137_v2 = vperm.slane %v2600_v52, %v4457_v23  ;;  %v2454_v55 = vperm.slane %v2448_v50, %v4471_v30  ;;  %v2512_v60 = vsel %vm60_vm0, %v2511_v12, %v7493_v59  ;;  %v6150_v20 = vperm.slane %v2588_v34, %v4457_v23  ;;  %v7496_v34 = vld [vmem:[#allocation81_spill] sm:$0xff] }
 0x573   :  { %v2623_v26 = vrot.slane %v5991_v35, 4  ;;  %v2361_v5 = vrot.slane %v2322_v61, 4  ;;  %v3521_v8 = vrot.slane %v7495_v13, 4  ;;  %v3484_v9 = vsel %vm60_vm0, %v3483_v41, %v7492_v36 }
 0x574   :  { %v2430_v1 = vperm.slane %v2424_v56, %v4471_v30  ;;  %v2357_v52 = vrot.slane %v2318_v32, 4  ;;  %v2635_v12 = vrot.slane %v6137_v2, 4  ;;  %v3494_v50 = vperm.slane %v3486_v31, %v4457_v23 }
 0x575   :  { %v3506_v47 = vperm.slane %v3498_v51, %v4457_v23  ;;  %v6166_v24 = vsel %vm60_vm0, %v2346_v40, %v2361_v5  ;;  %v3496_v36 = vsel %vm60_vm0, %v3495_v45, %v5727_v15  ;;  %v2467_v41 = vrot.slane %v2454_v55, 4 }
 0x576   :  { %3761 = vrot.lane.b32.xlu2 %v2356_v42, %s4409_s21  ;;  %3753 = vrot.lane.b32.xlu0 %v7494_v4, %s4408_s20  ;;  %v6169_v42 = vperm.slane %v2512_v60, %v4457_v23  ;;  %v2360_v32 = vsel %vm60_vm0, %v2359_v19, %v2322_v61  ;;  %v2425_v56 = vrot.slane %v2374_v14, 4  ;;  %v6175_v31 = vperm.slane %v3484_v9, %v4457_v23  ;;  %v6179_v4 = vpop.permute.xlu1 %2001 }
 0x577   :  { %v2624_v51 = vsel %vm60_vm0, %v2623_v26, %v5948_v48  ;;  %v2636_v40 = vsel %vm60_vm0, %v2635_v12, %v6150_v20  ;;  %v3509_v60 = vrot.slane %v5787_v33, 4  ;;  %v3507_v5 = vrot.slane %v5998_v27, 4 }
 0x578   :  { %3745 = vrot.lane.b32.xlu1 %v7496_v34, %s4407_s19  ;;  %7497 = vst [vmem:[#allocation47_spill] sm:$0xff] %v6175_v31  ;;  %v2469_v15 = vrot.slane %v2430_v1, 4  ;;  %v2465_v45 = vrot.slane %v6077_v49, 4  ;;  %v3545_v61 = vrot.slane %v3494_v50, 4  ;;  %v6187_v14 = vperm.slane %v3496_v36, %v4457_v23 }
 0x579   :  { %v3543_v19 = vrot.slane %v3506_v47, 4  ;;  %v2611_v9 = vrot.slane %v5879_v58, 4  ;;  %v6191_v26 = vperm.slane %v2624_v51, %v4457_v23  ;;  %v3510_v12 = vsel %vm60_vm0, %v5998_v27, %v3509_v60 }
 0x57a   :  { %7498 = vst [vmem:[#allocation63_spill] sm:$0xff] %v6187_v14  ;;  %v2470_v34 = vsel %vm60_vm0, %v2454_v55, %v2469_v15  ;;  %v2468_v10 = vsel %vm60_vm0, %v2467_v41, %v2430_v1  ;;  %v3533_v46 = vrot.slane %v6175_v31, 4  ;;  %v3546_v49 = vsel %vm60_vm0, %v3506_v47, %v3545_v61 }
 0x57b   :  { %v2358_v36 = vsel %vm60_vm0, %v6071_v43, %v2357_v52  ;;  %v6204_v51 = vperm.slane %v2636_v40, %v4471_v30  ;;  %v2547_v27 = vrot.slane %v6169_v42, 4  ;;  %v2426_v55 = vsel %vm60_vm0, %v6087_v39, %v2425_v56 }
 0x57c   :  { %v3508_v1 = vsel %vm60_vm0, %v3507_v5, %v5787_v33  ;;  %v2466_v47 = vsel %vm60_vm0, %v6068_v28, %v2465_v45  ;;  %v3518_v41 = vperm.slane %v3510_v12, %v4457_v23  ;;  %v7499_v43 = vrot.slane %v6046_v21, 4 }
 0x57d   :  { %v3534_v39 = vsel %vm60_vm0, %v6187_v14, %v3533_v46  ;;  %v2601_v33 = vrot.slane %v5691_v54, 4  ;;  %v2659_v56 = vrot.slane %v6191_v26, 4  ;;  %v3544_v28 = vsel %vm60_vm0, %v3543_v19, %v3494_v50 }
 0x57e   :  { %3771 = vrot.lane.b32.xlu2 %v2470_v34, %s4410_s22  ;;  %3763 = vrot.lane.b32.xlu0 %v2468_v10, %s4409_s21  ;;  %v2612_v10 = vsel %vm60_vm0, %v2611_v9, %v5854_v7  ;;  %v2550_v52 = vsel %vm60_vm0, %v6169_v42, %v7499_v43  ;;  %v3554_v40 = vperm.slane %v3546_v49, %v4471_v30  ;;  %v2449_v60 = vrot.slane %v6109_v57, 4 }
 0x57f   :  { %v3514_v5 = vperm.slane %v3508_v1, %v4457_v23  ;;  %v2685_v45 = vrot.slane %v6204_v51, 4  ;;  %v2434_v61 = vperm.slane %v2426_v55, %v4471_v30  ;;  %v6232_v9 = vperm.slane %v2612_v10, %v4457_v23 }
 0x580   :  { %3755 = vrot.lane.b32.xlu1 %v2466_v47, %s4408_s20  ;;  %v3542_v34 = vperm.slane %v3534_v39, %v4471_v30  ;;  %v3569_v50 = vrot.slane %v3518_v41, 4  ;;  %v2450_v19 = vsel %vm60_vm0, %v6074_v29, %v2449_v60  ;;  %v3550_v49 = vperm.slane %v3544_v28, %v4471_v30 }
 0x581   :  { %v2625_v1 = vrot.slane %v5948_v48, 4  ;;  %v2660_v47 = vsel %vm60_vm0, %v2659_v56, %v6232_v9  ;;  %v3593_v10 = vrot.slane %v3554_v40, 4  ;;  %v2548_v54 = vsel %vm60_vm0, %v2547_v27, %v6046_v21 }
 0x582   :  { %v2020_v15 = vpop.permute.xlu1 %2019  ;;  %v3585_v56 = vrot.slane %v3542_v34, 4  ;;  %v2661_v21 = vrot.slane %v6232_v9, 4 }
 0x583   :  { %v3519_v46 = vrot.slane %v2020_v15, 4  ;;  %v3522_v12 = vsel %vm60_vm0, %v2020_v15, %v3521_v8  ;;  %v3557_v8 = vrot.slane %v3514_v5, 4  ;;  %v2626_v48 = vsel %vm60_vm0, %v5991_v35, %v2625_v1 }
 0x584   :  { %v3530_v57 = vperm.slane %v3522_v12, %v4457_v23  ;;  %v2613_v1 = vrot.slane %v5854_v7, 4  ;;  %v2662_v9 = vsel %vm60_vm0, %v6191_v26, %v2661_v21  ;;  %v7515_v21 = vld [vmem:[#allocation65_spill] sm:$0xff] }
 0x585   :  { %v3520_v55 = vsel %vm60_vm0, %v3519_v46, %v7495_v13  ;;  %v2458_v13 = vperm.slane %v2450_v19, %v4471_v30  ;;  %v6257_v46 = vperm.slane %v2660_v47, %v4471_v30  ;;  %v6266_v19 = vperm.slane %v2626_v48, %v4457_v23 }
 0x586   :  { %v3526_v43 = vperm.slane %v3520_v55, %v4457_v23  ;;  %v3567_v39 = vrot.slane %v3530_v57, 4  ;;  %v3570_v15 = vsel %vm60_vm0, %v3530_v57, %v3569_v50  ;;  %3785 = vrot.lane.b32.xlu2 %v6166_v24, %s4412_s24  ;;  %3777 = vrot.lane.b32.xlu0 %v2360_v32, %s4411_s23  ;;  %v2473_v57 = vrot.slane %v2434_v61, 4 }
 0x587   :  { %v3578_v29 = vperm.slane %v3570_v15, %v4471_v30  ;;  %v2471_v55 = vrot.slane %v2458_v13, 4  ;;  %v2686_v7 = vsel %vm60_vm0, %v6257_v46, %v2685_v45 }
 0x588   :  { %v3555_v28 = vrot.slane %v3526_v43, 4  ;;  %v3568_v60 = vsel %vm60_vm0, %v3567_v39, %v3518_v41  ;;  %3769 = vrot.lane.b32.xlu1 %v2358_v36, %s4410_s22  ;;  %v3558_v24 = vsel %vm60_vm0, %v3526_v43, %v3557_v8  ;;  %v3589_v36 = vrot.slane %v3550_v49, 4 }
 0x589   :  { %v3566_v32 = vperm.slane %v3558_v24, %v4471_v30  ;;  %v3574_v12 = vperm.slane %v3568_v60, %v4471_v30  ;;  %v3591_v35 = vrot.slane %v3578_v29, 4  ;;  %v6263_v50 = vsel %vm60_vm0, %v3578_v29, %v3593_v10 }
 0x58a   :  { %7500 = vst [vmem:[#allocation28_spill] sm:$0xff] %v6263_v50  ;;  %v6269_v41 = vsel %vm60_vm0, %v3555_v28, %v3514_v5  ;;  %v2558_v43 = vperm.slane %v2550_v52, %v4471_v30  ;;  %v2614_v5 = vsel %vm60_vm0, %v5879_v58, %v2613_v1  ;;  %v2474_v48 = vsel %vm60_vm0, %v2458_v13, %v2473_v57 }
 0x58b   :  { %7501 = vst [vmem:[#allocation34_spill] sm:$0xff] %v6269_v41  ;;  %v6273_v47 = vsel %vm60_vm0, %v3566_v32, %v3585_v56  ;;  %v3587_v8 = vrot.slane %v3574_v12, 4  ;;  %v3583_v39 = vrot.slane %v3566_v32, 4  ;;  %v6277_v10 = vsel %vm60_vm0, %v3591_v35, %v3554_v40 }
 0x58c   :  { %7502 = vst [vmem:[#allocation23_spill] sm:$0xff] %v6273_v47  ;;  %v6280_v15 = vsel %vm60_vm0, %v3574_v12, %v3589_v36  ;;  %v2671_v52 = vrot.slane %v6266_v19, 4  ;;  %v2534_v40 = vperm.slane %v6050_v37, %v4471_v30  ;;  %v7506_v58 = vrot.slane %v6022_v22, 4 }
 0x58d   :  { %7503 = vst [vmem:[#allocation77_spill] sm:$0xff] %v6277_v10  ;;  %v6288_v29 = vsel %vm60_vm0, %v3587_v8, %v3550_v49  ;;  %v6300_v45 = vsel %vm60_vm0, %v3583_v39, %v3542_v34  ;;  %v2513_v49 = vrot.slane %v7493_v59, 4  ;;  %v2589_v13 = vrot.slane %v5694_v44, 4  ;;  %v6365_v39 = vpop.permute.xlu2 %3689 }
 0x58e   :  { %7504 = vst [vmem:[#allocation25_spill] sm:$0xff] %v6280_v15  ;;  %3795 = vrot.lane.b32.xlu2 %v2686_v7, %s4398_s10  ;;  %3787 = vrot.lane.b32.xlu0 %v2474_v48, %s4412_s24  ;;  %v2524_v56 = vsel %vm60_vm0, %v7506_v58, %v6013_v25  ;;  %v2602_v28 = vsel %vm60_vm0, %v7487_v17, %v2601_v33  ;;  %v7508_v37 = vrot.slane %v7486_v18, 4  ;;  %v2637_v25 = vrot.slane %v6150_v20, 4  ;;  %v7535_v15 = vld [vmem:[#allocation24_spill] sm:$0xff] }
 0x58f   :  { %7505 = vst [vmem:[#allocation54_spill] sm:$0xff] %v6288_v29  ;;  %v2472_v60 = vsel %vm60_vm0, %v2471_v55, %v2434_v61  ;;  %v6315_v34 = vperm.slane %v2614_v5, %v4457_v23  ;;  %v2514_v17 = vsel %vm60_vm0, %v7491_v62, %v2513_v49  ;;  %v2590_v18 = vsel %vm60_vm0, %v5709_v0, %v2589_v13 }
 0x590   :  { %7507 = vst [vmem:[#allocation55_spill] sm:$0xff] %v6300_v45  ;;  %v2502_v22 = vsel %vm60_vm0, %v7484_v6, %v7508_v37  ;;  %3779 = vrot.lane.b32.xlu1 %v2472_v60, %s4411_s23  ;;  %v2575_v44 = vrot.slane %v2558_v43, 4  ;;  %v6327_v6 = vperm.slane %v2524_v56, %v4471_v30  ;;  %v7510_v59 = vrot.slane %v7477_v16, 4  ;;  %v7537_v45 = vld [vmem:[#allocation57_spill] sm:$0xff] }
 0x591   :  { %v6334_v33 = vperm.slane %v2602_v28, %v4457_v23  ;;  %v2672_v62 = vsel %vm60_vm0, %v2671_v52, %v6315_v34  ;;  %v2498_v0 = vperm.slane %v6040_v63, %v4457_v23  ;;  %v2510_v42 = vperm.slane %v2502_v22, %v4457_v23  ;;  %v7512_v52 = vld [vmem:[#allocation40_spill] sm:$0xff] }
 0x592   :  { %7509 = vst [vmem:[#allocation61_spill] sm:$0xff] %v6327_v6  ;;  %v2478_v20 = vsel %vm60_vm0, %v7471_v11, %v7510_v59  ;;  %v2577_v27 = vrot.slane %v2534_v40, 4  ;;  %v6343_v61 = vperm.slane %v2548_v54, %v4471_v30  ;;  %v2522_v16 = vperm.slane %v2514_v17, %v4457_v23  ;;  %v7513_v17 = vld [vmem:[#allocation35_spill] sm:$0xff] }
 0x593   :  { %v2598_v11 = vperm.slane %v2590_v18, %v4457_v23  ;;  %v2638_v24 = vsel %vm60_vm0, %v6137_v2, %v2637_v25  ;;  %v2576_v63 = vsel %vm60_vm0, %v2575_v44, %v2534_v40  ;;  %v2573_v12 = vrot.slane %v6327_v6, 4  ;;  %v7514_v44 = vld [vmem:[#allocation36_spill] sm:$0xff] }
 0x594   :  { %7511 = vst [vmem:[#allocation58_spill] sm:$0xff] %v6343_v61  ;;  %v2578_v32 = vsel %vm60_vm0, %v2558_v43, %v2577_v27  ;;  %v6355_v35 = vperm.slane %v2672_v62, %v4471_v30  ;;  %v2647_v57 = vrot.slane %v6334_v33, 4  ;;  %v2561_v36 = vrot.slane %v2510_v42, 4 }
 0x595   :  { %v2574_v2 = vsel %vm60_vm0, %v6343_v61, %v2573_v12  ;;  %v2646_v26 = vperm.slane %v2638_v24, %v4471_v30  ;;  %v2670_v1 = vperm.slane %v2662_v9, %v4471_v30  ;;  %v2486_v55 = vperm.slane %v2478_v20, %v4457_v23  ;;  %v7516_v24 = vld [vmem:[#allocation80_spill] sm:$0xff] }
 0x596   :  { %3809 = vrot.lane.b32.xlu2 %v2578_v32, %s4399_s11  ;;  %3801 = vrot.lane.b32.xlu0 %v2576_v63, %s4400_s12  ;;  %v2535_v8 = vrot.slane %v2498_v0, 4  ;;  %v2559_v43 = vrot.slane %v2522_v16, 4  ;;  %v2648_v5 = vsel %vm60_vm0, %v2647_v57, %v2598_v11  ;;  %v2562_v7 = vsel %vm60_vm0, %v2522_v16, %v2561_v36  ;;  %v6404_v36 = vpop.permute.xlu2 %3699 }
 0x597   :  { %v2691_v48 = vrot.slane %v6355_v35, 4  ;;  %v2711_v40 = vrot.slane %v7512_v52, 4  ;;  %v2735_v58 = vrot.slane %v5664_v53, 4  ;;  %v6374_v56 = vperm.slane %v2648_v5, %v4471_v30 }
 0x598   :  { %3793 = vrot.lane.b32.xlu1 %v2574_v2, %s4398_s10  ;;  %v2689_v49 = vrot.slane %v2646_v26, 4  ;;  %v2687_v13 = vrot.slane %v2670_v1, 4  ;;  %v2537_v28 = vrot.slane %v2486_v55, 4  ;;  %v6377_v60 = vperm.slane %v2562_v7, %v4471_v30 }
 0x599   :  { %v2536_v37 = vsel %vm60_vm0, %v2535_v8, %v2486_v55  ;;  %v2560_v22 = vsel %vm60_vm0, %v2559_v43, %v2510_v42  ;;  %v2692_v25 = vsel %vm60_vm0, %v2691_v48, %v6374_v56  ;;  %v2699_v18 = vrot.slane %v7513_v17, 4  ;;  %v7518_v8 = vld [vmem:[#allocation69_spill] sm:$0xff] }
 0x59a   :  { %v2690_v54 = vsel %vm60_vm0, %v2670_v1, %v2689_v49  ;;  %v2712_v59 = vsel %vm60_vm0, %v2711_v40, %v7514_v44  ;;  %v2538_v20 = vsel %vm60_vm0, %v2498_v0, %v2537_v28  ;;  %v2736_v62 = vsel %vm60_vm0, %v2735_v58, %v7515_v21  ;;  %v7517_v1 = vld [vmem:[#allocation31_spill] sm:$0xff]  ;;  %v7519_v28 = vld [vmem:[#allocation72_spill] sm:$0xff] }
 0x59b   :  { %v2688_v42 = vsel %vm60_vm0, %v2687_v13, %v2646_v26  ;;  %v2542_v27 = vperm.slane %v2536_v37, %v4471_v30  ;;  %v2566_v16 = vperm.slane %v2560_v22, %v4471_v30  ;;  %v2723_v9 = vrot.slane %v7516_v24, 4 }
 0x59c   :  { %v2649_v32 = vrot.slane %v2598_v11, 4  ;;  %v2673_v63 = vrot.slane %v6315_v34, 4  ;;  %v2583_v12 = vrot.slane %v6377_v60, 4  ;;  %v6400_v0 = vperm.slane %v2736_v62, %v4457_v23 }
 0x59d   :  { %v6407_v2 = vperm.slane %v2538_v20, %v4471_v30  ;;  %v6410_v26 = vperm.slane %v2712_v59, %v4457_v23  ;;  %v2581_v11 = vrot.slane %v2542_v27, 4  ;;  %v2579_v34 = vrot.slane %v2566_v16, 4  ;;  %v7521_v20 = vld [vmem:[#allocation105_spill] sm:$0xff] }
 0x59e   :  { %3819 = vrot.lane.b32.xlu2 %v2692_v25, %s4401_s13  ;;  %3811 = vrot.lane.b32.xlu0 %v2690_v54, %s4399_s11  ;;  %v2674_v57 = vsel %vm60_vm0, %v6266_v19, %v2673_v63  ;;  %v2700_v55 = vsel %vm60_vm0, %v2699_v18, %v7517_v1  ;;  %v2724_v43 = vsel %vm60_vm0, %v2723_v9, %v7518_v8  ;;  %v2823_v7 = vrot.slane %v5793_v38, 4  ;;  %v7520_v18 = vld [vmem:[#allocation70_spill] sm:$0xff] }
 0x59f   :  { %v2584_v5 = vsel %vm60_vm0, %v2583_v12, %v6407_v2  ;;  %v2650_v19 = vsel %vm60_vm0, %v6334_v33, %v2649_v32  ;;  %v2847_v48 = vrot.slane %v6179_v4, 4  ;;  %v2582_v40 = vsel %vm60_vm0, %v2566_v16, %v2581_v11  ;;  %v7523_v63 = vld [vmem:[#allocation102_spill] sm:$0xff] }
 0x5a0   :  { %3803 = vrot.lane.b32.xlu1 %v2688_v42, %s4400_s12  ;;  %v2682_v58 = vperm.slane %v2674_v57, %v4471_v30  ;;  %v2771_v49 = vrot.slane %v6400_v0, 4  ;;  %v2747_v13 = vrot.slane %v6410_v26, 4  ;;  %v2835_v37 = vrot.slane %v7519_v28, 4  ;;  %v7522_v42 = vld [vmem:[#allocation106_spill] sm:$0xff] }
 0x5a1   :  { %v2580_v33 = vsel %vm60_vm0, %v2579_v34, %v2542_v27  ;;  %v2658_v22 = vperm.slane %v2650_v19, %v4471_v30  ;;  %v6432_v25 = vperm.slane %v2700_v55, %v4457_v23  ;;  %v6435_v54 = vperm.slane %v2724_v43, %v4457_v23  ;;  %v6455_v19 = vpop.permute.xlu2 %3713 }
 0x5a2   :  { %v2824_v59 = vsel %vm60_vm0, %v2823_v7, %v7520_v18  ;;  %v2836_v62 = vsel %vm60_vm0, %v2835_v37, %v7521_v20  ;;  %v2848_v16 = vsel %vm60_vm0, %v2847_v48, %v7522_v42  ;;  %v2695_v27 = vrot.slane %v2682_v58, 4 }
 0x5a3   :  { %v2737_v9 = vrot.slane %v7515_v21, 4  ;;  %v2772_v32 = vsel %vm60_vm0, %v2771_v49, %v6435_v54  ;;  %v2811_v12 = vrot.slane %v7523_v63, 4  ;;  %v2697_v57 = vrot.slane %v2658_v22, 4 }
 0x5a4   :  { %v2748_v11 = vsel %vm60_vm0, %v2747_v13, %v6432_v25  ;;  %v2830_v55 = vperm.slane %v2824_v59, %v4457_v23  ;;  %v2842_v43 = vperm.slane %v2836_v62, %v4457_v23  ;;  %v2696_v7 = vsel %vm60_vm0, %v2695_v27, %v2658_v22  ;;  %v6474_v27 = vpop.permute.xlu0 %3681 }
 0x5a5   :  { %v2738_v34 = vsel %vm60_vm0, %v5664_v53, %v2737_v9  ;;  %v2698_v21 = vsel %vm60_vm0, %v2682_v58, %v2697_v57  ;;  %v2693_v48 = vrot.slane %v6374_v56, 4  ;;  %v7524_v53 = vld [vmem:[#allocation95_spill] sm:$0xff]  ;;  %v2754_v37 = vperm.slane %v2748_v11, %v4471_v30 }
 0x5a6   :  { %3833 = vrot.lane.b32.xlu2 %v2584_v5, %s4403_s15  ;;  %3825 = vrot.lane.b32.xlu0 %v2582_v40, %s4402_s14  ;;  %v2854_v5 = vperm.slane %v2848_v16, %v4457_v23  ;;  %v2778_v40 = vperm.slane %v2772_v32, %v4471_v30  ;;  %v2812_v49 = vsel %vm60_vm0, %v2811_v12, %v7524_v53  ;;  %v2885_v22 = vrot.slane %v2842_v43, 4 }
 0x5a7   :  { %v2694_v13 = vsel %vm60_vm0, %v6355_v35, %v2693_v48  ;;  %v6469_v58 = vperm.slane %v2738_v34, %v4457_v23  ;;  %v2713_v59 = vrot.slane %v7514_v44, 4  ;;  %v2725_v62 = vrot.slane %v7518_v8, 4  ;;  %v6477_v35 = vpop.permute.xlu1 %3673 }
 0x5a8   :  { %3817 = vrot.lane.b32.xlu1 %v2580_v33, %s4401_s13  ;;  %v2859_v33 = vrot.slane %v2830_v55, 4  ;;  %v2883_v56 = vrot.slane %v2854_v5, 4  ;;  %v2795_v16 = vrot.slane %v2778_v40, 4  ;;  %v2818_v9 = vperm.slane %v2812_v49, %v4457_v23 }
 0x5a9   :  { %v2886_v32 = vsel %vm60_vm0, %v2854_v5, %v2885_v22  ;;  %v2714_v12 = vsel %vm60_vm0, %v7512_v52, %v2713_v59  ;;  %v2726_v57 = vsel %vm60_vm0, %v7516_v24, %v2725_v62  ;;  %v2797_v11 = vrot.slane %v2754_v37, 4 }
 0x5aa   :  { %v2783_v44 = vrot.slane %v6469_v58, 4  ;;  %v2585_v8 = vrot.slane %v6407_v2, 4  ;;  %v2860_v34 = vsel %vm60_vm0, %v2859_v33, %v2818_v9  ;;  %v2796_v5 = vsel %vm60_vm0, %v2795_v16, %v2754_v37  ;;  %v6501_v33 = vpop.permute.xlu2 %3723 }
 0x5ab   :  { %v2798_v48 = vsel %vm60_vm0, %v2778_v40, %v2797_v11  ;;  %v6492_v52 = vperm.slane %v2886_v32, %v4471_v30  ;;  %v6495_v24 = vperm.slane %v2714_v12, %v4457_v23  ;;  %v2825_v49 = vrot.slane %v7520_v18, 4 }
 0x5ac   :  { %v6499_v2 = vperm.slane %v2726_v57, %v4457_v23  ;;  %v2866_v40 = vperm.slane %v2860_v34, %v4471_v30  ;;  %v2701_v37 = vrot.slane %v7517_v1, 4  ;;  %v2837_v59 = vrot.slane %v7521_v20, 4 }
 0x5ad   :  { %v2749_v16 = vrot.slane %v6432_v25, 4  ;;  %v2773_v1 = vrot.slane %v6435_v54, 4 }
 0x5ae   :  { %3843 = vrot.lane.b32.xlu2 %v2698_v21, %s4404_s16  ;;  %3835 = vrot.lane.b32.xlu0 %v2696_v7, %s4403_s15  ;;  %v2884_v21 = vsel %vm60_vm0, %v2883_v56, %v2842_v43  ;;  %v2849_v7 = vrot.slane %v7522_v42, 4  ;;  %v2586_v43 = vsel %vm60_vm0, %v6377_v60, %v2585_v8  ;;  %v2826_v56 = vsel %vm60_vm0, %v5793_v38, %v2825_v49 }
 0x5af   :  { %v2890_v18 = vperm.slane %v2884_v21, %v4471_v30  ;;  %v2784_v60 = vsel %vm60_vm0, %v2783_v44, %v6499_v2  ;;  %v2702_v62 = vsel %vm60_vm0, %v7513_v17, %v2701_v37  ;;  %v2759_v38 = vrot.slane %v6495_v24, 4  ;;  %v6536_v17 = vpop.permute.xlu1 %3683 }
 0x5b0   :  { %3827 = vrot.lane.b32.xlu1 %v2694_v13, %s4402_s14  ;;  %v2861_v13 = vrot.slane %v2818_v9, 4  ;;  %v2850_v42 = vsel %vm60_vm0, %v6179_v4, %v2849_v7  ;;  %v2911_v4 = vrot.slane %v6492_v52, 4  ;;  %v2909_v32 = vrot.slane %v2866_v40, 4 }
 0x5b1   :  { %v6525_v9 = vperm.slane %v2850_v42, %v4457_v23  ;;  %v2907_v12 = vrot.slane %v2890_v18, 4  ;;  %v6534_v57 = vperm.slane %v2826_v56, %v4457_v23  ;;  %v6539_v25 = vperm.slane %v2784_v60, %v4471_v30 }
 0x5b2   :  { %v2862_v22 = vsel %vm60_vm0, %v2830_v55, %v2861_v13  ;;  %v6527_v55 = vpop.permute.xlu0 %3691  ;;  %v2750_v54 = vsel %vm60_vm0, %v6410_v26, %v2749_v16  ;;  %v2774_v11 = vsel %vm60_vm0, %v6400_v0, %v2773_v1  ;;  %v2813_v44 = vrot.slane %v7524_v53, 4  ;;  %v6564_v13 = vpop.permute.xlu2 %3737 }
 0x5b3   :  { %v6531_v20 = vperm.slane %v2862_v22, %v4471_v30  ;;  %v2838_v8 = vsel %vm60_vm0, %v7519_v28, %v2837_v59  ;;  %v2910_v21 = vsel %vm60_vm0, %v2890_v18, %v2909_v32  ;;  %v2710_v7 = vperm.slane %v2702_v62, %v4457_v23 }
 0x5b4   :  { %v2814_v0 = vsel %vm60_vm0, %v7523_v63, %v2813_v44  ;;  %v2908_v26 = vsel %vm60_vm0, %v2907_v12, %v2866_v40  ;;  %v2758_v28 = vperm.slane %v2750_v54, %v4471_v30  ;;  %v2782_v53 = vperm.slane %v2774_v11, %v4471_v30  ;;  %v7526_v12 = vld [vmem:[#allocation41_spill] sm:$0xff] }
 0x5b5   :  { %v2912_v34 = vsel %vm60_vm0, %v2911_v4, %v6531_v20  ;;  %v6562_v49 = vperm.slane %v2838_v8, %v4457_v23  ;;  %v2760_v42 = vsel %vm60_vm0, %v2759_v38, %v2710_v7  ;;  %v6570_v63 = vperm.slane %v2814_v0, %v4457_v23  ;;  %v7525_v4 = vld [vmem:[#allocation104_spill] sm:$0xff] }
 0x5b6   :  { %3857 = vrot.lane.b32.xlu2 %v2798_v48, %s4406_s18  ;;  %3849 = vrot.lane.b32.xlu0 %v2796_v5, %s4405_s17  ;;  %v2895_v48 = vrot.slane %v6525_v9, 4  ;;  %v2871_v5 = vrot.slane %v6534_v57, 4  ;;  %v6575_v18 = vperm.slane %v2760_v42, %v4471_v30  ;;  %v2801_v37 = vrot.slane %v2758_v28, 4  ;;  %v7527_v8 = vld [vmem:[#allocation48_spill] sm:$0xff] }
 0x5b7   :  { %v2799_v22 = vrot.slane %v2782_v53, 4  ;;  %v3047_v60 = vrot.slane %v7525_v4, 4  ;;  %v6586_v38 = vpop.permute.xlu1 %3697  ;;  %v2785_v32 = vrot.slane %v6499_v2, 4  ;;  %v3071_v54 = vrot.slane %v7526_v12, 4 }
 0x5b8   :  { %3841 = vrot.lane.b32.xlu1 %v2586_v43, %s4404_s16  ;;  %v2803_v43 = vrot.slane %v6539_v25, 4  ;;  %v2896_v40 = vsel %vm60_vm0, %v2895_v48, %v6562_v49  ;;  %v2872_v59 = vsel %vm60_vm0, %v2871_v5, %v6570_v63  ;;  %v2802_v16 = vsel %vm60_vm0, %v2782_v53, %v2801_v37  ;;  %v7530_v53 = vld [vmem:[#allocation101_spill] sm:$0xff]  ;;  %v7532_v37 = vld [vmem:[#allocation100_spill] sm:$0xff] }
 0x5b9   :  { %v2902_v1 = vperm.slane %v2896_v40, %v4471_v30  ;;  %v2800_v11 = vsel %vm60_vm0, %v2799_v22, %v2758_v28  ;;  %v2878_v44 = vperm.slane %v2872_v59, %v4471_v30  ;;  %v3048_v5 = vsel %vm60_vm0, %v3047_v60, %v7530_v53  ;;  %v7533_v59 = vld [vmem:[#allocation83_spill] sm:$0xff] }
 0x5ba   :  { %v6577_v56 = vpop.permute.xlu0 %3705  ;;  %v2804_v62 = vsel %vm60_vm0, %v2803_v43, %v6575_v18  ;;  %v2786_v2 = vsel %vm60_vm0, %v6469_v58, %v2785_v32  ;;  %v7531_v43 = vld [vmem:[#allocation71_spill] sm:$0xff]  ;;  %v3035_v22 = vrot.slane %v7532_v37, 4  ;;  %v6614_v50 = vperm.slane %v3048_v5, %v4457_v23  ;;  %v7536_v32 = vld [vmem:[#allocation110_spill] sm:$0xff] }
 0x5bb   :  { %v2915_v42 = vrot.slane %v2902_v1, 4  ;;  %v2947_v28 = vrot.slane %v7531_v43, 4  ;;  %v2794_v58 = vperm.slane %v2786_v2, %v4471_v30  ;;  %v3059_v10 = vrot.slane %v7536_v32, 4  ;;  %v7538_v2 = vld [vmem:[#allocation97_spill] sm:$0xff] }
 0x5bc   :  { %v2897_v47 = vrot.slane %v6562_v49, 4 }
 0x5bd   :  { %v2948_v29 = vsel %vm60_vm0, %v2947_v28, %v7537_v45 }
 0x5be   :  { %3867 = vrot.lane.b32.xlu2 %v2912_v34, %s4407_s19  ;;  %3859 = vrot.lane.b32.xlu0 %v2910_v21, %s4406_s18  ;;  %v2935_v34 = vrot.slane %v7527_v8, 4  ;;  %v7528_v21 = vld [vmem:[#allocation46_spill] sm:$0xff] }
 0x5bf   :  { %v2923_v48 = vrot.slane %v7528_v21, 4 }
 0x5c0   :  { %3851 = vrot.lane.b32.xlu1 %v2908_v26, %s4405_s17  ;;  %v2761_v26 = vrot.slane %v2710_v7, 4 }
 0x5c1   :  { %v2924_v60 = vsel %vm60_vm0, %v2923_v48, %v7535_v15 }
 0x5c2   :  { %v2762_v40 = vsel %vm60_vm0, %v6495_v24, %v2761_v26  ;;  %v2916_v26 = vsel %vm60_vm0, %v2915_v42, %v2878_v44  ;;  %v6626_v48 = vpop.permute.xlu0 %3715  ;;  %v2930_v5 = vperm.slane %v2924_v60, %v4457_v23  ;;  %v7540_v60 = vld [vmem:[#allocation49_spill] sm:$0xff] }
 0x5c4   :  { %v2973_v61 = vrot.slane %v2930_v5, 4 }
 0x5c6   :  { %3881 = vrot.lane.b32.xlu2 %v2804_v62, %s4409_s21  ;;  %3873 = vrot.lane.b32.xlu0 %v2802_v16, %s4408_s20  ;;  %v3072_v62 = vsel %vm60_vm0, %v3071_v54, %v7533_v59  ;;  %v2917_v16 = vrot.slane %v2878_v44, 4  ;;  %v2913_v54 = vrot.slane %v6531_v20, 4  ;;  %v2770_v44 = vperm.slane %v2762_v40, %v4471_v30 }
 0x5c8   :  { %v6596_v0 = vpop.permute.xlu2 %3747  ;;  %3865 = vrot.lane.b32.xlu1 %v2800_v11, %s4407_s19  ;;  %v7534_v11 = vld [vmem:[#allocation30_spill] sm:$0xff]  ;;  %v2918_v24 = vsel %vm60_vm0, %v2902_v1, %v2917_v16  ;;  %v3036_v1 = vsel %vm60_vm0, %v3035_v22, %v7538_v2  ;;  %v2914_v20 = vsel %vm60_vm0, %v6492_v52, %v2913_v54  ;;  %v6639_v16 = vpop.permute.xlu1 %3707  ;;  %v6646_v22 = vperm.slane %v2948_v29, %v4457_v23  ;;  %v7541_v52 = vld [vmem:[#allocation52_spill] sm:$0xff] }
 0x5c9   :  { %7529 = vst [vmem:[#allocation27_spill] sm:$0xff] %v6596_v0  ;;  %v2936_v7 = vsel %vm60_vm0, %v2935_v34, %v7534_v11  ;;  %v6624_v34 = vperm.slane %v3072_v62, %v4457_v23  ;;  %v2937_v42 = vrot.slane %v7534_v11, 4  ;;  %v3083_v62 = vrot.slane %v6614_v50, 4 }
 0x5ca   :  { %v2942_v28 = vperm.slane %v2936_v7, %v4457_v23  ;;  %v3060_v40 = vsel %vm60_vm0, %v3059_v10, %v7541_v52  ;;  %v2807_v54 = vrot.slane %v2794_v58, 4  ;;  %v6651_v11 = vperm.slane %v3036_v1, %v4457_v23 }
 0x5cb   :  { %v2873_v7 = vrot.slane %v6570_v63, 4  ;;  %v3107_v6 = vrot.slane %v6624_v34, 4  ;;  %v2809_v31 = vrot.slane %v2770_v44, 4  ;;  %v2805_v29 = vrot.slane %v6575_v18, 4 }
 0x5cc   :  { %v6662_v14 = vperm.slane %v3060_v40, %v4457_v23  ;;  %v2898_v63 = vsel %vm60_vm0, %v6525_v9, %v2897_v47  ;;  %v3084_v49 = vsel %vm60_vm0, %v3083_v62, %v6651_v11  ;;  %v2997_v1 = vrot.slane %v6646_v22, 4  ;;  %v6689_v40 = vpop.permute.xlu0 %3729 }
 0x5cd   :  { %v2874_v10 = vsel %vm60_vm0, %v6534_v57, %v2873_v7  ;;  %v3073_v0 = vrot.slane %v7533_v59, 4  ;;  %v2808_v18 = vsel %vm60_vm0, %v2807_v54, %v2770_v44  ;;  %v2806_v47 = vsel %vm60_vm0, %v6539_v25, %v2805_v29 }
 0x5ce   :  { %3891 = vrot.lane.b32.xlu2 %v2918_v24, %s4410_s22  ;;  %3883 = vrot.lane.b32.xlu0 %v2916_v26, %s4409_s21  ;;  %v2959_v26 = vrot.slane %v7540_v60, 4  ;;  %v3108_v9 = vsel %vm60_vm0, %v3107_v6, %v6662_v14  ;;  %v2925_v44 = vrot.slane %v7535_v15, 4  ;;  %v2938_v62 = vsel %vm60_vm0, %v7527_v8, %v2937_v42 }
 0x5cf   :  { %v3074_v59 = vsel %vm60_vm0, %v7526_v12, %v3073_v0  ;;  %v6695_v6 = vperm.slane %v3108_v9, %v4471_v30  ;;  %v2974_v12 = vsel %vm60_vm0, %v2942_v28, %v2973_v61  ;;  %v3061_v8 = vrot.slane %v7541_v52, 4 }
 0x5d0   :  { %v6641_v24 = vpop.permute.xlu2 %3761  ;;  %3875 = vrot.lane.b32.xlu1 %v2914_v20, %s4408_s20  ;;  %v7542_v20 = vld [vmem:[#allocation56_spill] sm:$0xff]  ;;  %v2926_v15 = vsel %vm60_vm0, %v7528_v21, %v2925_v44  ;;  %v2949_v42 = vrot.slane %v7537_v45, 4  ;;  %v6705_v7 = vperm.slane %v3074_v59, %v4457_v23  ;;  %v6707_v29 = vpop.permute.xlu1 %3721  ;;  %v2982_v21 = vperm.slane %v2974_v12, %v4471_v30 }
 0x5d1   :  { %7539 = vst [vmem:[#allocation45_spill] sm:$0xff] %v6641_v24  ;;  %v2960_v41 = vsel %vm60_vm0, %v2959_v26, %v7542_v20  ;;  %v2810_v26 = vsel %vm60_vm0, %v2794_v58, %v2809_v31  ;;  %v2971_v24 = vrot.slane %v2942_v28, 4  ;;  %v6682_v31 = vperm.slane %v3084_v49, %v4471_v30 }
 0x5d2   :  { %v2966_v57 = vperm.slane %v2960_v41, %v4457_v23  ;;  %v2882_v58 = vperm.slane %v2874_v10, %v4471_v30  ;;  %v2906_v41 = vperm.slane %v2898_v63, %v4471_v30  ;;  %v3049_v10 = vrot.slane %v7530_v53, 4 }
 0x5d3   :  { %v2972_v54 = vsel %vm60_vm0, %v2971_v24, %v2930_v5  ;;  %v3133_v61 = vrot.slane %v6682_v31, 4  ;;  %v2950_v5 = vsel %vm60_vm0, %v7531_v43, %v2949_v42  ;;  %v3062_v53 = vsel %vm60_vm0, %v7536_v32, %v3061_v8  ;;  %v7543_v32 = vld [vmem:[#allocation84_spill] sm:$0xff] }
 0x5d4   :  { %v2998_v0 = vsel %vm60_vm0, %v2966_v57, %v2997_v1  ;;  %v2921_v28 = vrot.slane %v2882_v58, 4  ;;  %v2919_v63 = vrot.slane %v2906_v41, 4  ;;  %v6716_v45 = vperm.slane %v2972_v54, %v4471_v30 }
 0x5d5   :  { %v3006_v24 = vperm.slane %v2998_v0, %v4471_v30  ;;  %v3050_v52 = vsel %vm60_vm0, %v7525_v4, %v3049_v10  ;;  %v3134_v49 = vsel %vm60_vm0, %v6695_v6, %v3133_v61  ;;  %v6726_v43 = vperm.slane %v2938_v62, %v4457_v23 }
 0x5d6   :  { %3905 = vrot.lane.b32.xlu2 %v2810_v26, %s4412_s24  ;;  %3897 = vrot.lane.b32.xlu0 %v2808_v18, %s4411_s23  ;;  %v2922_v1 = vsel %vm60_vm0, %v2906_v41, %v2921_v28  ;;  %v2995_v26 = vrot.slane %v2966_v57, 4  ;;  %v3119_v18 = vrot.slane %v6705_v7, 4  ;;  %v2961_v4 = vrot.slane %v7542_v20, 4 }
 0x5d7   :  { %v4095_v9 = vsel %vm340_vm1, %v7543_v32, %v6477_v35  ;;  %v2920_v59 = vsel %vm60_vm0, %v2919_v63, %v2882_v58  ;;  %v6738_v41 = vperm.slane %v2926_v15, %v4457_v23  ;;  %v6741_v57 = vperm.slane %v3050_v52, %v4457_v23 }
 0x5d8   :  { %v6691_v25 = vpop.permute.xlu2 %3771  ;;  %3889 = vrot.lane.b32.xlu1 %v2806_v47, %s4410_s22  ;;  %v2958_v47 = vperm.slane %v2950_v5, %v4457_v23  ;;  %v6744_v44 = vperm.slane %v3062_v53, %v4457_v23  ;;  %v2996_v35 = vsel %vm60_vm0, %v2995_v26, %v6646_v22  ;;  %v3037_v58 = vrot.slane %v7538_v2, 4 }
 0x5d9   :  { %v3025_v12 = vrot.slane %v2982_v21, 4  ;;  %v3023_v0 = vrot.slane %v3006_v24, 4  ;;  %v3021_v54 = vrot.slane %v6716_v45, 4  ;;  %v3085_v15 = vrot.slane %v6651_v11, 4 }
 0x5da   :  { %v3109_v8 = vrot.slane %v6662_v14, 4  ;;  %v3120_v42 = vsel %vm60_vm0, %v3119_v18, %v6744_v44  ;;  %v4097_v10 = vsel %vm343_vm2, %v4095_v9, %v6474_v27  ;;  %v2962_v22 = vsel %vm60_vm0, %v7540_v60, %v2961_v4 }
 0x5db   :  { %v3009_v2 = vrot.slane %v2958_v47, 4  ;;  %v3038_v28 = vsel %vm60_vm0, %v7532_v37, %v3037_v58  ;;  %v6768_v63 = vperm.slane %v2996_v35, %v4471_v30  ;;  %v3095_v14 = vrot.slane %v6741_v57, 4 }
 0x5dc   :  { %v2683_v11 = vrot.slane %v6257_v46, 4  ;;  %v3086_v5 = vsel %vm60_vm0, %v6614_v50, %v3085_v15  ;;  %v3110_v27 = vsel %vm60_vm0, %v6624_v34, %v3109_v8  ;;  %v4099_v60 = vsel %vm346_vm3, %v4097_v10, %v6365_v39 }
 0x5dd   :  { %v3026_v52 = vsel %vm60_vm0, %v3006_v24, %v3025_v12  ;;  %v3024_v37 = vsel %vm60_vm0, %v3023_v0, %v2982_v21  ;;  %v6781_v53 = vperm.slane %v3120_v42, %v4471_v30  ;;  %v6785_v46 = vperm.slane %v3038_v28, %v4457_v23  ;;  %v7545_v28 = vld [vmem:[#allocation21_spill] sm:$0xff] }
 0x5de   :  { %3915 = vrot.lane.b32.xlu2 %v3134_v49, %s4398_s10  ;;  %3907 = vrot.lane.b32.xlu0 %v2922_v1, %s4412_s24  ;;  %v2970_v49 = vperm.slane %v2962_v22, %v4457_v23  ;;  %v4101_v50 = vsel %vm349_vm4, %v4099_v60, %v6586_v38  ;;  %v4098_v39 = vsel %vm343_vm2, %v6123_v3, %v6536_v17  ;;  %v2983_v1 = vrot.slane %v6726_v43, 4 }
 0x5df   :  { %v3022_v34 = vsel %vm60_vm0, %v6768_v63, %v3021_v54  ;;  %v3094_v21 = vperm.slane %v3086_v5, %v4471_v30  ;;  %v3118_v24 = vperm.slane %v3110_v27, %v4471_v30  ;;  %v2684_v38 = vsel %vm60_vm0, %v2683_v11, %v6204_v51 }
 0x5e0   :  { %v6746_v62 = vpop.permute.xlu2 %3785  ;;  %v6748_v20 = vpop.permute.xlu0 %3739  ;;  %3899 = vrot.lane.b32.xlu1 %v2920_v59, %s4411_s23  ;;  %v3096_v3 = vsel %vm60_vm0, %v3095_v14, %v6785_v46  ;;  %v4103_v17 = vsel %vm352_vm5, %v4101_v50, %v6577_v56  ;;  %v3139_v32 = vrot.slane %v6781_v53, 4  ;;  %v3010_v9 = vsel %vm60_vm0, %v2970_v49, %v3009_v2  ;;  %v7547_v50 = vld [vmem:[#allocation13_spill] sm:$0xff] }
 0x5e1   :  { %v3007_v51 = vrot.slane %v2970_v49, 4  ;;  %v4100_v59 = vsel %vm346_vm3, %v4098_v39, %v6527_v55  ;;  %v2984_v58 = vsel %vm60_vm0, %v2983_v1, %v6738_v41  ;;  %v6818_v12 = vperm.slane %v3096_v3, %v4471_v30 }
 0x5e2   :  { %v6761_v61 = vpop.permute.xlu1 %3731  ;;  %v3137_v56 = vrot.slane %v3094_v21, 4  ;;  %v3135_v0 = vrot.slane %v3118_v24, 4  ;;  %v2985_v54 = vrot.slane %v6738_v41, 4  ;;  %v4105_v15 = vsel %vm355_vm6, %v4103_v17, %v6455_v19 }
 0x5e3   :  { %v6824_v8 = vperm.slane %v3010_v9, %v4471_v30  ;;  %v3008_v42 = vsel %vm60_vm0, %v3007_v51, %v2958_v47  ;;  %v4102_v55 = vsel %vm349_vm4, %v4100_v59, %v6404_v36  ;;  %v4107_v10 = vsel %vm358_vm7, %v4105_v15, %v6707_v29  ;;  %v7544_v29 = vld [vmem:[#allocation5_spill] sm:$0xff]  ;;  %v7549_v9 = vld [vmem:[#allocation22_spill] sm:$0xff] }
 0x5e4   :  { %v3140_v22 = vsel %vm60_vm0, %v3139_v32, %v6818_v12  ;;  %v3138_v2 = vsel %vm60_vm0, %v3118_v24, %v3137_v56  ;;  %v4104_v41 = vsel %vm352_vm5, %v4102_v55, %v6639_v16  ;;  %v3136_v19 = vsel %vm60_vm0, %v3135_v0, %v3094_v21  ;;  %v7548_v32 = vld [vmem:[#allocation10_spill] sm:$0xff] }
 0x5e5   :  { %v2990_v36 = vperm.slane %v2984_v58, %v4471_v30  ;;  %v3014_v47 = vperm.slane %v3008_v42, %v4471_v30  ;;  %v6844_v14 = vsel %vm411_vm9, %v7545_v28, %v7544_v29  ;;  %v3121_v11 = vrot.slane %v6744_v44, 4  ;;  %v7552_v0 = vld [vmem:[#allocation18_spill] sm:$0xff]  ;;  %v7556_v29 = vld [vmem:[#allocation11_spill] sm:$0xff] }
 0x5e6   :  { %3929 = vrot.lane.b32.xlu2 %v3026_v52, %s4399_s11  ;;  %3921 = vrot.lane.b32.xlu0 %v3024_v37, %s4400_s12  ;;  %v4109_v16 = vsel %vm411_vm9, %v4107_v10, %v6689_v40  ;;  %v2986_v60 = vsel %vm60_vm0, %v6726_v43, %v2985_v54  ;;  %v7546_v52 = vld [vmem:[#allocation9_spill] sm:$0xff]  ;;  %v4106_v49 = vsel %vm355_vm6, %v4104_v41, %v6626_v48  ;;  %v3031_v44 = vrot.slane %v6824_v8, 4  ;;  %v7553_v10 = vld [vmem:[#allocation6_spill] sm:$0xff]  ;;  %v7557_v28 = vld [vmem:[#allocation27_spill] sm:$0xff] }
 0x5e7   :  { %v415_v37 = vsel %vm414_vm8, %v6844_v14, %v7546_v52  ;;  %v3097_v39 = vrot.slane %v6785_v46, 4  ;;  %v4111_v21 = vsel %vm414_vm8, %v4109_v16, %v6564_v13  ;;  %v6868_v24 = vperm.slane %v2986_v60, %v4471_v30  ;;  %v7558_v52 = vld [vmem:[#allocation16_spill] sm:$0xff] }
 0x5e8   :  { %v3796_v26 = vpop.permute.xlu2 %3795  ;;  %v6801_v18 = vpop.permute.xlu0 %3753  ;;  %3913 = vrot.lane.b32.xlu1 %v3022_v34, %s4398_s10  ;;  %v418_v40 = vsel %vm417_vm10, %v415_v37, %v7547_v50  ;;  %v3122_v34 = vsel %vm60_vm0, %v6705_v7, %v3121_v11  ;;  %v3029_v1 = vrot.slane %v2990_v36, 4  ;;  %v3027_v48 = vrot.slane %v3014_v47, 4 }
 0x5e9   :  { %v6809_v4 = vsel %vm340_vm1, %v2684_v38, %v3796_v26  ;;  %v3098_v38 = vsel %vm60_vm0, %v6741_v57, %v3097_v39  ;;  %v4108_v26 = vsel %vm358_vm7, %v4106_v49, %v6501_v33  ;;  %v3032_v13 = vsel %vm60_vm0, %v3031_v44, %v6868_v24  ;;  %v7550_v57 = vld [vmem:[#allocation7_spill] sm:$0xff] }
 0x5ea   :  { %v3746_v35 = vpop.permute.xlu1 %3745  ;;  %v4110_v7 = vsel %vm411_vm9, %v4108_v26, %v6761_v61  ;;  %v3030_v3 = vsel %vm60_vm0, %v3014_v47, %v3029_v1  ;;  %v3130_v17 = vperm.slane %v3122_v34, %v4471_v30  ;;  %v6884_v51 = vsel %vm411_vm9, %v7549_v9, %v7548_v32  ;;  %v7551_v61 = vld [vmem:[#allocation14_spill] sm:$0xff]  ;;  %v7559_v49 = vld [vmem:[#allocation19_spill] sm:$0xff] }
 0x5eb   :  { %v4113_v46 = vsel %vm417_vm10, %v4111_v21, %v3746_v35  ;;  %v421_v33 = vsel %vm420_vm11, %v418_v40, %v7550_v57  ;;  %v3028_v58 = vsel %vm60_vm0, %v3027_v48, %v2990_v36  ;;  %v3106_v56 = vperm.slane %v3098_v38, %v4471_v30  ;;  %v7560_v38 = vld [vmem:[#allocation8_spill] sm:$0xff]  ;;  %v7563_v57 = vld [vmem:[#allocation15_spill] sm:$0xff] }
 0x5ec   :  { %v424_v59 = vsel %vm423_vm12, %v421_v33, %v7551_v61  ;;  %v4115_v35 = vsel %vm420_vm11, %v4113_v46, %v6801_v18  ;;  %v4112_v15 = vsel %vm414_vm8, %v4110_v7, %v6748_v20  ;;  %v416_v18 = vsel %vm414_vm8, %v6884_v51, %v7553_v10  ;;  %v7561_v46 = vld [vmem:[#allocation17_spill] sm:$0xff] }
 0x5ed   :  { %v427_v54 = vsel %vm426_vm13, %v424_v59, %v7552_v0  ;;  %v4114_v11 = vsel %vm417_vm10, %v4112_v15, %v7557_v28  ;;  %v3145_v60 = vrot.slane %v3106_v56, 4  ;;  %v3141_v1 = vrot.slane %v6818_v12, 4  ;;  %v7566_v15 = vld [vmem:[#allocation109_spill] sm:$0xff]  ;;  %v7573_v28 = vld [vmem:[#allocation82_spill] sm:$0xff] }
 0x5ee   :  { %3939 = vrot.lane.b32.xlu2 %v3140_v22, %s4401_s13  ;;  %3931 = vrot.lane.b32.xlu0 %v3138_v2, %s4399_s11  ;;  %v3143_v22 = vrot.slane %v3130_v17, 4  ;;  %v7554_v2 = vld [vmem:[#allocation12_spill] sm:$0xff]  ;;  %v430_v20 = vsel %vm429_vm14, %v427_v54, %v7556_v29  ;;  %v3033_v59 = vrot.slane %v6868_v24, 4  ;;  %v7567_v24 = vld [vmem:[#allocation78_spill] sm:$0xff]  ;;  %v7572_v29 = vld [vmem:[#allocation73_spill] sm:$0xff] }
 0x5ef   :  { %v419_v41 = vsel %vm417_vm10, %v416_v18, %v7554_v2  ;;  %v6919_v44 = vsel %vm432_vm15, %v430_v20, %v7559_v49  ;;  %v3146_v34 = vsel %vm60_vm0, %v3130_v17, %v3145_v60  ;;  %v7568_v18 = vld [vmem:[#allocation74_spill] sm:$0xff]  ;;  %v7570_v2 = vld [vmem:[#allocation87_spill] sm:$0xff]  ;;  %v3395_v20 = vrot.slane %v7572_v29, 4 }
 0x5f0   :  { %v6849_v5 = vpop.permute.xlu2 %3809  ;;  %v3764_v27 = vpop.permute.xlu0 %3763  ;;  %3923 = vrot.lane.b32.xlu1 %v3136_v19, %s4400_s12  ;;  %v7555_v19 = vld [vmem:[#allocation45_spill] sm:$0xff]  ;;  %v422_v37 = vsel %vm420_vm11, %v419_v41, %v7558_v52  ;;  %v3144_v21 = vsel %vm60_vm0, %v3143_v22, %v3106_v56  ;;  %v7569_v22 = vld [vmem:[#allocation91_spill] sm:$0xff]  ;;  %v7576_v52 = vld [vmem:[#allocation64_spill] sm:$0xff] }
 0x5f1   :  { %v4117_v36 = vsel %vm423_vm12, %v4115_v35, %v7555_v19  ;;  %v7564_v35 = vld [vmem:[#allocation90_spill] sm:$0xff] }
 0x5f2   :  { %v3756_v43 = vpop.permute.xlu1 %3755  ;;  %v7577_v49 = vld [vmem:[#allocation94_spill] sm:$0xff] }
 0x5f3   :  { %v4116_v50 = vsel %vm420_vm11, %v4114_v11, %v3756_v43  ;;  %v425_v43 = vsel %vm423_vm12, %v422_v37, %v7560_v38  ;;  %v7574_v11 = vld [vmem:[#allocation76_spill] sm:$0xff]  ;;  %v3383_v37 = vrot.slane %v7576_v52, 4 }
 0x5f4   :  { %v4118_v26 = vsel %vm423_vm12, %v4116_v50, %v3764_v27  ;;  %v428_v7 = vsel %vm426_vm13, %v425_v43, %v7561_v46  ;;  %v3407_v50 = vrot.slane %v7577_v49, 4  ;;  %v7582_v46 = vld [vmem:[#allocation32_spill] sm:$0xff] }
 0x5f5   :  { %v4120_v32 = vsel %vm426_vm13, %v4118_v26, %v6691_v25  ;;  %v3034_v25 = vsel %vm60_vm0, %v6824_v8, %v3033_v59  ;;  %v7581_v26 = vld [vmem:[#allocation33_spill] sm:$0xff]  ;;  %v7586_v59 = vld [vmem:[#allocation88_spill] sm:$0xff] }
 0x5f6   :  { %3953 = vrot.lane.b32.xlu2 %v3032_v13, %s4403_s15  ;;  %3945 = vrot.lane.b32.xlu0 %v3030_v3, %s4402_s14  ;;  %v7562_v3 = vld [vmem:[#allocation20_spill] sm:$0xff] }
 0x5f7   :  { %v431_v17 = vsel %vm429_vm14, %v428_v7, %v7562_v3  ;;  %v3384_v7 = vsel %vm60_vm0, %v3383_v37, %v7582_v46 }
 0x5f8   :  { %v6900_v42 = vpop.permute.xlu2 %3819  ;;  %v3778_v55 = vpop.permute.xlu0 %3777  ;;  %3937 = vrot.lane.b32.xlu1 %v3028_v58, %s4401_s13  ;;  %v7565_v58 = vld [vmem:[#allocation93_spill] sm:$0xff] }
 0x5fa   :  { %v3770_v47 = vpop.permute.xlu1 %3769 }
 0x5fb   :  { %v4119_v16 = vsel %vm426_vm13, %v4117_v36, %v3770_v47  ;;  %v7571_v36 = vld [vmem:[#allocation92_spill] sm:$0xff] }
 0x5fc   :  { %v4121_v40 = vsel %vm429_vm14, %v4119_v16, %v3778_v55  ;;  %v7575_v16 = vld [vmem:[#allocation37_spill] sm:$0xff] }
 0x5fd   :  { %v4123_v39 = vsel %vm432_vm15, %v4121_v40, %v6746_v62  ;;  %v3142_v62 = vsel %vm60_vm0, %v6781_v53, %v3141_v1  ;;  %v6948_v53 = vsel %vm432_vm15, %v431_v17, %v7563_v57  ;;  %v3371_v60 = vrot.slane %v7575_v16, 4  ;;  %v7578_v40 = vld [vmem:[#allocation63_spill] sm:$0xff] }
 0x5fe   :  { %v4201_v48 = vmul.f32 %v4123_v39, %v6919_v44  ;;  %3963 = vrot.lane.b32.xlu2 %v3146_v34, %s4404_s16  ;;  %3955 = vrot.lane.b32.xlu0 %v3144_v21, %s4403_s15  ;;  %v3531_v39 = vrot.slane %v7578_v40, 4  ;;  %v7579_v1 = vld [vmem:[#allocation107_spill] sm:$0xff]  ;;  %v3390_v57 = vperm.slane %v3384_v7, %v4457_v23 }
 0x600   :  { %4209 = vst [vmem:[#allocation2 + $0x8] sm:$0xff] %v4201_v48  ;;  %v6938_v13 = vpop.permute.xlu2 %3833  ;;  %v3788_v12 = vpop.permute.xlu0 %3787  ;;  %3947 = vrot.lane.b32.xlu1 %v3142_v62, %s4402_s14  ;;  %v7580_v48 = vld [vmem:[#allocation60_spill] sm:$0xff]  ;;  %v3372_v62 = vsel %vm60_vm0, %v3371_v60, %v7581_v26 }
 0x601   :  { %v3396_v38 = vsel %vm60_vm0, %v3395_v20, %v7580_v48  ;;  %v7589_v20 = vld [vmem:[#allocation58_spill] sm:$0xff] }
 0x602   :  { %v3780_v9 = vpop.permute.xlu1 %3779  ;;  %v3402_v17 = vperm.slane %v3396_v38, %v4457_v23  ;;  %v3385_v38 = vrot.slane %v7582_v46, 4 }
 0x603   :  { %v4122_v27 = vsel %vm429_vm14, %v4120_v32, %v3780_v9  ;;  %v7584_v32 = vld [vmem:[#allocation47_spill] sm:$0xff] }
 0x604   :  { %v4124_v33 = vsel %vm432_vm15, %v4122_v27, %v3788_v12  ;;  %v7583_v12 = vld [vmem:[#allocation66_spill] sm:$0xff]  ;;  %v3532_v9 = vsel %vm60_vm0, %v3531_v39, %v7584_v32  ;;  %v3378_v27 = vperm.slane %v3372_v62, %v4457_v23  ;;  %v7590_v62 = vld [vmem:[#allocation61_spill] sm:$0xff]  ;;  %v3386_v46 = vsel %vm60_vm0, %v7576_v52, %v3385_v38 }
 0x605   :  { %v4205_v61 = vmul.f32 %v4124_v33, %v6948_v53  ;;  %v3408_v3 = vsel %vm60_vm0, %v3407_v50, %v7583_v12 }
 0x606   :  { %3977 = vrot.lane.b32.xlu2 %v7564_v35, %s4406_s18  ;;  %3969 = vrot.lane.b32.xlu0 %v7565_v58, %s4405_s17  ;;  %v3414_v33 = vperm.slane %v3408_v3, %v4457_v23  ;;  %v7024_v35 = vperm.slane %v3532_v9, %v4471_v30  ;;  %v3445_v58 = vrot.slane %v3402_v17, 4  ;;  %v7591_v3 = vld [vmem:[#allocation75_spill] sm:$0xff]  ;;  %v3397_v9 = vrot.slane %v7580_v48, 4 }
 0x607   :  { %4213 = vst [vmem:[#allocation2 + $0x30] sm:$0xff] %v4205_v61  ;;  %v7585_v61 = vld [vmem:[#allocation86_spill] sm:$0xff] }
 0x608   :  { %v6959_v56 = vpop.permute.xlu2 %3843  ;;  %v6961_v0 = vpop.permute.xlu0 %3801  ;;  %3961 = vrot.lane.b32.xlu1 %v3034_v25, %s4404_s16  ;;  %v3446_v60 = vsel %vm60_vm0, %v3414_v33, %v3445_v58  ;;  %v3581_v37 = vrot.slane %v7024_v35, 4  ;;  %v3443_v50 = vrot.slane %v3414_v33, 4  ;;  %v3398_v48 = vsel %vm60_vm0, %v7572_v29, %v3397_v9 }
 0x609   :  { %v3394_v29 = vperm.slane %v3386_v46, %v4457_v23 }
 0x60a   :  { %v3794_v54 = vpop.permute.xlu1 %3793 }
 0x60e   :  { %3987 = vrot.lane.b32.xlu2 %v7566_v15, %s4407_s19  ;;  %3979 = vrot.lane.b32.xlu0 %v7567_v24, %s4406_s18  ;;  %v7587_v24 = vld [vmem:[#allocation89_spill] sm:$0xff] }
 0x610   :  { %v6968_v55 = vpop.permute.xlu2 %3857  ;;  %v6970_v10 = vpop.permute.xlu0 %3811  ;;  %3971 = vrot.lane.b32.xlu1 %v7568_v18, %s4405_s17  ;;  %v7588_v18 = vld [vmem:[#allocation34_spill] sm:$0xff] }
 0x612   :  { %v6974_v8 = vpop.permute.xlu1 %3803 }
 0x616   :  { %4001 = vrot.lane.b32.xlu2 %v7569_v22, %s4409_s21  ;;  %3993 = vrot.lane.b32.xlu0 %v7570_v2, %s4408_s20  ;;  %v7034_v22 = vperm.slane %v7588_v18, %v4471_v30  ;;  %v3421_v2 = vrot.slane %v3378_v27, 4 }
 0x618   :  { %v6980_v41 = vpop.permute.xlu0 %3825  ;;  %v6982_v19 = vpop.permute.xlu2 %3867  ;;  %3985 = vrot.lane.b32.xlu1 %v7571_v36, %s4407_s19  ;;  %v3419_v36 = vrot.slane %v3390_v57, 4  ;;  %v3422_v40 = vsel %vm60_vm0, %v3390_v57, %v3421_v2  ;;  %v3582_v39 = vsel %vm60_vm0, %v7034_v22, %v3581_v37  ;;  %v3409_v57 = vrot.slane %v7583_v12, 4 }
 0x61a   :  { %v6986_v47 = vpop.permute.xlu1 %3817  ;;  %v3420_v32 = vsel %vm60_vm0, %v3419_v36, %v3378_v27  ;;  %v3444_v27 = vsel %vm60_vm0, %v3443_v50, %v3402_v17  ;;  %v3373_v36 = vrot.slane %v7581_v26, 4 }
 0x61b   :  { %v7070_v18 = vperm.slane %v3420_v32, %v4471_v30  ;;  %v7078_v17 = vperm.slane %v3444_v27, %v4471_v30 }
 0x61d   :  { %v3469_v26 = vrot.slane %v7070_v18, 4 }
 0x61e   :  { %4011 = vrot.lane.b32.xlu2 %v7573_v28, %s4410_s22  ;;  %4003 = vrot.lane.b32.xlu0 %v7574_v11, %s4409_s21  ;;  %v2571_v28 = vrot.slane %v7589_v20, 4 }
 0x620   :  { %v6997_v34 = vpop.permute.xlu0 %3835  ;;  %v6999_v21 = vpop.permute.xlu2 %3881  ;;  %3995 = vrot.lane.b32.xlu1 %v7579_v1, %s4408_s20  ;;  %v3454_v1 = vperm.slane %v3446_v60, %v4471_v30  ;;  %v2572_v7 = vsel %vm60_vm0, %v2571_v28, %v7590_v62  ;;  %v3406_v28 = vperm.slane %v3398_v48, %v4457_v23  ;;  %v3131_v60 = vrot.slane %v6695_v6, 4 }
 0x621   :  { %v4125_v33 = vsel %vm340_vm1, %v2572_v7, %v3794_v54  ;;  %v3410_v54 = vsel %vm60_vm0, %v7577_v49, %v3409_v57  ;;  %v4128_v6 = vsel %vm343_vm2, %v6809_v4, %v6974_v8 }
 0x622   :  { %v7005_v43 = vpop.permute.xlu1 %3827  ;;  %v3471_v12 = vrot.slane %v3454_v1, 4  ;;  %v4127_v52 = vsel %vm343_vm2, %v4125_v33, %v6961_v0  ;;  %v3418_v49 = vperm.slane %v3410_v54, %v4457_v23  ;;  %v3457_v38 = vrot.slane %v3406_v28, 4  ;;  %v7593_v33 = vld [vmem:[#allocation96_spill] sm:$0xff] }
 0x623   :  { %v4129_v37 = vsel %vm346_vm3, %v4127_v52, %v6849_v5  ;;  %v3470_v5 = vsel %vm60_vm0, %v7078_v17, %v3469_v26  ;;  %v4130_v9 = vsel %vm346_vm3, %v4128_v6, %v6970_v10  ;;  %v7596_v52 = vld [vmem:[#allocation59_spill] sm:$0xff]  ;;  %v7599_v26 = vld [vmem:[#allocation42_spill] sm:$0xff] }
 0x624   :  { %v3455_v62 = vrot.slane %v3418_v49, 4  ;;  %v3458_v8 = vsel %vm60_vm0, %v3418_v49, %v3457_v38  ;;  %v7600_v38 = vld [vmem:[#allocation39_spill] sm:$0xff] }
 0x625   :  { %v7122_v48 = vperm.slane %v3458_v8, %v4471_v30 }
 0x626   :  { %4025 = vrot.lane.b32.xlu2 %v7585_v61, %s4412_s24  ;;  %4017 = vrot.lane.b32.xlu0 %v7586_v59, %s4411_s23  ;;  %v3430_v61 = vperm.slane %v3422_v40, %v4471_v30  ;;  %v4131_v40 = vsel %vm349_vm4, %v4129_v37, %v6986_v47  ;;  %v3132_v47 = vsel %vm60_vm0, %v3131_v60, %v6682_v31  ;;  %v3613_v31 = vrot.slane %v7593_v33, 4  ;;  %v7598_v37 = vld [vmem:[#allocation55_spill] sm:$0xff]  ;;  %v7602_v33 = vld [vmem:[#allocation44_spill] sm:$0xff] }
 0x628   :  { %v7026_v25 = vpop.permute.xlu0 %3849  ;;  %v7028_v15 = vpop.permute.xlu2 %3891  ;;  %4009 = vrot.lane.b32.xlu1 %v7587_v24, %s4410_s22  ;;  %v7592_v24 = vld [vmem:[#allocation108_spill] sm:$0xff]  ;;  %v3473_v20 = vrot.slane %v3430_v61, 4  ;;  %v3472_v0 = vsel %vm60_vm0, %v3471_v12, %v3430_v61  ;;  %v7594_v12 = vld [vmem:[#allocation23_spill] sm:$0xff] }
 0x62a   :  { %v7037_v11 = vpop.permute.xlu1 %3841  ;;  %v3474_v50 = vsel %vm60_vm0, %v3454_v1, %v3473_v20  ;;  %v3431_v1 = vrot.slane %v3394_v29, 4  ;;  %v7597_v20 = vld [vmem:[#allocation51_spill] sm:$0xff] }
 0x62e   :  { %4027 = vrot.lane.b32.xlu0 %v7591_v3, %s4412_s24  ;;  %4035 = vrot.lane.b32.xlu2 %v3582_v39, %s4398_s10  ;;  %v3374_v39 = vsel %vm60_vm0, %v7575_v16, %v3373_v36  ;;  %v4133_v16 = vsel %vm352_vm5, %v4131_v40, %v6980_v41  ;;  %v3456_v41 = vsel %vm60_vm0, %v3455_v62, %v3406_v28  ;;  %v3601_v28 = vrot.slane %v7597_v20, 4 }
 0x62f   :  { %v3382_v4 = vperm.slane %v3374_v39, %v4457_v23  ;;  %v4135_v46 = vsel %vm355_vm6, %v4133_v16, %v6938_v13  ;;  %v7595_v13 = vld [vmem:[#allocation54_spill] sm:$0xff]  ;;  %v3614_v36 = vsel %vm60_vm0, %v3613_v31, %v7596_v52  ;;  %v3607_v40 = vrot.slane %v7599_v26, 4 }
 0x630   :  { %v7058_v59 = vpop.permute.xlu2 %3905  ;;  %v7060_v58 = vpop.permute.xlu0 %3859  ;;  %4019 = vrot.lane.b32.xlu1 %v7592_v24, %s4411_s23  ;;  %v4132_v24 = vsel %vm349_vm4, %v4130_v9, %v6900_v42  ;;  %v4137_v27 = vsel %vm358_vm7, %v4135_v46, %v7037_v11  ;;  %v3462_v11 = vperm.slane %v3456_v41, %v4471_v30  ;;  %v3618_v39 = vperm.slane %v3614_v36, %v4457_v23 }
 0x631   :  { %v3432_v61 = vsel %vm60_vm0, %v3431_v1, %v3382_v4  ;;  %v3433_v10 = vrot.slane %v3382_v4, 4  ;;  %v4134_v54 = vsel %vm352_vm5, %v4132_v24, %v7005_v43  ;;  %v4139_v43 = vsel %vm411_vm9, %v4137_v27, %v7026_v25 }
 0x632   :  { %v7074_v2 = vpop.permute.xlu1 %3851  ;;  %v3438_v42 = vperm.slane %v3432_v61, %v4471_v30  ;;  %v3475_v1 = vrot.slane %v3462_v11, 4  ;;  %v3602_v62 = vsel %vm60_vm0, %v3601_v28, %v7600_v38  ;;  %v3625_v9 = vrot.slane %v3618_v39, 4 }
 0x633   :  { %v3434_v49 = vsel %vm60_vm0, %v3394_v29, %v3433_v10  ;;  %v4141_v29 = vsel %vm414_vm8, %v4139_v43, %v6968_v55  ;;  %v3595_v31 = vrot.slane %v7602_v33, 4  ;;  %v3606_v61 = vperm.slane %v3602_v62, %v4457_v23  ;;  %v7606_v43 = vld [vmem:[#allocation43_spill] sm:$0xff] }
 0x634   :  { %v3442_v25 = vperm.slane %v3434_v49, %v4471_v30  ;;  %v7604_v49 = vld [vmem:[#allocation77_spill] sm:$0xff]  ;;  %v7610_v62 = vld [vmem:[#allocation99_spill] sm:$0xff] }
 0x635   :  { %v3619_v52 = vrot.slane %v3606_v61, 4 }
 0x636   :  { %4041 = vrot.lane.b32.xlu0 %v3472_v0, %s4400_s12  ;;  %4049 = vrot.lane.b32.xlu2 %v3474_v50, %s4399_s11  ;;  %v4136_v0 = vsel %vm355_vm6, %v4134_v54, %v6997_v34  ;;  %v3479_v50 = vrot.slane %v7122_v48, 4  ;;  %v7603_v54 = vld [vmem:[#allocation26_spill] sm:$0xff] }
 0x637   :  { %v4138_v34 = vsel %vm358_vm7, %v4136_v0, %v6959_v56  ;;  %v7607_v0 = vld [vmem:[#allocation103_spill] sm:$0xff] }
 0x638   :  { %v3916_v7 = vpop.permute.xlu2 %3915  ;;  %v3874_v3 = vpop.permute.xlu0 %3873  ;;  %4033 = vrot.lane.b32.xlu1 %v3470_v5, %s4398_s10  ;;  %v3477_v5 = vrot.slane %v3438_v42, 4  ;;  %v4140_v4 = vsel %vm411_vm9, %v4138_v34, %v7074_v2  ;;  %v3480_v8 = vsel %vm60_vm0, %v3479_v50, %v3442_v25  ;;  %v3633_v50 = vrot.slane %v7607_v0, 4 }
 0x639   :  { %v7106_v32 = vsel %vm340_vm1, %v3132_v47, %v3916_v7  ;;  %v7601_v7 = vld [vmem:[#allocation50_spill] sm:$0xff]  ;;  %v4142_v2 = vsel %vm414_vm8, %v4140_v4, %v7060_v58 }
 0x63a   :  { %v3866_v57 = vpop.permute.xlu1 %3865  ;;  %v3608_v16 = vsel %vm60_vm0, %v3607_v40, %v7601_v7  ;;  %v3478_v55 = vsel %vm60_vm0, %v3462_v11, %v3477_v5  ;;  %v7608_v40 = vld [vmem:[#allocation25_spill] sm:$0xff]  ;;  %v3634_v34 = vsel %vm60_vm0, %v3633_v50, %v7610_v62 }
 0x63b   :  { %v4143_v47 = vsel %vm417_vm10, %v4141_v29, %v3866_v57  ;;  %v3476_v57 = vsel %vm60_vm0, %v3475_v1, %v3438_v42  ;;  %v3612_v46 = vperm.slane %v3608_v16, %v4457_v23 }
 0x63c   :  { %v4145_v56 = vsel %vm420_vm11, %v4143_v47, %v3874_v3  ;;  %v3596_v3 = vsel %vm60_vm0, %v3595_v31, %v7603_v54  ;;  %v7611_v31 = vld [vmem:[#allocation29_spill] sm:$0xff] }
 0x63d   :  { %v4147_v24 = vsel %vm423_vm12, %v4145_v56, %v6999_v21  ;;  %v3626_v10 = vsel %vm60_vm0, %v3625_v9, %v3612_v46  ;;  %v3600_v20 = vperm.slane %v3596_v3, %v4457_v23  ;;  %v3638_v9 = vperm.slane %v3634_v34, %v4457_v23 }
 0x63e   :  { %4051 = vrot.lane.b32.xlu0 %v7594_v12, %s4399_s11  ;;  %4059 = vrot.lane.b32.xlu2 %v7595_v13, %s4401_s13  ;;  %v4144_v12 = vsel %vm417_vm10, %v4142_v2, %v6982_v19  ;;  %v3630_v11 = vperm.slane %v3626_v10, %v4471_v30  ;;  %v7605_v19 = vld [vmem:[#allocation28_spill] sm:$0xff]  ;;  %v3668_v56 = vperm.slane %v7611_v31, %v4471_v30 }
 0x63f   :  { %v3620_v39 = vsel %vm60_vm0, %v3619_v52, %v3600_v20 }
 0x640   :  { %v3884_v60 = vpop.permute.xlu0 %3883  ;;  %4043 = vrot.lane.b32.xlu1 %v7598_v37, %s4400_s12  ;;  %v3930_v36 = vpop.permute.xlu2 %3929  ;;  %v3639_v37 = vrot.slane %v7606_v43, 4  ;;  %v3631_v5 = vrot.slane %v3630_v11, 4  ;;  %v3624_v47 = vperm.slane %v3620_v39, %v4471_v30 }
 0x642   :  { %v3876_v6 = vpop.permute.xlu1 %3875 }
 0x643   :  { %v4146_v58 = vsel %vm420_vm11, %v4144_v12, %v3876_v6  ;;  %v7609_v6 = vld [vmem:[#allocation98_spill] sm:$0xff] }
 0x644   :  { %v4148_v26 = vsel %vm423_vm12, %v4146_v58, %v3884_v60  ;;  %v3640_v29 = vsel %vm60_vm0, %v3639_v37, %v7609_v6 }
 0x645   :  { %v4150_v1 = vsel %vm426_vm13, %v4148_v26, %v7028_v15  ;;  %v3644_v7 = vperm.slane %v3640_v29, %v4457_v23 }
 0x646   :  { %4065 = vrot.lane.b32.xlu0 %v3478_v55, %s4402_s14  ;;  %4073 = vrot.lane.b32.xlu2 %v3480_v8, %s4403_s15  ;;  %v3632_v55 = vsel %vm60_vm0, %v3631_v5, %v3624_v47  ;;  %v3481_v8 = vrot.slane %v3442_v25, 4  ;;  %v3669_v25 = vrot.slane %v3668_v56, 4 }
 0x648   :  { %v3898_v41 = vpop.permute.xlu0 %3897  ;;  %4057 = vrot.lane.b32.xlu1 %v3476_v57, %s4401_s13  ;;  %v3940_v15 = vpop.permute.xlu2 %3939  ;;  %v3482_v33 = vsel %vm60_vm0, %v7122_v48, %v3481_v8  ;;  %v3657_v57 = vrot.slane %v3644_v7, 4 }
 0x64a   :  { %v3890_v27 = vpop.permute.xlu1 %3889  ;;  %v3658_v2 = vsel %vm60_vm0, %v3657_v57, %v3638_v9 }
 0x64b   :  { %v4149_v13 = vsel %vm426_vm13, %v4147_v24, %v3890_v27  ;;  %v3662_v23 = vperm.slane %v3658_v2, %v4471_v30 }
 0x64c   :  { %v4151_v42 = vsel %vm429_vm14, %v4149_v13, %v3898_v41 }
 0x64d   :  { %v4153_v21 = vsel %vm432_vm15, %v4151_v42, %v7058_v59  ;;  %v3670_v41 = vsel %vm60_vm0, %v3669_v25, %v3662_v23  ;;  %v3019_v42 = vrot.slane %v6768_v63, 4 }
 0x64e   :  { %v4202_v28 = vmul.f32 %v4153_v21, %v6919_v44  ;;  %4075 = vrot.lane.b32.xlu0 %v7604_v49, %s4403_s15  ;;  %4083 = vrot.lane.b32.xlu2 %v7605_v19, %s4404_s16 }
 0x64f   :  { %v3020_v30 = vsel %vm60_vm0, %v3019_v42, %v6716_v45 }
 0x650   :  { %4210 = vst [vmem:[#allocation2 + $0x10] sm:$0xff] %v4202_v28  ;;  %v3908_v59 = vpop.permute.xlu0 %3907  ;;  %4067 = vrot.lane.b32.xlu1 %v7608_v40, %s4402_s14  ;;  %v3954_v24 = vpop.permute.xlu2 %3953 }
 0x652   :  { %v3900_v38 = vpop.permute.xlu1 %3899 }
 0x653   :  { %v4152_v60 = vsel %vm429_vm14, %v4150_v1, %v3900_v38 }
 0x654   :  { %v4154_v16 = vsel %vm432_vm15, %v4152_v60, %v3908_v59 }
 0x655   :  { %v4206_v4 = vmul.f32 %v4154_v16, %v6948_v53 }
 0x656   :  { %4089 = vrot.lane.b32.xlu0 %v3632_v55, %s4405_s17 }
 0x657   :  { %4214 = vst [vmem:[#allocation2 + $0x38] sm:$0xff] %v4206_v4 }
 0x658   :  { %v3922_v61 = vpop.permute.xlu0 %3921  ;;  %4081 = vrot.lane.b32.xlu1 %v3482_v33, %s4404_s16  ;;  %v3964_v54 = vpop.permute.xlu2 %3963 }
 0x65a   :  { %v3914_v46 = vpop.permute.xlu1 %3913 }
 0x65b   :  { %v4155_v20 = vsel %vm340_vm1, %v3020_v30, %v3914_v46 }
 0x65c   :  { %v4157_v49 = vsel %vm343_vm2, %v4155_v20, %v3922_v61 }
 0x65d   :  { %v4159_v43 = vsel %vm346_vm3, %v4157_v49, %v3930_v36 }
 0x660   :  { %v3932_v27 = vpop.permute.xlu0 %3931  ;;  %4091 = vrot.lane.b32.xlu1 %v3670_v41, %s4405_s17  ;;  %v3978_v52 = vpop.permute.xlu2 %3977 }
 0x662   :  { %v3924_v48 = vpop.permute.xlu1 %3923 }
 0x663   :  { %v4158_v0 = vsel %vm343_vm2, %v7106_v32, %v3924_v48 }
 0x664   :  { %v4160_v45 = vsel %vm346_vm3, %v4158_v0, %v3932_v27 }
 0x665   :  { %v4162_v39 = vsel %vm349_vm4, %v4160_v45, %v3940_v15 }
 0x668   :  { %v3946_v10 = vpop.permute.xlu0 %3945  ;;  %v3988_v11 = vpop.permute.xlu2 %3987 }
 0x66a   :  { %v3938_v3 = vpop.permute.xlu1 %3937 }
 0x66b   :  { %v4161_v37 = vsel %vm349_vm4, %v4159_v43, %v3938_v3 }
 0x66c   :  { %v4163_v26 = vsel %vm352_vm5, %v4161_v37, %v3946_v10 }
 0x66d   :  { %v4165_v40 = vsel %vm355_vm6, %v4163_v26, %v3954_v24 }
 0x670   :  { %v3956_v12 = vpop.permute.xlu0 %3955  ;;  %v4002_v50 = vpop.permute.xlu2 %4001 }
 0x672   :  { %v3948_v13 = vpop.permute.xlu1 %3947 }
 0x673   :  { %v4164_v36 = vsel %vm352_vm5, %v4162_v39, %v3948_v13  ;;  %v3467_v13 = vrot.slane %v7078_v17, 4 }
 0x674   :  { %v4166_v32 = vsel %vm355_vm6, %v4164_v36, %v3956_v12 }
 0x675   :  { %v4168_v34 = vsel %vm358_vm7, %v4166_v32, %v3964_v54  ;;  %v3468_v42 = vsel %vm60_vm0, %v3467_v13, %v7070_v18 }
 0x678   :  { %v3970_v58 = vpop.permute.xlu0 %3969  ;;  %v4012_v1 = vpop.permute.xlu2 %4011 }
 0x67a   :  { %v3962_v21 = vpop.permute.xlu1 %3961 }
 0x67b   :  { %v4167_v6 = vsel %vm358_vm7, %v4165_v40, %v3962_v21 }
 0x67c   :  { %v4169_v29 = vsel %vm411_vm9, %v4167_v6, %v3970_v58 }
 0x67d   :  { %v4171_v62 = vsel %vm414_vm8, %v4169_v29, %v3978_v52 }
 0x680   :  { %v3980_v28 = vpop.permute.xlu0 %3979  ;;  %v4026_v33 = vpop.permute.xlu2 %4025 }
 0x682   :  { %v3972_v19 = vpop.permute.xlu1 %3971 }
 0x683   :  { %v4170_v47 = vsel %vm411_vm9, %v4168_v34, %v3972_v19 }
 0x684   :  { %v4172_v16 = vsel %vm414_vm8, %v4170_v47, %v3980_v28 }
 0x685   :  { %v4174_v9 = vsel %vm417_vm10, %v4172_v16, %v3988_v11  ;;  %v3579_v11 = vrot.slane %v7034_v22, 4 }
 0x687   :  { %v3580_v49 = vsel %vm60_vm0, %v3579_v11, %v7024_v35 }
 0x688   :  { %v3994_v63 = vpop.permute.xlu0 %3993  ;;  %v4036_v10 = vpop.permute.xlu2 %4035 }
 0x689   :  { %v4186_v17 = vsel %vm340_vm1, %v3580_v49, %v4036_v10 }
 0x68a   :  { %v3986_v59 = vpop.permute.xlu1 %3985 }
 0x68b   :  { %v4173_v60 = vsel %vm417_vm10, %v4171_v62, %v3986_v59 }
 0x68c   :  { %v4175_v7 = vsel %vm420_vm11, %v4173_v60, %v3994_v63 }
 0x68d   :  { %v4177_v55 = vsel %vm423_vm12, %v4175_v7, %v4002_v50 }
 0x690   :  { %v4004_v5 = vpop.permute.xlu0 %4003 }
 0x692   :  { %v3996_v38 = vpop.permute.xlu1 %3995 }
 0x693   :  { %v4176_v31 = vsel %vm420_vm11, %v4174_v9, %v3996_v38 }
 0x694   :  { %v4178_v46 = vsel %vm423_vm12, %v4176_v31, %v4004_v5 }
 0x695   :  { %v4180_v25 = vsel %vm426_vm13, %v4178_v46, %v4012_v1 }
 0x698   :  { %v4018_v4 = vpop.permute.xlu0 %4017 }
 0x69a   :  { %v4010_v8 = vpop.permute.xlu1 %4009 }
 0x69b   :  { %v4179_v15 = vsel %vm426_vm13, %v4177_v55, %v4010_v8 }
 0x69c   :  { %v4181_v56 = vsel %vm429_vm14, %v4179_v15, %v4018_v4 }
 0x69d   :  { %v4183_v57 = vsel %vm432_vm15, %v4181_v56, %v4026_v33 }
 0x69e   :  { %v4203_v61 = vmul.f32 %v4183_v57, %v6919_v44  ;;  %v4050_v44 = vpop.permute.xlu2 %4049 }
 0x6a0   :  { %4211 = vst [vmem:[#allocation2 + $0x18] sm:$0xff] %v4203_v61  ;;  %v4028_v2 = vpop.permute.xlu0 %4027 }
 0x6a2   :  { %v4020_v23 = vpop.permute.xlu1 %4019 }
 0x6a3   :  { %v4182_v41 = vsel %vm429_vm14, %v4180_v25, %v4020_v23 }
 0x6a4   :  { %v4184_v24 = vsel %vm432_vm15, %v4182_v41, %v4028_v2 }
 0x6a5   :  { %v4207_v27 = vmul.f32 %v4184_v24, %v6948_v53 }
 0x6a6   :  { %v4060_v21 = vpop.permute.xlu2 %4059 }
 0x6a7   :  { %4215 = vst [vmem:[#allocation2 + $0x40] sm:$0xff] %v4207_v27 }
 0x6a8   :  { %v4042_v48 = vpop.permute.xlu0 %4041 }
 0x6aa   :  { %v4034_v54 = vpop.permute.xlu1 %4033 }
 0x6ab   :  { %v4185_v30 = vsel %vm340_vm1, %v3468_v42, %v4034_v54 }
 0x6ac   :  { %v4187_v53 = vsel %vm343_vm2, %v4185_v30, %v4042_v48 }
 0x6ad   :  { %v4189_v19 = vsel %vm346_vm3, %v4187_v53, %v4050_v44 }
 0x6ae   :  { %v4074_v37 = vpop.permute.xlu2 %4073 }
 0x6b0   :  { %v4052_v3 = vpop.permute.xlu0 %4051 }
 0x6b2   :  { %v4044_v12 = vpop.permute.xlu1 %4043 }
 0x6b3   :  { %v4188_v18 = vsel %vm343_vm2, %v4186_v17, %v4044_v12 }
 0x6b4   :  { %v4190_v22 = vsel %vm346_vm3, %v4188_v18, %v4052_v3 }
 0x6b5   :  { %v4192_v26 = vsel %vm349_vm4, %v4190_v22, %v4060_v21 }
 0x6b6   :  { %v4084_v36 = vpop.permute.xlu2 %4083 }
 0x6b8   :  { %v4066_v52 = vpop.permute.xlu0 %4065 }
 0x6ba   :  { %v4058_v58 = vpop.permute.xlu1 %4057 }
 0x6bb   :  { %v4191_v43 = vsel %vm349_vm4, %v4189_v19, %v4058_v58 }
 0x6bc   :  { %v4193_v0 = vsel %vm352_vm5, %v4191_v43, %v4066_v52 }
 0x6bd   :  { %v4195_v50 = vsel %vm355_vm6, %v4193_v0, %v4074_v37 }
 0x6c0   :  { %v4076_v20 = vpop.permute.xlu0 %4075 }
 0x6c2   :  { %v4068_v28 = vpop.permute.xlu1 %4067 }
 0x6c3   :  { %v4194_v59 = vsel %vm352_vm5, %v4192_v26, %v4068_v28 }
 0x6c4   :  { %v4196_v6 = vsel %vm355_vm6, %v4194_v59, %v4076_v20 }
 0x6c5   :  { %v4198_v29 = vsel %vm358_vm7, %v4196_v6, %v4084_v36 }
 0x6c8   :  { %v4090_v45 = vpop.permute.xlu0 %4089 }
 0x6ca   :  { %v4082_v63 = vpop.permute.xlu1 %4081 }
 0x6cb   :  { %v4197_v35 = vsel %vm358_vm7, %v4195_v50, %v4082_v63 }
 0x6cc   :  { %v4199_v40 = vsel %vm411_vm9, %v4197_v35, %v4090_v45 }
 0x6cd   :  { %v4204_v39 = vmul.f32 %v4199_v40, %v6844_v14 }
 0x6cf   :  { %4212 = vst.msk [vmem:[#allocation2 + $0x20] sm:$0xff] %vm414_vm8, %v4204_v39 }
 0x6d2   :  { %v4092_v5 = vpop.permute.xlu1 %4091 }
 0x6d3   :  { %v4200_v32 = vsel %vm411_vm9, %v4198_v29, %v4092_v5 }
 0x6d4   :  { %v4208_v1 = vmul.f32 %v4200_v32, %v6884_v51 }
 0x6d6   :  { %4216 = vst.msk [vmem:[#allocation2 + $0x48] sm:$0xff] %vm414_vm8, %v4208_v1 }
 0x6d7   :  { %4229 = dma.vmem_to_hbm [thread:$0]  %s4222_s3, 1280, %s4224_s30, [#allocation3], %s4414_s4, %s4414_s4, %s4402_s14  }
 0x6d8   :  { %4394 = dma.done.wait [#allocation3], 1280  }
 0x6d9   :  { %4395 = vsyncadd [#allocation3], 4294966016 }
 0x6da   :  { %4234 = vsyncpa [#allocation3], 1 }

</bundles_post_ra>
